<compile_context>
chip_gen: v5e
topology: v5e:2x2
jax: 0.10.0
libtpu: 0.0.40
codegen_flags: <defaults>
</compile_context>

<pallas_src>
import math
import functools
import numpy as np

import jax
import jax.numpy as jnp
from jax import lax
from jax.experimental import pallas as pl
from jax.experimental.pallas import tpu as pltpu


# --------------------------------- kernel ------------------------------------

def gcn_topk_kernel(x_ref, adj_ref, act_ref, kf_ref,
                    w1_ref, b1_ref, p1_ref,
                    w2_ref, b2_ref, p2_ref,
                    w3_ref, b3_ref, p3_ref,
                    wo_ref, bo_ref,
                    out_ref):
    adj = adj_ref[...]                                   # [Gb, Nm, Nm] bf16
    Gb, Nm, _ = adj.shape
    act0 = act_ref[...]                                  # [Gb, Nm, 1]  f32
    kf = kf_ref[...]                                     # [Gb, 1, 4]   f32
    k1 = kf[:, :, 1:2]                                   # [Gb, 1, 1]
    k2 = kf[:, :, 2:3]
    k3 = kf[:, :, 3:4]

    # tie-break: lower index wins on equal scores -> beats[g, i, j] requires (j < i)
    tie_lt = (lax.broadcasted_iota(jnp.int32, (1, Nm, Nm), 2)
              < lax.broadcasted_iota(jnp.int32, (1, Nm, Nm), 1))

    def conv(xin, W, b, active):
        # X W as one tall bf16 MXU matmul with f32 accumulation.
        h = jnp.dot(xin.astype(jnp.bfloat16).reshape(Gb * Nm, -1), W,
                    preferred_element_type=jnp.float32).reshape(Gb, Nm, -1)
        # Degree of the pooled (masked) graph, +1 for the self loop.  VPU row-sum:
        # avoids a second full MXU/DMA pass over adj for a width-1 matvec.
        act_row = active.reshape(Gb, 1, Nm)
        deg = jnp.sum(adj * act_row, axis=-1, keepdims=True) + 1.0        # [Gb,Nm,1] f32
        dinv = lax.rsqrt(deg)
        hs = dinv * h
        # Dropped / padded source rows of hs are exactly zero, so the column mask of the
        # pooled adjacency is applied implicitly; no row mask needed either because the
        # pool multiplies dropped rows by sel == 0 afterwards.
        agg = jnp.einsum('gij,gjf->gif', adj, hs.astype(jnp.bfloat16),
                         preferred_element_type=jnp.float32)
        return dinv * (agg + hs) + b

    def pool(h, p_row, active, k_f):
        # TopKPooling(nonlinearity=sigmoid): score = sigmoid(h . w/||w||); keep top-k
        # among active nodes; x <- x * score * keep_mask.
        score = jax.nn.sigmoid(jnp.sum(h * p_row, axis=-1, keepdims=True))  # [Gb,Nm,1]
        # fold the active mask into the ranking key: inactive scores -> -1 never win,
        # and their rank >= n_active >= k so they are never selected.
        key = jnp.where(active > 0.5, score, -1.0)
        key_row = key.reshape(Gb, 1, Nm)
        beats = jnp.logical_or(key_row > key,
                               jnp.logical_and(key_row == key, tie_lt)
                               ).astype(jnp.float32)                       # [Gb,Nm,Nm]
        rank = jnp.sum(beats, axis=-1, keepdims=True)                      # [Gb,Nm,1]
        sel = (rank < k_f).astype(jnp.float32)
        return h * score * sel, sel

    h = conv(x_ref[...], w1_ref[...], b1_ref[...], act0)
    h, sel1 = pool(h, p1_ref[...], act0, k1)
    h = jnp.maximum(h, 0.0)

    h = conv(h, w2_ref[...], b2_ref[...], sel1)
    h, sel2 = pool(h, p2_ref[...], sel1, k2)
    h = jnp.maximum(h, 0.0)

    h = conv(h, w3_ref[...], b3_ref[...], sel2)
    h, _sel3 = pool(h, p3_ref[...], sel2, k3)
    h = jnp.maximum(h, 0.0)

    # readout: dropped/padded rows of h are exactly 0 and kept rows are >= 0 (post-ReLU),
    # so plain max / sum over the padded block equal the masked per-graph reductions.
    gmax = jnp.max(h, axis=1, keepdims=True)                               # [Gb,1,F]
    gap = jnp.sum(h, axis=1, keepdims=True) / k3                           # [Gb,1,F]
    feat = jnp.concatenate([gmax, gap], axis=-1)                           # [Gb,1,2F]
    logit = jnp.sum(feat * wo_ref[...], axis=-1, keepdims=True) + bo_ref[...]
    prob = jax.nn.sigmoid(logit)                                           # [Gb,1,1]

    pad = out_ref.shape[-1] - feat.shape[-1] - 1                           # static
    parts = [feat, prob]
    if pad > 0:
        parts.append(jnp.zeros((Gb, 1, pad), jnp.float32))
    out_ref[...] = jnp.concatenate(parts, axis=-1)                         # lane-dense store


# --------------------------------- wrapper ------------------------------------

def init_params(key, indim, features):
    ks = jax.random.split(key, 8)

    def glorot(k, shape):
        lim = math.sqrt(6.0 / (shape[0] + shape[1]))
        return jax.random.uniform(k, shape, jnp.float32, -lim, lim)

    return dict(
        W1=glorot(ks[0], (indim, features)), b1=jnp.zeros((1, features), jnp.float32),
        p1=jax.random.normal(ks[1], (features, 1), jnp.float32),
        W2=glorot(ks[2], (features, features)), b2=jnp.zeros((1, features), jnp.float32),
        p2=jax.random.normal(ks[3], (features, 1), jnp.float32),
        W3=glorot(ks[4], (features, features)), b3=jnp.zeros((1, features), jnp.float32),
        p3=jax.random.normal(ks[5], (features, 1), jnp.float32),
        Wout=glorot(ks[6], (2 * features, 1)), bout=jnp.zeros((1, 1), jnp.float32),
    )


def prepare_graph(edge_index, edge_weight, batch_index, num_graphs, ratio):
    """One-time host-side preprocessing (fixed topology + batch): dense per-graph bf16
    adjacency, node->(graph, slot) maps, pad masks and static per-graph TopK sizes.
    Keeps the per-call forward path jittable and free of device->host syncs."""
    bidx = np.asarray(batch_index).astype(np.int64)
    ei = np.asarray(edge_index).astype(np.int64)
    ew = np.asarray(edge_weight, dtype=np.float32)
    G = int(num_graphs)

    n0 = np.bincount(bidx, minlength=G).astype(np.int64)
    Nm = max(int(n0.max()), 1)
    Nm = int(-(-Nm // 16) * 16)                 # multiple of 16: bf16 sublane packing

    # graphs per grid step: amortize the ~0.35 us/step cost and make the flattened
    # (Gb*Nm, Din)@(Din,F) matmul tall enough for the MXU; cap by the double-buffered
    # bf16 adjacency footprint so VMEM stays comfortable on v7x (64 MiB / TC).
    gb_mxu = max(1, -(-256 // Nm))
    gb_vmem = max(1, (24 * 1024 * 1024) // (2 * 2 * Nm * Nm))
    Gb = max(1, min(G, gb_mxu, gb_vmem))
    nblk = -(-G // Gb)
    G_pad = nblk * Gb                           # pad with dummy 1-node graphs

    slot = np.zeros(bidx.shape[0], dtype=np.int64)
    counters = np.zeros(G, dtype=np.int64)
    for i, gg in enumerate(bidx):
        slot[i] = counters[gg]
        counters[gg] += 1

    adj = np.zeros((G_pad, Nm, Nm), dtype=np.float32)
    src, dst = ei[0], ei[1]
    np.add.at(adj, (bidx[dst], slot[dst], slot[src]), ew)   # adj[g, dst, src] += w

    n0p = np.ones(G_pad, dtype=np.int64)        # dummy graphs: 1 node, keep 1
    n0p[:G] = n0
    n1 = np.maximum(np.ceil(ratio * n0p).astype(np.int64), 1)
    n2 = np.maximum(np.ceil(ratio * n1).astype(np.int64), 1)
    n3 = np.maximum(np.ceil(ratio * n2).astype(np.int64), 1)
    kf = np.stack([n0p, n1, n2, n3], axis=1).astype(np.float32).reshape(G_pad, 1, 4)
    act0 = (np.arange(Nm)[None, :] < n0p[:, None]).astype(np.float32).reshape(G_pad, Nm, 1)

    return dict(
        num_graphs=G, num_graphs_padded=G_pad, graphs_per_block=Gb, max_nodes=Nm,
        graph_of_node=jnp.asarray(bidx, jnp.int32),
        slot_of_node=jnp.asarray(slot, jnp.int32),
        adj=jnp.asarray(adj).astype(jnp.bfloat16),
        act0=jnp.asarray(act0),
        kf=jnp.asarray(kf),
    )


@functools.partial(jax.jit, static_argnames=("num_graphs", "num_graphs_padded",
                                              "max_nodes", "graphs_per_block"))
def _forward(params, x, graph_of_node, slot_of_node, adj, act0, kf,
             num_graphs, num_graphs_padded, max_nodes, graphs_per_block):
    G, Gp, Nm, Gb = num_graphs, num_graphs_padded, max_nodes, graphs_per_block
    Din = x.shape[1]
    F = params["W1"].shape[1]
    LPAD = max(128, ((2 * F + 1 + 127) // 128) * 128)

    # scatter node features into the padded per-graph layout [Gp, Nm, Din] (bf16 stream)
    x_p = jnp.zeros((Gp, Nm, Din), jnp.bfloat16).at[graph_of_node, slot_of_node].set(
        x.astype(jnp.bfloat16))

    # pre-normalize TopK score vectors: sigmoid(x . w / ||w||) == sigmoid(x @ (w/||w||))
    p1n = (params["p1"] / jnp.linalg.norm(params["p1"])).reshape(1, F)
    p2n = (params["p2"] / jnp.linalg.norm(params["p2"])).reshape(1, F)
    p3n = (params["p3"] / jnp.linalg.norm(params["p3"])).reshape(1, F)
    w1 = params["W1"].astype(jnp.bfloat16)
    w2 = params["W2"].astype(jnp.bfloat16)
    w3 = params["W3"].astype(jnp.bfloat16)
    wo = params["Wout"].reshape(1, 2 * F)

    # VMEM budget derived from the actual (double-buffered) tiles, capped for v7x 64 MiB/TC.
    blk_bytes = Gb * Nm * Nm * 2 + Gb * Nm * max(Din, F) * 2 + Gb * LPAD * 4
    tmp_bytes = 3 * Gb * Nm * Nm * 4 + 4 * Gb * Nm * F * 4
    vmem_limit = int(min(max(2 * blk_bytes + tmp_bytes + (4 << 20), 32 << 20), 56 << 20))

    grid_spec = pltpu.PrefetchScalarGridSpec(
        num_scalar_prefetch=0,
        grid=(Gp // Gb,),
        in_specs=[
            pl.BlockSpec((Gb, Nm, Din), lambda i: (i, 0, 0)),
            pl.BlockSpec((Gb, Nm, Nm), lambda i: (i, 0, 0)),
            pl.BlockSpec((Gb, Nm, 1), lambda i: (i, 0, 0)),
            pl.BlockSpec((Gb, 1, 4), lambda i: (i, 0, 0)),
            pl.BlockSpec((Din, F), lambda i: (0, 0)),
            pl.BlockSpec((1, F), lambda i: (0, 0)),
            pl.BlockSpec((1, F), lambda i: (0, 0)),
            pl.BlockSpec((F, F), lambda i: (0, 0)),
            pl.BlockSpec((1, F), lambda i: (0, 0)),
            pl.BlockSpec((1, F), lambda i: (0, 0)),
            pl.BlockSpec((F, F), lambda i: (0, 0)),
            pl.BlockSpec((1, F), lambda i: (0, 0)),
            pl.BlockSpec((1, F), lambda i: (0, 0)),
            pl.BlockSpec((1, 2 * F), lambda i: (0, 0)),
            pl.BlockSpec((1, 1), lambda i: (0, 0)),
        ],
        out_specs=pl.BlockSpec((Gb, 1, LPAD), lambda i: (i, 0, 0)),
    )

    out_slab = pl.pallas_call(
        gcn_topk_kernel,
        out_shape=jax.ShapeDtypeStruct((Gp, 1, LPAD), jnp.float32),
        grid_spec=grid_spec,
        compiler_params=pltpu.CompilerParams(
            dimension_semantics=("parallel",),      # v7x: graph blocks split across 2 TCs
            vmem_limit_bytes=vmem_limit),
    )(x_p, adj, act0, kf,
      w1, params["b1"], p1n,
      w2, params["b2"], p2n,
      w3, params["b3"], p3n,
      wo, params["bout"])

    feat = out_slab[:G, 0, :2 * F]
    out = out_slab[:G, 0, 2 * F:2 * F + 1]
    return out, feat


def two_layer_gcn_with_pooling(params, x, meta):
    return _forward(params, x, meta["graph_of_node"], meta["slot_of_node"],
                    meta["adj"], meta["act0"], meta["kf"],
                    num_graphs=meta["num_graphs"],
                    num_graphs_padded=meta["num_graphs_padded"],
                    max_nodes=meta["max_nodes"],
                    graphs_per_block=meta["graphs_per_block"])


# ---------------------------------- main --------------------------------------

if __name__ == "__main__":
    indim, features, ratio = 16, 32, 0.5
    nodes_per_graph, num_graphs = 16, 2
    N = nodes_per_graph * num_graphs

    key = jax.random.PRNGKey(0)
    k_x, k_w, k_p = jax.random.split(key, 3)

    x = jax.random.normal(k_x, (N, indim), jnp.float32)
    batch_index = np.repeat(np.arange(num_graphs, dtype=np.int32), nodes_per_graph)

    # deterministic undirected edges: per graph a ring + random chords (both directions)
    rng = np.random.default_rng(0)
    src, dst = [], []
    for g in range(num_graphs):
        base = g * nodes_per_graph
        for i in range(nodes_per_graph):
            j = (i + 1) % nodes_per_graph
            src += [base + i, base + j]
            dst += [base + j, base + i]
        for _ in range(nodes_per_graph):
            a, b = rng.integers(0, nodes_per_graph, size=2)
            if a == b:
                b = (a + 3) % nodes_per_graph
            src += [base + a, base + b]
            dst += [base + b, base + a]
    edge_index = np.array([src, dst], dtype=np.int32)
    E = edge_index.shape[1]
    w_half = jax.random.uniform(k_w, (E // 2,), jnp.float32, 0.1, 1.0)
    edge_weight = jnp.repeat(w_half, 2)            # symmetric weights

    params = init_params(k_p, indim, features)

    # one-time host-side preprocessing (topology + batch fixed); hot path below is jitted
    meta = prepare_graph(edge_index, np.asarray(edge_weight), batch_index,
                         num_graphs, ratio)

    out, feat = two_layer_gcn_with_pooling(params, x, meta)
    out = jax.block_until_ready(out)
    feat = jax.block_until_ready(feat)

    assert out.shape == (num_graphs, 1) and feat.shape == (num_graphs, 2 * features)
    assert bool(jnp.all(jnp.isfinite(out))) and bool(jnp.all(jnp.isfinite(feat)))
    print("KERNEL_OK")
</pallas_src>

<mosaic_0001>
module attributes {stable_mosaic.version = 11 : i64} {
  func.func @gcn_topk_kernel(%arg0: i32, %arg1: memref<2x16x16xbf16, #tpu.memory_space<vmem>>, %arg2: memref<2x16x16xbf16, #tpu.memory_space<vmem>>, %arg3: memref<2x16x1xf32, #tpu.memory_space<vmem>>, %arg4: memref<2x1x4xf32, #tpu.memory_space<vmem>>, %arg5: memref<16x32xbf16, #tpu.memory_space<vmem>>, %arg6: memref<1x32xf32, #tpu.memory_space<vmem>>, %arg7: memref<1x32xf32, #tpu.memory_space<vmem>>, %arg8: memref<32x32xbf16, #tpu.memory_space<vmem>>, %arg9: memref<1x32xf32, #tpu.memory_space<vmem>>, %arg10: memref<1x32xf32, #tpu.memory_space<vmem>>, %arg11: memref<32x32xbf16, #tpu.memory_space<vmem>>, %arg12: memref<1x32xf32, #tpu.memory_space<vmem>>, %arg13: memref<1x32xf32, #tpu.memory_space<vmem>>, %arg14: memref<1x64xf32, #tpu.memory_space<vmem>>, %arg15: memref<1x1xf32, #tpu.memory_space<vmem>>, %arg16: memref<2x1x128xf32, #tpu.memory_space<vmem>>) attributes {dimension_semantics = [#tpu.dimension_semantics<parallel>], iteration_bounds = array<i64: 1>, scalar_prefetch = 0 : i64, scratch_operands = 0 : i64, tpu.core_type = #tpu.core_type<tc>, window_params = [{transform_indices = @transform_0, window_bounds = array<i64: 2, 16, 16>}, {transform_indices = @transform_1, window_bounds = array<i64: 2, 16, 16>}, {transform_indices = @transform_2, window_bounds = array<i64: 2, 16, 1>}, {transform_indices = @transform_3, window_bounds = array<i64: 2, 1, 4>}, {pipeline_mode = #tpu.pipeline_mode<synchronous>, transform_indices = @transform_4, window_bounds = array<i64: 16, 32>}, {pipeline_mode = #tpu.pipeline_mode<synchronous>, transform_indices = @transform_5, window_bounds = array<i64: 1, 32>}, {pipeline_mode = #tpu.pipeline_mode<synchronous>, transform_indices = @transform_6, window_bounds = array<i64: 1, 32>}, {pipeline_mode = #tpu.pipeline_mode<synchronous>, transform_indices = @transform_7, window_bounds = array<i64: 32, 32>}, {pipeline_mode = #tpu.pipeline_mode<synchronous>, transform_indices = @transform_8, window_bounds = array<i64: 1, 32>}, {pipeline_mode = #tpu.pipeline_mode<synchronous>, transform_indices = @transform_9, window_bounds = array<i64: 1, 32>}, {pipeline_mode = #tpu.pipeline_mode<synchronous>, transform_indices = @transform_10, window_bounds = array<i64: 32, 32>}, {pipeline_mode = #tpu.pipeline_mode<synchronous>, transform_indices = @transform_11, window_bounds = array<i64: 1, 32>}, {pipeline_mode = #tpu.pipeline_mode<synchronous>, transform_indices = @transform_12, window_bounds = array<i64: 1, 32>}, {pipeline_mode = #tpu.pipeline_mode<synchronous>, transform_indices = @transform_13, window_bounds = array<i64: 1, 64>}, {pipeline_mode = #tpu.pipeline_mode<synchronous>, transform_indices = @transform_14, window_bounds = array<i64: 1, 1>}, {transform_indices = @transform_15, window_bounds = array<i64: 2, 1, 128>}]} {
    %c0 = arith.constant 0 : index
    %c0_0 = arith.constant 0 : index
    %c0_1 = arith.constant 0 : index
    %0 = vector.load %arg2[%c0, %c0_0, %c0_1] : memref<2x16x16xbf16, #tpu.memory_space<vmem>>, vector<2x16x16xbf16>
    %c0_2 = arith.constant 0 : index
    %c0_3 = arith.constant 0 : index
    %c0_4 = arith.constant 0 : index
    %1 = vector.load %arg3[%c0_2, %c0_3, %c0_4] : memref<2x16x1xf32, #tpu.memory_space<vmem>>, vector<2x16x1xf32>
    %c0_5 = arith.constant 0 : index
    %c0_6 = arith.constant 0 : index
    %c0_7 = arith.constant 0 : index
    %2 = vector.load %arg4[%c0_5, %c0_6, %c0_7] : memref<2x1x4xf32, #tpu.memory_space<vmem>>, vector<2x1x4xf32>
    %3 = vector.extract_strided_slice %2 {offsets = [0, 0, 1], sizes = [2, 1, 1], strides = [1, 1, 1]} : vector<2x1x4xf32> to vector<2x1x1xf32>
    %4 = vector.extract_strided_slice %2 {offsets = [0, 0, 2], sizes = [2, 1, 1], strides = [1, 1, 1]} : vector<2x1x4xf32> to vector<2x1x1xf32>
    %5 = vector.extract_strided_slice %2 {offsets = [0, 0, 3], sizes = [2, 1, 1], strides = [1, 1, 1]} : vector<2x1x4xf32> to vector<2x1x1xf32>
    %6 = tpu.iota {dimensions = array<i32: 2>} : vector<1x16x16xi32>
    %7 = tpu.iota {dimensions = array<i32: 1>} : vector<1x16x16xi32>
    %8 = arith.cmpi slt, %6, %7 : vector<1x16x16xi32>
    %c0_8 = arith.constant 0 : index
    %c0_9 = arith.constant 0 : index
    %c0_10 = arith.constant 0 : index
    %9 = vector.load %arg1[%c0_8, %c0_9, %c0_10] : memref<2x16x16xbf16, #tpu.memory_space<vmem>>, vector<2x16x16xbf16>
    %c0_11 = arith.constant 0 : index
    %c0_12 = arith.constant 0 : index
    %10 = vector.load %arg5[%c0_11, %c0_12] : memref<16x32xbf16, #tpu.memory_space<vmem>>, vector<16x32xbf16>
    %c0_13 = arith.constant 0 : index
    %c0_14 = arith.constant 0 : index
    %11 = vector.load %arg6[%c0_13, %c0_14] : memref<1x32xf32, #tpu.memory_space<vmem>>, vector<1x32xf32>
    %12 = vector.shape_cast %9 : vector<2x16x16xbf16> to vector<32x16xbf16>
    %cst = arith.constant dense<0.000000e+00> : vector<32x32xf32>
    %13 = tpu.matmul %12, %10, %cst {dimension_numbers = #tpu.dot_dimension_numbers<[1], [0], [0], [1], [0, 0, 1, 1], [], []>} : vector<32x16xbf16>, vector<16x32xbf16>, vector<32x32xf32> -> vector<32x32xf32>
    %14 = vector.shape_cast %13 : vector<32x32xf32> to vector<2x16x32xf32>
    %15 = vector.shape_cast %1 : vector<2x16x1xf32> to vector<2x1x16xf32>
    %16 = arith.extf %0 : vector<2x16x16xbf16> to vector<2x16x16xf32>
    %17 = vector.broadcast %15 : vector<2x1x16xf32> to vector<2x16x16xf32>
    %18 = arith.mulf %16, %17 : vector<2x16x16xf32>
    %cst_15 = arith.constant dense<0.000000e+00> : vector<2x16xf32>
    %19 = vector.multi_reduction <add>, %18, %cst_15 [2] : vector<2x16x16xf32> to vector<2x16xf32>
    %20 = vector.shape_cast %19 : vector<2x16xf32> to vector<2x16x1xf32>
    %cst_16 = arith.constant 1.000000e+00 : f32
    %21 = vector.broadcast %cst_16 : f32 to vector<2x16x1xf32>
    %22 = arith.addf %20, %21 : vector<2x16x1xf32>
    %23 = math.rsqrt %22 : vector<2x16x1xf32>
    %24 = vector.broadcast %23 : vector<2x16x1xf32> to vector<2x16x32xf32>
    %25 = arith.mulf %24, %14 : vector<2x16x32xf32>
    %26 = arith.truncf %25 : vector<2x16x32xf32> to vector<2x16x32xbf16>
    "tpu.trace_start"() <{level = 10 : i32, message = "gij,gjf->gif"}> : () -> ()
    %cst_17 = arith.constant dense<0.000000e+00> : vector<2x16x32xf32>
    %27 = tpu.matmul %0, %26, %cst_17 {dimension_numbers = #tpu.dot_dimension_numbers<[2], [1], [1], [2], [0, 0, 0, 1, 1, 2], [0], [0]>} : vector<2x16x16xbf16>, vector<2x16x32xbf16>, vector<2x16x32xf32> -> vector<2x16x32xf32>
    "tpu.trace_stop"() : () -> ()
    %28 = arith.addf %27, %25 : vector<2x16x32xf32>
    %29 = vector.broadcast %23 : vector<2x16x1xf32> to vector<2x16x32xf32>
    %30 = arith.mulf %29, %28 : vector<2x16x32xf32>
    %31 = vector.shape_cast %11 : vector<1x32xf32> to vector<1x1x32xf32>
    %32 = vector.broadcast %31 : vector<1x1x32xf32> to vector<2x16x32xf32>
    %33 = arith.addf %30, %32 : vector<2x16x32xf32>
    %c0_18 = arith.constant 0 : index
    %c0_19 = arith.constant 0 : index
    %34 = vector.load %arg7[%c0_18, %c0_19] : memref<1x32xf32, #tpu.memory_space<vmem>>, vector<1x32xf32>
    %35 = vector.shape_cast %34 : vector<1x32xf32> to vector<1x1x32xf32>
    %36 = vector.broadcast %35 : vector<1x1x32xf32> to vector<2x16x32xf32>
    %37 = arith.mulf %33, %36 : vector<2x16x32xf32>
    %cst_20 = arith.constant dense<0.000000e+00> : vector<2x16xf32>
    %38 = vector.multi_reduction <add>, %37, %cst_20 [2] : vector<2x16x32xf32> to vector<2x16xf32>
    %39 = vector.shape_cast %38 : vector<2x16xf32> to vector<2x16x1xf32>
    %40 = arith.negf %39 : vector<2x16x1xf32>
    %41 = math.exp %40 : vector<2x16x1xf32>
    %cst_21 = arith.constant 1.000000e+00 : f32
    %42 = vector.broadcast %cst_21 : f32 to vector<2x16x1xf32>
    %43 = arith.addf %42, %41 : vector<2x16x1xf32>
    %44 = arith.divf %42, %43 : vector<2x16x1xf32>
    %cst_22 = arith.constant 5.000000e-01 : f32
    %45 = vector.broadcast %cst_22 : f32 to vector<2x16x1xf32>
    %46 = arith.cmpf ogt, %1, %45 : vector<2x16x1xf32>
    %cst_23 = arith.constant -1.000000e+00 : f32
    %47 = vector.broadcast %cst_23 : f32 to vector<2x16x1xf32>
    %48 = arith.select %46, %44, %47 : vector<2x16x1xi1>, vector<2x16x1xf32>
    %49 = vector.shape_cast %48 : vector<2x16x1xf32> to vector<2x1x16xf32>
    %50 = vector.broadcast %49 : vector<2x1x16xf32> to vector<2x16x16xf32>
    %51 = vector.broadcast %48 : vector<2x16x1xf32> to vector<2x16x16xf32>
    %52 = arith.cmpf ogt, %50, %51 : vector<2x16x16xf32>
    %53 = vector.broadcast %49 : vector<2x1x16xf32> to vector<2x16x16xf32>
    %54 = vector.broadcast %48 : vector<2x16x1xf32> to vector<2x16x16xf32>
    %55 = arith.cmpf oeq, %53, %54 : vector<2x16x16xf32>
    %56 = vector.broadcast %8 : vector<1x16x16xi1> to vector<2x16x16xi1>
    %57 = arith.andi %55, %56 : vector<2x16x16xi1>
    %58 = arith.ori %52, %57 : vector<2x16x16xi1>
    %59 = arith.extui %58 : vector<2x16x16xi1> to vector<2x16x16xi32>
    %60 = arith.sitofp %59 : vector<2x16x16xi32> to vector<2x16x16xf32>
    %cst_24 = arith.constant dense<0.000000e+00> : vector<2x16xf32>
    %61 = vector.multi_reduction <add>, %60, %cst_24 [2] : vector<2x16x16xf32> to vector<2x16xf32>
    %62 = vector.shape_cast %61 : vector<2x16xf32> to vector<2x16x1xf32>
    %63 = vector.broadcast %3 : vector<2x1x1xf32> to vector<2x16x1xf32>
    %64 = arith.cmpf olt, %62, %63 : vector<2x16x1xf32>
    %65 = arith.extui %64 : vector<2x16x1xi1> to vector<2x16x1xi32>
    %66 = arith.sitofp %65 : vector<2x16x1xi32> to vector<2x16x1xf32>
    %67 = vector.broadcast %44 : vector<2x16x1xf32> to vector<2x16x32xf32>
    %68 = arith.mulf %33, %67 : vector<2x16x32xf32>
    %69 = vector.broadcast %66 : vector<2x16x1xf32> to vector<2x16x32xf32>
    %70 = arith.mulf %68, %69 : vector<2x16x32xf32>
    %cst_25 = arith.constant 0.000000e+00 : f32
    %71 = vector.broadcast %cst_25 : f32 to vector<2x16x32xf32>
    %72 = arith.maximumf %70, %71 : vector<2x16x32xf32>
    %c0_26 = arith.constant 0 : index
    %c0_27 = arith.constant 0 : index
    %73 = vector.load %arg8[%c0_26, %c0_27] : memref<32x32xbf16, #tpu.memory_space<vmem>>, vector<32x32xbf16>
    %c0_28 = arith.constant 0 : index
    %c0_29 = arith.constant 0 : index
    %74 = vector.load %arg9[%c0_28, %c0_29] : memref<1x32xf32, #tpu.memory_space<vmem>>, vector<1x32xf32>
    %75 = arith.truncf %72 : vector<2x16x32xf32> to vector<2x16x32xbf16>
    %76 = vector.shape_cast %75 : vector<2x16x32xbf16> to vector<32x32xbf16>
    %cst_30 = arith.constant dense<0.000000e+00> : vector<32x32xf32>
    %77 = tpu.matmul %76, %73, %cst_30 {dimension_numbers = #tpu.dot_dimension_numbers<[1], [0], [0], [1], [0, 0, 1, 1], [], []>} : vector<32x32xbf16>, vector<32x32xbf16>, vector<32x32xf32> -> vector<32x32xf32>
    %78 = vector.shape_cast %77 : vector<32x32xf32> to vector<2x16x32xf32>
    %79 = vector.shape_cast %66 : vector<2x16x1xf32> to vector<2x1x16xf32>
    %80 = arith.extf %0 : vector<2x16x16xbf16> to vector<2x16x16xf32>
    %81 = vector.broadcast %79 : vector<2x1x16xf32> to vector<2x16x16xf32>
    %82 = arith.mulf %80, %81 : vector<2x16x16xf32>
    %cst_31 = arith.constant dense<0.000000e+00> : vector<2x16xf32>
    %83 = vector.multi_reduction <add>, %82, %cst_31 [2] : vector<2x16x16xf32> to vector<2x16xf32>
    %84 = vector.shape_cast %83 : vector<2x16xf32> to vector<2x16x1xf32>
    %cst_32 = arith.constant 1.000000e+00 : f32
    %85 = vector.broadcast %cst_32 : f32 to vector<2x16x1xf32>
    %86 = arith.addf %84, %85 : vector<2x16x1xf32>
    %87 = math.rsqrt %86 : vector<2x16x1xf32>
    %88 = vector.broadcast %87 : vector<2x16x1xf32> to vector<2x16x32xf32>
    %89 = arith.mulf %88, %78 : vector<2x16x32xf32>
    %90 = arith.truncf %89 : vector<2x16x32xf32> to vector<2x16x32xbf16>
    "tpu.trace_start"() <{level = 10 : i32, message = "gij,gjf->gif"}> : () -> ()
    %cst_33 = arith.constant dense<0.000000e+00> : vector<2x16x32xf32>
    %91 = tpu.matmul %0, %90, %cst_33 {dimension_numbers = #tpu.dot_dimension_numbers<[2], [1], [1], [2], [0, 0, 0, 1, 1, 2], [0], [0]>} : vector<2x16x16xbf16>, vector<2x16x32xbf16>, vector<2x16x32xf32> -> vector<2x16x32xf32>
    "tpu.trace_stop"() : () -> ()
    %92 = arith.addf %91, %89 : vector<2x16x32xf32>
    %93 = vector.broadcast %87 : vector<2x16x1xf32> to vector<2x16x32xf32>
    %94 = arith.mulf %93, %92 : vector<2x16x32xf32>
    %95 = vector.shape_cast %74 : vector<1x32xf32> to vector<1x1x32xf32>
    %96 = vector.broadcast %95 : vector<1x1x32xf32> to vector<2x16x32xf32>
    %97 = arith.addf %94, %96 : vector<2x16x32xf32>
    %c0_34 = arith.constant 0 : index
    %c0_35 = arith.constant 0 : index
    %98 = vector.load %arg10[%c0_34, %c0_35] : memref<1x32xf32, #tpu.memory_space<vmem>>, vector<1x32xf32>
    %99 = vector.shape_cast %98 : vector<1x32xf32> to vector<1x1x32xf32>
    %100 = vector.broadcast %99 : vector<1x1x32xf32> to vector<2x16x32xf32>
    %101 = arith.mulf %97, %100 : vector<2x16x32xf32>
    %cst_36 = arith.constant dense<0.000000e+00> : vector<2x16xf32>
    %102 = vector.multi_reduction <add>, %101, %cst_36 [2] : vector<2x16x32xf32> to vector<2x16xf32>
    %103 = vector.shape_cast %102 : vector<2x16xf32> to vector<2x16x1xf32>
    %104 = arith.negf %103 : vector<2x16x1xf32>
    %105 = math.exp %104 : vector<2x16x1xf32>
    %cst_37 = arith.constant 1.000000e+00 : f32
    %106 = vector.broadcast %cst_37 : f32 to vector<2x16x1xf32>
    %107 = arith.addf %106, %105 : vector<2x16x1xf32>
    %108 = arith.divf %106, %107 : vector<2x16x1xf32>
    %cst_38 = arith.constant 5.000000e-01 : f32
    %109 = vector.broadcast %cst_38 : f32 to vector<2x16x1xf32>
    %110 = arith.cmpf ogt, %66, %109 : vector<2x16x1xf32>
    %cst_39 = arith.constant -1.000000e+00 : f32
    %111 = vector.broadcast %cst_39 : f32 to vector<2x16x1xf32>
    %112 = arith.select %110, %108, %111 : vector<2x16x1xi1>, vector<2x16x1xf32>
    %113 = vector.shape_cast %112 : vector<2x16x1xf32> to vector<2x1x16xf32>
    %114 = vector.broadcast %113 : vector<2x1x16xf32> to vector<2x16x16xf32>
    %115 = vector.broadcast %112 : vector<2x16x1xf32> to vector<2x16x16xf32>
    %116 = arith.cmpf ogt, %114, %115 : vector<2x16x16xf32>
    %117 = vector.broadcast %113 : vector<2x1x16xf32> to vector<2x16x16xf32>
    %118 = vector.broadcast %112 : vector<2x16x1xf32> to vector<2x16x16xf32>
    %119 = arith.cmpf oeq, %117, %118 : vector<2x16x16xf32>
    %120 = vector.broadcast %8 : vector<1x16x16xi1> to vector<2x16x16xi1>
    %121 = arith.andi %119, %120 : vector<2x16x16xi1>
    %122 = arith.ori %116, %121 : vector<2x16x16xi1>
    %123 = arith.extui %122 : vector<2x16x16xi1> to vector<2x16x16xi32>
    %124 = arith.sitofp %123 : vector<2x16x16xi32> to vector<2x16x16xf32>
    %cst_40 = arith.constant dense<0.000000e+00> : vector<2x16xf32>
    %125 = vector.multi_reduction <add>, %124, %cst_40 [2] : vector<2x16x16xf32> to vector<2x16xf32>
    %126 = vector.shape_cast %125 : vector<2x16xf32> to vector<2x16x1xf32>
    %127 = vector.broadcast %4 : vector<2x1x1xf32> to vector<2x16x1xf32>
    %128 = arith.cmpf olt, %126, %127 : vector<2x16x1xf32>
    %129 = arith.extui %128 : vector<2x16x1xi1> to vector<2x16x1xi32>
    %130 = arith.sitofp %129 : vector<2x16x1xi32> to vector<2x16x1xf32>
    %131 = vector.broadcast %108 : vector<2x16x1xf32> to vector<2x16x32xf32>
    %132 = arith.mulf %97, %131 : vector<2x16x32xf32>
    %133 = vector.broadcast %130 : vector<2x16x1xf32> to vector<2x16x32xf32>
    %134 = arith.mulf %132, %133 : vector<2x16x32xf32>
    %cst_41 = arith.constant 0.000000e+00 : f32
    %135 = vector.broadcast %cst_41 : f32 to vector<2x16x32xf32>
    %136 = arith.maximumf %134, %135 : vector<2x16x32xf32>
    %c0_42 = arith.constant 0 : index
    %c0_43 = arith.constant 0 : index
    %137 = vector.load %arg11[%c0_42, %c0_43] : memref<32x32xbf16, #tpu.memory_space<vmem>>, vector<32x32xbf16>
    %c0_44 = arith.constant 0 : index
    %c0_45 = arith.constant 0 : index
    %138 = vector.load %arg12[%c0_44, %c0_45] : memref<1x32xf32, #tpu.memory_space<vmem>>, vector<1x32xf32>
    %139 = arith.truncf %136 : vector<2x16x32xf32> to vector<2x16x32xbf16>
    %140 = vector.shape_cast %139 : vector<2x16x32xbf16> to vector<32x32xbf16>
    %cst_46 = arith.constant dense<0.000000e+00> : vector<32x32xf32>
    %141 = tpu.matmul %140, %137, %cst_46 {dimension_numbers = #tpu.dot_dimension_numbers<[1], [0], [0], [1], [0, 0, 1, 1], [], []>} : vector<32x32xbf16>, vector<32x32xbf16>, vector<32x32xf32> -> vector<32x32xf32>
    %142 = vector.shape_cast %141 : vector<32x32xf32> to vector<2x16x32xf32>
    %143 = vector.shape_cast %130 : vector<2x16x1xf32> to vector<2x1x16xf32>
    %144 = arith.extf %0 : vector<2x16x16xbf16> to vector<2x16x16xf32>
    %145 = vector.broadcast %143 : vector<2x1x16xf32> to vector<2x16x16xf32>
    %146 = arith.mulf %144, %145 : vector<2x16x16xf32>
    %cst_47 = arith.constant dense<0.000000e+00> : vector<2x16xf32>
    %147 = vector.multi_reduction <add>, %146, %cst_47 [2] : vector<2x16x16xf32> to vector<2x16xf32>
    %148 = vector.shape_cast %147 : vector<2x16xf32> to vector<2x16x1xf32>
    %cst_48 = arith.constant 1.000000e+00 : f32
    %149 = vector.broadcast %cst_48 : f32 to vector<2x16x1xf32>
    %150 = arith.addf %148, %149 : vector<2x16x1xf32>
    %151 = math.rsqrt %150 : vector<2x16x1xf32>
    %152 = vector.broadcast %151 : vector<2x16x1xf32> to vector<2x16x32xf32>
    %153 = arith.mulf %152, %142 : vector<2x16x32xf32>
    %154 = arith.truncf %153 : vector<2x16x32xf32> to vector<2x16x32xbf16>
    "tpu.trace_start"() <{level = 10 : i32, message = "gij,gjf->gif"}> : () -> ()
    %cst_49 = arith.constant dense<0.000000e+00> : vector<2x16x32xf32>
    %155 = tpu.matmul %0, %154, %cst_49 {dimension_numbers = #tpu.dot_dimension_numbers<[2], [1], [1], [2], [0, 0, 0, 1, 1, 2], [0], [0]>} : vector<2x16x16xbf16>, vector<2x16x32xbf16>, vector<2x16x32xf32> -> vector<2x16x32xf32>
    "tpu.trace_stop"() : () -> ()
    %156 = arith.addf %155, %153 : vector<2x16x32xf32>
    %157 = vector.broadcast %151 : vector<2x16x1xf32> to vector<2x16x32xf32>
    %158 = arith.mulf %157, %156 : vector<2x16x32xf32>
    %159 = vector.shape_cast %138 : vector<1x32xf32> to vector<1x1x32xf32>
    %160 = vector.broadcast %159 : vector<1x1x32xf32> to vector<2x16x32xf32>
    %161 = arith.addf %158, %160 : vector<2x16x32xf32>
    %c0_50 = arith.constant 0 : index
    %c0_51 = arith.constant 0 : index
    %162 = vector.load %arg13[%c0_50, %c0_51] : memref<1x32xf32, #tpu.memory_space<vmem>>, vector<1x32xf32>
    %163 = vector.shape_cast %162 : vector<1x32xf32> to vector<1x1x32xf32>
    %164 = vector.broadcast %163 : vector<1x1x32xf32> to vector<2x16x32xf32>
    %165 = arith.mulf %161, %164 : vector<2x16x32xf32>
    %cst_52 = arith.constant dense<0.000000e+00> : vector<2x16xf32>
    %166 = vector.multi_reduction <add>, %165, %cst_52 [2] : vector<2x16x32xf32> to vector<2x16xf32>
    %167 = vector.shape_cast %166 : vector<2x16xf32> to vector<2x16x1xf32>
    %168 = arith.negf %167 : vector<2x16x1xf32>
    %169 = math.exp %168 : vector<2x16x1xf32>
    %cst_53 = arith.constant 1.000000e+00 : f32
    %170 = vector.broadcast %cst_53 : f32 to vector<2x16x1xf32>
    %171 = arith.addf %170, %169 : vector<2x16x1xf32>
    %172 = arith.divf %170, %171 : vector<2x16x1xf32>
    %cst_54 = arith.constant 5.000000e-01 : f32
    %173 = vector.broadcast %cst_54 : f32 to vector<2x16x1xf32>
    %174 = arith.cmpf ogt, %130, %173 : vector<2x16x1xf32>
    %cst_55 = arith.constant -1.000000e+00 : f32
    %175 = vector.broadcast %cst_55 : f32 to vector<2x16x1xf32>
    %176 = arith.select %174, %172, %175 : vector<2x16x1xi1>, vector<2x16x1xf32>
    %177 = vector.shape_cast %176 : vector<2x16x1xf32> to vector<2x1x16xf32>
    %178 = vector.broadcast %177 : vector<2x1x16xf32> to vector<2x16x16xf32>
    %179 = vector.broadcast %176 : vector<2x16x1xf32> to vector<2x16x16xf32>
    %180 = arith.cmpf ogt, %178, %179 : vector<2x16x16xf32>
    %181 = vector.broadcast %177 : vector<2x1x16xf32> to vector<2x16x16xf32>
    %182 = vector.broadcast %176 : vector<2x16x1xf32> to vector<2x16x16xf32>
    %183 = arith.cmpf oeq, %181, %182 : vector<2x16x16xf32>
    %184 = vector.broadcast %8 : vector<1x16x16xi1> to vector<2x16x16xi1>
    %185 = arith.andi %183, %184 : vector<2x16x16xi1>
    %186 = arith.ori %180, %185 : vector<2x16x16xi1>
    %187 = arith.extui %186 : vector<2x16x16xi1> to vector<2x16x16xi32>
    %188 = arith.sitofp %187 : vector<2x16x16xi32> to vector<2x16x16xf32>
    %cst_56 = arith.constant dense<0.000000e+00> : vector<2x16xf32>
    %189 = vector.multi_reduction <add>, %188, %cst_56 [2] : vector<2x16x16xf32> to vector<2x16xf32>
    %190 = vector.shape_cast %189 : vector<2x16xf32> to vector<2x16x1xf32>
    %191 = vector.broadcast %5 : vector<2x1x1xf32> to vector<2x16x1xf32>
    %192 = arith.cmpf olt, %190, %191 : vector<2x16x1xf32>
    %193 = arith.extui %192 : vector<2x16x1xi1> to vector<2x16x1xi32>
    %194 = arith.sitofp %193 : vector<2x16x1xi32> to vector<2x16x1xf32>
    %195 = vector.broadcast %172 : vector<2x16x1xf32> to vector<2x16x32xf32>
    %196 = arith.mulf %161, %195 : vector<2x16x32xf32>
    %197 = vector.broadcast %194 : vector<2x16x1xf32> to vector<2x16x32xf32>
    %198 = arith.mulf %196, %197 : vector<2x16x32xf32>
    %cst_57 = arith.constant 0.000000e+00 : f32
    %199 = vector.broadcast %cst_57 : f32 to vector<2x16x32xf32>
    %200 = arith.maximumf %198, %199 : vector<2x16x32xf32>
    %cst_58 = arith.constant dense<0xFF800000> : vector<2x32xf32>
    %201 = vector.multi_reduction <maximumf>, %200, %cst_58 [1] : vector<2x16x32xf32> to vector<2x32xf32>
    %202 = vector.shape_cast %201 : vector<2x32xf32> to vector<2x1x32xf32>
    %cst_59 = arith.constant dense<0.000000e+00> : vector<2x32xf32>
    %203 = vector.multi_reduction <add>, %200, %cst_59 [1] : vector<2x16x32xf32> to vector<2x32xf32>
    %204 = vector.shape_cast %203 : vector<2x32xf32> to vector<2x1x32xf32>
    %205 = vector.broadcast %5 : vector<2x1x1xf32> to vector<2x1x32xf32>
    %206 = arith.divf %204, %205 : vector<2x1x32xf32>
    %207 = tpu.concatenate %202, %206 in 2 : vector<2x1x32xf32>, vector<2x1x32xf32> -> vector<2x1x64xf32>
    %c0_60 = arith.constant 0 : index
    %c0_61 = arith.constant 0 : index
    %208 = vector.load %arg14[%c0_60, %c0_61] : memref<1x64xf32, #tpu.memory_space<vmem>>, vector<1x64xf32>
    %209 = vector.shape_cast %208 : vector<1x64xf32> to vector<1x1x64xf32>
    %210 = vector.broadcast %209 : vector<1x1x64xf32> to vector<2x1x64xf32>
    %211 = arith.mulf %207, %210 : vector<2x1x64xf32>
    %cst_62 = arith.constant dense<0.000000e+00> : vector<2x1xf32>
    %212 = vector.multi_reduction <add>, %211, %cst_62 [2] : vector<2x1x64xf32> to vector<2x1xf32>
    %213 = vector.shape_cast %212 : vector<2x1xf32> to vector<2x1x1xf32>
    %c0_63 = arith.constant 0 : index
    %c0_64 = arith.constant 0 : index
    %214 = vector.load %arg15[%c0_63, %c0_64] : memref<1x1xf32, #tpu.memory_space<vmem>>, vector<1x1xf32>
    %215 = vector.shape_cast %214 : vector<1x1xf32> to vector<1x1x1xf32>
    %216 = vector.broadcast %215 : vector<1x1x1xf32> to vector<2x1x1xf32>
    %217 = arith.addf %213, %216 : vector<2x1x1xf32>
    %218 = arith.negf %217 : vector<2x1x1xf32>
    %219 = math.exp %218 : vector<2x1x1xf32>
    %cst_65 = arith.constant 1.000000e+00 : f32
    %220 = vector.broadcast %cst_65 : f32 to vector<2x1x1xf32>
    %221 = arith.addf %220, %219 : vector<2x1x1xf32>
    %222 = arith.divf %220, %221 : vector<2x1x1xf32>
    %cst_66 = arith.constant 0.000000e+00 : f32
    %223 = vector.broadcast %cst_66 : f32 to vector<2x1x63xf32>
    %224 = tpu.concatenate %207, %222, %223 in 2 : vector<2x1x64xf32>, vector<2x1x1xf32>, vector<2x1x63xf32> -> vector<2x1x128xf32>
    %c0_67 = arith.constant 0 : index
    %c0_68 = arith.constant 0 : index
    %c0_69 = arith.constant 0 : index
    %225 = vector.load %arg16[%c0_67, %c0_68, %c0_69] : memref<2x1x128xf32, #tpu.memory_space<vmem>>, vector<2x1x128xf32>
    tpu.vector_store %arg16[%c0_67, %c0_68, %c0_69], %224 {strides = array<i32>} : memref<2x1x128xf32, #tpu.memory_space<vmem>>, vector<2x1x128xf32>,
    return
  }
  func.func @transform_0(%arg0: i32) -> (i32, i32, i32) {
    %c0_i32 = arith.constant 0 : i32
    %c0_i32_0 = arith.constant 0 : i32
    %c0_i32_1 = arith.constant 0 : i32
    return %arg0, %c0_i32, %c0_i32_0 : i32, i32, i32
  }
  func.func @transform_1(%arg0: i32) -> (i32, i32, i32) {
    %c0_i32 = arith.constant 0 : i32
    %c0_i32_0 = arith.constant 0 : i32
    %c0_i32_1 = arith.constant 0 : i32
    return %arg0, %c0_i32, %c0_i32_0 : i32, i32, i32
  }
  func.func @transform_2(%arg0: i32) -> (i32, i32, i32) {
    %c0_i32 = arith.constant 0 : i32
    %c0_i32_0 = arith.constant 0 : i32
    %c0_i32_1 = arith.constant 0 : i32
    return %arg0, %c0_i32, %c0_i32_0 : i32, i32, i32
  }
  func.func @transform_3(%arg0: i32) -> (i32, i32, i32) {
    %c0_i32 = arith.constant 0 : i32
    %c0_i32_0 = arith.constant 0 : i32
    %c0_i32_1 = arith.constant 0 : i32
    return %arg0, %c0_i32, %c0_i32_0 : i32, i32, i32
  }
  func.func @transform_4(%arg0: i32) -> (i32, i32) {
    %c0_i32 = arith.constant 0 : i32
    %c0_i32_0 = arith.constant 0 : i32
    %c0_i32_1 = arith.constant 0 : i32
    return %c0_i32, %c0_i32_0 : i32, i32
  }
  func.func @transform_5(%arg0: i32) -> (i32, i32) {
    %c0_i32 = arith.constant 0 : i32
    %c0_i32_0 = arith.constant 0 : i32
    %c0_i32_1 = arith.constant 0 : i32
    return %c0_i32, %c0_i32_0 : i32, i32
  }
  func.func @transform_6(%arg0: i32) -> (i32, i32) {
    %c0_i32 = arith.constant 0 : i32
    %c0_i32_0 = arith.constant 0 : i32
    %c0_i32_1 = arith.constant 0 : i32
    return %c0_i32, %c0_i32_0 : i32, i32
  }
  func.func @transform_7(%arg0: i32) -> (i32, i32) {
    %c0_i32 = arith.constant 0 : i32
    %c0_i32_0 = arith.constant 0 : i32
    %c0_i32_1 = arith.constant 0 : i32
    return %c0_i32, %c0_i32_0 : i32, i32
  }
  func.func @transform_8(%arg0: i32) -> (i32, i32) {
    %c0_i32 = arith.constant 0 : i32
    %c0_i32_0 = arith.constant 0 : i32
    %c0_i32_1 = arith.constant 0 : i32
    return %c0_i32, %c0_i32_0 : i32, i32
  }
  func.func @transform_9(%arg0: i32) -> (i32, i32) {
    %c0_i32 = arith.constant 0 : i32
    %c0_i32_0 = arith.constant 0 : i32
    %c0_i32_1 = arith.constant 0 : i32
    return %c0_i32, %c0_i32_0 : i32, i32
  }
  func.func @transform_10(%arg0: i32) -> (i32, i32) {
    %c0_i32 = arith.constant 0 : i32
    %c0_i32_0 = arith.constant 0 : i32
    %c0_i32_1 = arith.constant 0 : i32
    return %c0_i32, %c0_i32_0 : i32, i32
  }
  func.func @transform_11(%arg0: i32) -> (i32, i32) {
    %c0_i32 = arith.constant 0 : i32
    %c0_i32_0 = arith.constant 0 : i32
    %c0_i32_1 = arith.constant 0 : i32
    return %c0_i32, %c0_i32_0 : i32, i32
  }
  func.func @transform_12(%arg0: i32) -> (i32, i32) {
    %c0_i32 = arith.constant 0 : i32
    %c0_i32_0 = arith.constant 0 : i32
    %c0_i32_1 = arith.constant 0 : i32
    return %c0_i32, %c0_i32_0 : i32, i32
  }
  func.func @transform_13(%arg0: i32) -> (i32, i32) {
    %c0_i32 = arith.constant 0 : i32
    %c0_i32_0 = arith.constant 0 : i32
    %c0_i32_1 = arith.constant 0 : i32
    return %c0_i32, %c0_i32_0 : i32, i32
  }
  func.func @transform_14(%arg0: i32) -> (i32, i32) {
    %c0_i32 = arith.constant 0 : i32
    %c0_i32_0 = arith.constant 0 : i32
    %c0_i32_1 = arith.constant 0 : i32
    return %c0_i32, %c0_i32_0 : i32, i32
  }
  func.func @transform_15(%arg0: i32) -> (i32, i32, i32) {
    %c0_i32 = arith.constant 0 : i32
    %c0_i32_0 = arith.constant 0 : i32
    %c0_i32_1 = arith.constant 0 : i32
    return %arg0, %c0_i32, %c0_i32_0 : i32, i32, i32
  }
}

</mosaic_0001>

<bundles_post_ra>
// kernel: _forward.1
= control target key start
LH: loop header
LB: loop body
LE: loop exit
PB: predicated region body
PF: predicated region fallthrough
CT: control target
= control target key end

     0   :  { %v5049_v0 = vmov 0   ;;  %vm7278_vm0 = vcmask 130048   ;;  %v63_v8 = vlaneseq  ;;  %vm7279_vm1 = vcmask 130112   ;;  %s7261_s2 = inlined_call_operand.vmem [shape: f32[2,16,1], index: 2, kind: input, shape index: {}]   ;;  %s7262_s4 = inlined_call_operand.vmem [shape: bf16[16,32], index: 4, kind: input, shape index: {}]   ;;  %s7263_s0 = inlined_call_operand.vmem [shape: bf16[2,16,16], index: 0, kind: input, shape index: {}]   ;;  %s7264_s1 = inlined_call_operand.vmem [shape: bf16[2,16,16], index: 1, kind: input, shape index: {}]   ;;  %s7265_s5 = inlined_call_operand.vmem [shape: f32[1,32], index: 5, kind: input, shape index: {}]   ;;  %s7266_s6 = inlined_call_operand.vmem [shape: f32[1,32], index: 6, kind: input, shape index: {}]   ;;  %s7267_s3 = inlined_call_operand.vmem [shape: f32[2,1,4], index: 3, kind: input, shape index: {}]   ;;  %s7268_s7 = inlined_call_operand.vmem [shape: bf16[32,32], index: 7, kind: input, shape index: {}]   ;;  %s7269_s8 = inlined_call_operand.vmem [shape: f32[1,32], index: 8, kind: input, shape index: {}]   ;;  %s7270_s9 = inlined_call_operand.vmem [shape: f32[1,32], index: 9, kind: input, shape index: {}]   ;;  %s7271_s10 = inlined_call_operand.vmem [shape: bf16[32,32], index: 10, kind: input, shape index: {}]   ;;  %s7272_s11 = inlined_call_operand.vmem [shape: f32[1,32], index: 11, kind: input, shape index: {}]   ;;  %s7273_s12 = inlined_call_operand.vmem [shape: f32[1,32], index: 12, kind: input, shape index: {}]   ;;  %s7274_s13 = inlined_call_operand.vmem [shape: f32[1,64], index: 13, kind: input, shape index: {}]   ;;  %s7275_s14 = inlined_call_operand.<no memory space> [shape: f32[1,1], index: 14, kind: input, shape index: {}]   ;;  %s7276_s15 = inlined_call_operand.vmem [shape: f32[2,1,128], index: 15, kind: output, shape index: {}]  }
   0x1   :  { %4411 = vset.pattern.permute.xlu1 %v5049_v0  ;;  %4410 = vset.pattern.permute.xlu0 %v5049_v0  ;;  %v5141_v1 = vld [vmem:[%s7261_s2 + $0x10] sm:$0xff]  ;;  %v5146_v2 = vld [vmem:[%s7261_s2] sm:$0xff]  ;;  %v5153_v3 = vld [vmem:[%s7261_s2 + $0x18] sm:$0xff] }
   0x2   :  { %134 = vperm.xlu1 %4411, %v5141_v1   ;;  %128 = vperm.xlu0 %4410, %v5146_v2   ;;  %v5158_v4 = vld [vmem:[%s7261_s2 + $0x8] sm:$0xff]  ;;  %v4397_v5 = vld [vmem:[%s7262_s4] sm:$0xff]  ;;  %v5173_v9 = vshrl.u32 %v63_v8, 7  ;;  %v5181_v13 = vand.u32 127, %v63_v8 }
   0x3   :  { %4402 = vmatpush.bf16.msra.mxu3 %v4397_v5  ;;  %107 = vmatpush.bf16.msra.mxu0 %v4397_v5  ;;  %v4396_v6 = vld [vmem:[%s7263_s0 + $0x8] sm:$0xff]  ;;  %v4395_v7 = vld [vmem:[%s7263_s0] sm:$0xff] }
   0x4   :  { %v5176_v10 = vadd.s32 8, %v5173_v9  ;;  %v5184_v14 = vadd.s32 4294967288, %v5181_v13  ;;  %v56_v15 = vld [vmem:[%s7264_s1 + $0x8] sm:$0xff]   ;;  %v53_v16 = vld [vmem:[%s7264_s1] sm:$0xff]   ;;  %vm68_vm2 = vcmp.lt.s32.totalorder %v5181_v13, %v5173_v9 }
   0x5   :  { %v5193_v20 = vunpack.c.h.bf16 %v56_v15  ;;  %v5195_v21 = vunpack.c.l.bf16 %v56_v15  ;;  %v5197_v22 = vunpack.c.l.bf16 %v53_v16  ;;  %v5210_v34 = vunpack.c.h.bf16 %v53_v16 }
   0x6   :  { %4140 = vmatmul.msk.bf16.vlgmr.msra.gmra.mxu3 %vm7278_vm0, %v4396_v6  ;;  %4139 = vmatmul.msk.bf16.vlgmr.msra.gmra.mxu0 %vm7278_vm0, %v4395_v7  ;;  %v5217_v37 = vsel %vm68_vm2, 1, %v5049_v0  ;;  %vm69_vm3 = vcmp.lt.s32.totalorder %v5181_v13, %v5176_v10  ;;  %vm7277_vm2 = vcmask 261120  }
   0x7   :  { %4412 = vset.pattern.permute.xlu2 %v5176_v10  ;;  %v635_v38 = vperm.slane %v5217_v37, 1  ;;  %v622_v39 = vperm.slane %v5217_v37, 0  ;;  %v661_v40 = vperm.slane %v5217_v37, 3  ;;  %v674_v41 = vperm.slane %v5217_v37, 4 }
   0x8   :  { %v687_v42 = vperm.slane %v5217_v37, 5  ;;  %v700_v49 = vperm.slane %v5217_v37, 6  ;;  %v5241_v8 = vsel %vm69_vm3, 1, %v5049_v0 }
   0xa   :  { %137 = vperm.xlu1 %4411, %v5153_v3   ;;  %131 = vperm.xlu0 %4410, %v5158_v4  }
  0x12   :  { %4413 = vset.pattern.permute.xlu1 %v5173_v9  ;;  %4414 = vset.pattern.permute.xlu0 %v5176_v10 }
  0x74   :  { %v135_v11 = vpop.permute.xlu1 %134  ;;  %v129_v12 = vpop.permute.xlu0 %128 }
  0x75   :  { %v144_v17 = vperm.slane %v135_v11, %v5181_v13  ;;  %v139_v23 = vperm.slane %v129_v12, %v5181_v13 }
  0x7c   :  { %v138_v18 = vpop.permute.xlu1 %137  ;;  %v132_v19 = vpop.permute.xlu0 %131 }
  0x7d   :  { %v145_v24 = vperm.slane %v138_v18, %v5184_v14  ;;  %v141_v25 = vperm.slane %v132_v19, %v5184_v14 }
  0x7f   :  { %v146_v26 = vsel %vm7279_vm1, %v145_v24, %v144_v17  ;;  %v143_v27 = vsel %vm7279_vm1, %v141_v25, %v139_v23  ;;  %v726_v25 = vperm.slane %v5241_v8, 0 }
  0x80   :  { %v171_v28 = vmul.f32 %v146_v26, %v5193_v20  ;;  %v170_v29 = vmul.f32 %v146_v26, %v5195_v21  ;;  %v168_v30 = vmul.f32 %v143_v27, %v5197_v22  ;;  %v169_v35 = vmul.f32 %v143_v27, %v5210_v34 }
  0x82   :  { %v181_v31 = vsel %vm7278_vm0, %v171_v28, 0.0  ;;  %v178_v32 = vsel %vm7278_vm0, %v170_v29, 0.0  ;;  %v172_v33 = vsel %vm7278_vm0, %v168_v30, 0.0  ;;  %v175_v36 = vsel %vm7278_vm0, %v169_v35, 0.0 }
  0x83   :  { %182 = vadd.xlane.f32.xlu1 %v181_v31  ;;  %179 = vadd.xlane.f32.xlu0 %v178_v32  ;;  %v109_v18 = vpop.f32.mrf.mxu0 }
  0x84   :  { %173 = vadd.xlane.f32.xlu2 %v172_v33 }
  0x89   :  { %v114_v50 = vpop.f32.mrf.mxu3 }
  0x8c   :  { %176 = vadd.xlane.f32.xlu2 %v175_v36 }
  0x91   :  { %v116_v15 = vpop.f32.mrf.mxu3 }
  0x9c   :  { %640 = vperm.xlu1 %4413, %v635_v38  }
  0xa4   :  { %633 = vperm.xlu2 %4412, %v622_v39  }
  0xac   :  { %646 = vperm.xlu2 %4412, %v635_v38  }
  0xb4   :  { %4415 = vset.pattern.permute.xlu2 %v5173_v9 }
  0xbc   :  { %666 = vperm.xlu2 %4415, %v661_v40  }
  0xc4   :  { %679 = vperm.xlu2 %4415, %v674_v41  }
  0xcc   :  { %4417 = vset.pattern.permute.xlu2 %v5176_v10 }
  0xd4   :  { %698 = vperm.xlu2 %4417, %v687_v42  }
  0xdc   :  { %711 = vperm.xlu2 %4417, %v700_v49  }
  0xe4   :  { %4419 = vset.pattern.permute.xlu2 %v5173_v9 }
  0xec   :  { %731 = vperm.xlu2 %4419, %v726_v25  }
  0xf6   :  { %v183_v43 = vpop.xlane.xlu1 %182  ;;  %v180_v44 = vpop.xlane.xlu0 %179 }
  0xf7   :  { %v187_v45 = vadd.f32 1.0, %v183_v43  ;;  %v186_v46 = vadd.f32 1.0, %v180_v44  ;;  %v174_v47 = vpop.xlane.xlu2 %173 }
  0xf8   :  { %v184_v48 = vadd.f32 1.0, %v174_v47  ;;  %v111_v47 = vpop.f32.mrf.mxu0 }
  0xf9   :  { %4957 = vrsqrt.f32 %v187_v45  ;;  %vm224_vm6 = vweird.f32 %v187_v45  ;;  %vm214_vm8 = vweird.f32 %v186_v46 }
  0xfa   :  { %4959 = vrsqrt.f32 %v186_v46  ;;  %vm194_vm11 = vweird.f32 %v184_v48 }
  0xfb   :  { %4961 = vrsqrt.f32 %v184_v48 }
  0xff   :  { %v4958_v51 = vpop.eup %4957  ;;  %v177_v52 = vpop.xlane.xlu2 %176 }
 0x100   :  { %v4960_v53 = vpop.eup %4959  ;;  %v219_v54 = vmul.f32 %v4958_v51, %v187_v45  ;;  %v185_v55 = vadd.f32 1.0, %v177_v52  ;;  %vm225_vm4 = vweird.f32 %v4958_v51 }
 0x101   :  { %v4962_v56 = vpop.eup %4961  ;;  %v209_v57 = vmul.f32 %v4960_v53, %v186_v46  ;;  %vm215_vm5 = vweird.f32 %v4960_v53  ;;  %vm226_vm9 = vmor %vm224_vm6, %vm225_vm4  ;;  %v739_v46 = vperm.slane %v5241_v8, 1 }
 0x102   :  { %v220_v58 = vmul.f32 %v4958_v51, %v219_v54  ;;  %v189_v59 = vmul.f32 %v4962_v56, %v184_v48  ;;  %4963 = vrsqrt.f32 %v185_v55  ;;  %vm195_vm7 = vweird.f32 %v4962_v56  ;;  %vm216_vm10 = vmor %vm214_vm8, %vm215_vm5 }
 0x103   :  { %v210_v60 = vmul.f32 %v4960_v53, %v209_v57  ;;  %vm196_vm12 = vmor %vm194_vm11, %vm195_vm7  ;;  %vm204_vm14 = vweird.f32 %v185_v55  ;;  %744 = vperm.xlu2 %4419, %v739_v46   ;;  %v4393_v57 = vld [vmem:[%s7264_s1] sm:$0xff]  ;;  %vm400_vm5 = vcmp.gt.f32.partialorder %v5146_v2, 0.5 }
 0x104   :  { %v190_v61 = vmul.f32 %v4962_v56, %v189_v59  ;;  %v221_v62 = vmul.f32 0.5, %v220_v58  ;;  %v752_v58 = vperm.slane %v5241_v8, 2  ;;  %v765_v59 = vperm.slane %v5241_v8, 3 }
 0x105   :  { %v211_v63 = vmul.f32 0.5, %v210_v60  ;;  %v791_v60 = vperm.slane %v5241_v8, 5 }
 0x106   :  { %v191_v5 = vmul.f32 0.5, %v190_v61  ;;  %v222_v6 = vsub.f32 1.5, %v221_v62  ;;  %v804_v61 = vperm.slane %v5241_v8, 6  ;;  %v817_v62 = vperm.slane %v5241_v8, 7 }
 0x107   :  { %v212_v7 = vsub.f32 1.5, %v211_v63  ;;  %v648_v63 = vperm.slane %v5217_v37, 2 }
 0x108   :  { %v4964_v11 = vpop.eup %4963  ;;  %v192_v12 = vsub.f32 1.5, %v191_v5  ;;  %v223_v16 = vmul.f32 %v4958_v51, %v222_v6 }
 0x109   :  { %v199_v17 = vmul.f32 %v4964_v11, %v185_v55  ;;  %v213_v19 = vmul.f32 %v4960_v53, %v212_v7  ;;  %vm205_vm13 = vweird.f32 %v4964_v11  ;;  %653 = vperm.xlu1 %4413, %v648_v63   ;;  %659 = vperm.xlu0 %4414, %v648_v63  }
 0x10a   :  { %v193_v23 = vmul.f32 %v4962_v56, %v192_v12  ;;  %v5244_v24 = vsel %vm226_vm9, %v4958_v51, %v223_v16  ;;  %vm206_vm15 = vmor %vm204_vm14, %vm205_vm13  ;;  %v713_v12 = vperm.slane %v5217_v37, 7  ;;  %v4949_v16 = vld [vmem:[%s7265_s5] ss:$0 sm:$0xff] }
 0x10b   :  { %v200_v26 = vmul.f32 %v4964_v11, %v199_v17  ;;  %v5247_v27 = vsel %vm216_vm10, %v4960_v53, %v213_v19  ;;  %v5250_v28 = vmul.f32 %v5244_v24, %v116_v15  ;;  %4421 = vset.pattern.permute.xlu2 %v5176_v10  ;;  %v4950_v19 = vld [vmem:[%s7266_s6] ss:$0 sm:$0xff]  ;;  %vm402_vm10 = vcmp.gt.f32.partialorder %v5141_v1, 0.5 }
 0x10c   :  { %v230_v29 = vmul.f32 %v5247_v27, %v114_v50  ;;  %v197_v30 = vsel %vm196_vm12, %v4962_v56, %v193_v23  ;;  %v4394_v50 = vld [vmem:[%s7264_s1 + $0x8] sm:$0xff] }
 0x10d   :  { %v201_v31 = vmul.f32 0.5, %v200_v26  ;;  %v235_v32 = vpack.c.bf16 %v5250_v28, %v5250_v28  ;;  %v228_v38 = vmul.f32 %v197_v30, %v109_v18 }
 0x10e   :  { %v234_v33 = vpack.c.bf16 %v230_v29, %v230_v29 }
 0x10f   :  { %v202_v35 = vsub.f32 1.5, %v201_v31  ;;  %v272_v36 = vunpack.c.l.b16 %v235_v32  ;;  %v232_v52 = vpack.c.bf16 %v228_v38, %v228_v38 }
 0x110   :  { %v271_v43 = vunpack.c.l.b16 %v234_v33 }
 0x111   :  { %v203_v44 = vmul.f32 %v4964_v11, %v202_v35  ;;  %v243_v54 = vunpack.c.l.b16 %v232_v52  ;;  %4416 = vset.pattern.permute.xlu1 %v5176_v10  ;;  %724 = vperm.xlu0 %4414, %v713_v12  }
 0x112   :  { %v273_v45 = vpack.c.b16 %v272_v36, %v271_v43 }
 0x113   :  { %v207_v48 = vsel %vm206_vm15, %v4964_v11, %v203_v44  ;;  %763 = vperm.xlu2 %4421, %v752_v58   ;;  %vm401_vm15 = vcmp.gt.f32.partialorder %v5158_v4, 0.5 }
 0x114   :  { %v229_v51 = vmul.f32 %v207_v48, %v111_v47  ;;  %285 = vmatpush.bf16.msra.mxu2 %v273_v45 }
 0x116   :  { %v233_v53 = vpack.c.bf16 %v229_v51, %v229_v51 }
 0x117   :  { %4150 = vmatmul.msk.bf16.vlgmr.msra.gmra.mxu2 %vm7278_vm0, %v4394_v50 }
 0x118   :  { %v244_v55 = vunpack.c.l.b16 %v233_v53 }
 0x119   :  { %672 = vperm.xlu1 %4416, %v661_v40  }
 0x11a   :  { %v245_v56 = vpack.c.b16 %v244_v55, %v243_v54 }
 0x11b   :  { %776 = vperm.xlu2 %4421, %v765_v59  }
 0x11c   :  { %257 = vmatpush.bf16.msra.mxu1 %v245_v56 }
 0x11f   :  { %4145 = vmatmul.msk.bf16.vlgmr.msra.gmra.mxu1 %vm7278_vm0, %v4393_v57 }
 0x121   :  { %685 = vperm.xlu1 %4416, %v674_v41  }
 0x123   :  { %4424 = vset.pattern.permute.xlu2 %v5173_v9 }
 0x129   :  { %4418 = vset.pattern.permute.xlu1 %v5173_v9 }
 0x12b   :  { %796 = vperm.xlu2 %4424, %v791_v60  }
 0x131   :  { %705 = vperm.xlu1 %4418, %v700_v49  }
 0x133   :  { %809 = vperm.xlu2 %4424, %v804_v61  }
 0x139   :  { %718 = vperm.xlu1 %4418, %v713_v12  }
 0x13b   :  { %4426 = vset.pattern.permute.xlu2 %v5176_v10 }
 0x141   :  { %4420 = vset.pattern.permute.xlu1 %v5176_v10 }
 0x143   :  { %828 = vperm.xlu2 %4426, %v817_v62  }
 0x149   :  { %737 = vperm.xlu1 %4420, %v726_v25  }
 0x14b   :  { %4427 = vset.pattern.permute.xlu2 %v5049_v0 }
 0x151   :  { %750 = vperm.xlu1 %4420, %v739_v46  }
 0x159   :  { %4422 = vset.pattern.permute.xlu1 %v5173_v9 }
 0x161   :  { %770 = vperm.xlu1 %4422, %v765_v59  }
 0x19a   :  { %v287_v5 = vpop.f32.mrf.mxu2 }
 0x19b   :  { %v288_v7 = vadd.f32 %v287_v5, %v230_v29  ;;  %v5300_v29 = vpop.permute.xlu2 %633 }
 0x19c   :  { %v259_v6 = vpop.f32.mrf.mxu1 }
 0x19d   :  { %v260_v11 = vadd.f32 %v259_v6, %v228_v38  ;;  %v294_v17 = vmul.f32 %v288_v7, %v5247_v27 }
 0x19f   :  { %v292_v15 = vmul.f32 %v260_v11, %v197_v30  ;;  %v5303_v32 = vadd.f32 %v4949_v16, %v294_v17 }
 0x1a1   :  { %v5294_v18 = vadd.f32 %v4949_v16, %v292_v15  ;;  %v309_v27 = vmul.f32 %v4950_v19, %v5303_v32 }
 0x1a2   :  { %v289_v33 = vpop.f32.mrf.mxu2 }
 0x1a3   :  { %v307_v23 = vmul.f32 %v4950_v19, %v5294_v18  ;;  %v290_v35 = vadd.f32 %v289_v33, %v5250_v28  ;;  %v318_v36 = vsel %vm7277_vm2, %v309_v27, 0.0  ;;  %v5312_v43 = vpop.permute.xlu2 %646  ;;  %v778_v28 = vperm.slane %v5241_v8, 4 }
 0x1a4   :  { %v261_v26 = vpop.f32.mrf.mxu1 }
 0x1a5   :  { %v262_v30 = vadd.f32 %v261_v26, %v229_v51  ;;  %v312_v31 = vsel %vm7277_vm2, %v307_v23, 0.0  ;;  %v295_v44 = vmul.f32 %v290_v35, %v5244_v24  ;;  %789 = vperm.xlu0 %4414, %v778_v28   ;;  %783 = vperm.xlu1 %4422, %v778_v28  }
 0x1a6   :  { %313 = vadd.xlane.f32.xlu2 %v312_v31 }
 0x1a7   :  { %v293_v40 = vmul.f32 %v262_v30, %v207_v48  ;;  %v5318_v47 = vadd.f32 %v4949_v16, %v295_v44 }
 0x1a9   :  { %v5310_v38 = vadd.f32 %v4949_v16, %v293_v40  ;;  %v310_v50 = vmul.f32 %v4950_v19, %v5318_v47 }
 0x1ab   :  { %v308_v45 = vmul.f32 %v4950_v19, %v5310_v38  ;;  %v5320_v48 = vpop.permute.xlu2 %666  ;;  %v321_v51 = vsel %vm7277_vm2, %v310_v50, 0.0 }
 0x1ad   :  { %v315_v41 = vsel %vm7277_vm2, %v308_v45, 0.0  ;;  %4423 = vset.pattern.permute.xlu0 %v5173_v9  ;;  %4425 = vset.pattern.permute.xlu1 %v5176_v10  ;;  %vm7290_vm2 = vcmp.ne.s32.totalorder %v5312_v43, 0 }
 0x1ae   :  { %319 = vadd.xlane.f32.xlu2 %v318_v36 }
 0x1b3   :  { %v5327_v24 = vpop.permute.xlu2 %679 }
 0x1b5   :  { %627 = vperm.xlu0 %4423, %v622_v39   ;;  %802 = vperm.xlu1 %4425, %v791_v60  }
 0x1b6   :  { %316 = vadd.xlane.f32.xlu2 %v315_v41 }
 0x1bb   :  { %v5331_v52 = vpop.permute.xlu2 %698 }
 0x1bd   :  { %692 = vperm.xlu0 %4423, %v687_v42   ;;  %815 = vperm.xlu1 %4425, %v804_v61  }
 0x1be   :  { %322 = vadd.xlane.f32.xlu2 %v321_v51 }
 0x1c3   :  { %v5339_v49 = vpop.permute.xlu2 %711 }
 0x1c4   :  { %7374 = vst [vmem:[#allocation3_spill] sm:$0xff] %v5339_v49 }
 0x1c5   :  { %757 = vperm.xlu0 %4423, %v752_v58   ;;  %4428 = vset.pattern.permute.xlu1 %v5049_v0 }
 0x1cb   :  { %v5345_v53 = vpop.permute.xlu2 %731 }
 0x1cc   :  { %7375 = vst [vmem:[#allocation4_spill] sm:$0xff] %v5345_v53 }
 0x1cd   :  { %822 = vperm.xlu0 %4423, %v817_v62  }
 0x1d3   :  { %v5348_v39 = vpop.permute.xlu2 %744 }
 0x1d4   :  { %7376 = vst [vmem:[#allocation5_spill] sm:$0xff] %v5348_v39 }
 0x1d5   :  { %4429 = vset.pattern.permute.xlu0 %v5049_v0 }
 0x1db   :  { %v5353_v37 = vpop.permute.xlu2 %763 }
 0x1dc   :  { %7377 = vst [vmem:[#allocation6_spill] sm:$0xff] %v5353_v37 }
 0x1e3   :  { %v5355_v42 = vpop.permute.xlu2 %776 }
 0x1e4   :  { %7378 = vst [vmem:[#allocation7_spill] sm:$0xff] %v5355_v42 }
 0x1eb   :  { %v5358_v25 = vpop.permute.xlu2 %796 }
 0x1ec   :  { %7379 = vst [vmem:[#allocation8_spill] sm:$0xff] %v5358_v25 }
 0x1f3   :  { %v5364_v9 = vpop.permute.xlu2 %809 }
 0x1f4   :  { %7380 = vst [vmem:[#allocation9_spill] sm:$0xff] %v5364_v9 }
 0x1fb   :  { %v5367_v46 = vpop.permute.xlu2 %828 }
 0x1fc   :  { %7381 = vst [vmem:[#allocation10_spill] sm:$0xff] %v5367_v46 }
 0x219   :  { %v314_v54 = vpop.xlane.xlu2 %313 }
 0x21a   :  { %v4151_v55 = vmul.f32 -1.442695, %v314_v54 }
 0x21c   :  { %4965 = vpow2.f32 %v4151_v55 }
 0x221   :  { %v320_v56 = vpop.xlane.xlu2 %319 }
 0x222   :  { %v4966_v57 = vpop.eup %4965  ;;  %v4153_v10 = vmul.f32 -1.442695, %v320_v56 }
 0x223   :  { %v336_v58 = vadd.f32 1.0, %v4966_v57 }
 0x224   :  { %4967 = vpow2.f32 %v4153_v10 }
 0x225   :  { %4969 = vrcp.f32 %v336_v58  ;;  %v351_v5 = vand.u32 2147483648, %v336_v58  ;;  %v349_v7 = vand.u32 2147483647, %v336_v58  ;;  %vm345_vm4 = vweird.f32 %v336_v58 }
 0x227   :  { %v352_v19 = vor.u32 1.1754944e-38, %v351_v5  ;;  %vm350_vm7 = vcmp.eq.f32.partialorder %v349_v7, 8.507059e+37 }
 0x229   :  { %v317_v59 = vpop.xlane.xlu2 %316 }
 0x22a   :  { %v4968_v60 = vpop.eup %4967  ;;  %v4152_v62 = vmul.f32 -1.442695, %v317_v59 }
 0x22b   :  { %v4970_v8 = vpop.eup %4969  ;;  %v338_v61 = vadd.f32 1.0, %v4968_v60 }
 0x22c   :  { %v341_v63 = vmul.f32 %v4970_v8, %v336_v58  ;;  %4971 = vpow2.f32 %v4152_v62  ;;  %vm346_vm3 = vweird.f32 %v4970_v8 }
 0x22d   :  { %4973 = vrcp.f32 %v338_v61  ;;  %vm347_vm6 = vmor %vm345_vm4, %vm346_vm3  ;;  %v381_v33 = vand.u32 2147483648, %v338_v61  ;;  %v379_v2 = vand.u32 2147483647, %v338_v61  ;;  %vm375_vm9 = vweird.f32 %v338_v61 }
 0x22e   :  { %v342_v0 = vsub.f32 1.0, %v341_v63 }
 0x22f   :  { %v382_v41 = vor.u32 1.1754944e-38, %v381_v33  ;;  %vm380_vm12 = vcmp.eq.f32.partialorder %v379_v2, 8.507059e+37 }
 0x230   :  { %v343_v6 = vmul.f32 %v4970_v8, %v342_v0 }
 0x231   :  { %v323_v11 = vpop.xlane.xlu2 %322 }
 0x232   :  { %v4972_v12 = vpop.eup %4971  ;;  %v344_v15 = vadd.f32 %v4970_v8, %v343_v6  ;;  %v4154_v16 = vmul.f32 -1.442695, %v323_v11 }
 0x233   :  { %v4974_v17 = vpop.eup %4973  ;;  %v337_v23 = vadd.f32 1.0, %v4972_v12 }
 0x234   :  { %v348_v26 = vsel %vm347_vm6, %v4970_v8, %v344_v15  ;;  %v371_v30 = vmul.f32 %v4974_v17, %v338_v61  ;;  %4975 = vpow2.f32 %v4154_v16  ;;  %vm376_vm8 = vweird.f32 %v4974_v17  ;;  %v5384_v61 = vpop.permute.xlu1 %640 }
 0x235   :  { %v5370_v31 = vsel %vm350_vm7, %v352_v19, %v348_v26  ;;  %4977 = vrcp.f32 %v337_v23  ;;  %vm377_vm11 = vmor %vm375_vm9, %vm376_vm8  ;;  %v366_v57 = vand.u32 2147483648, %v337_v23  ;;  %v364_v58 = vand.u32 2147483647, %v337_v23 }
 0x236   :  { %v5373_v40 = vsel %vm400_vm5, %v5370_v31, -1.0  ;;  %v372_v27 = vsub.f32 1.0, %v371_v30  ;;  %vm360_vm14 = vweird.f32 %v337_v23  ;;  %vm403_vm7 = vcmp.gt.f32.partialorder %v5153_v3, 0.5 }
 0x237   :  { %410 = vperm.xlu2 %4427, %v5373_v40   ;;  %v367_v60 = vor.u32 1.1754944e-38, %v366_v57  ;;  %vm365_vm4 = vcmp.eq.f32.partialorder %v364_v58, 8.507059e+37  ;;  %v7310_v57 = vmov 0.0  }
 0x238   :  { %v373_v35 = vmul.f32 %v4974_v17, %v372_v27  ;;  %v5409_v27 = vpop.permute.xlu0 %659 }
 0x23a   :  { %v4976_v36 = vpop.eup %4975  ;;  %v374_v44 = vadd.f32 %v4974_v17, %v373_v35 }
 0x23b   :  { %v4978_v45 = vpop.eup %4977  ;;  %v339_v28 = vadd.f32 1.0, %v4976_v36 }
 0x23c   :  { %v378_v50 = vsel %vm377_vm11, %v4974_v17, %v374_v44  ;;  %v356_v51 = vmul.f32 %v4978_v45, %v337_v23  ;;  %vm361_vm13 = vweird.f32 %v4978_v45  ;;  %v5398_v19 = vpop.permute.xlu1 %653 }
 0x23d   :  { %v5377_v54 = vsel %vm380_vm12, %v382_v41, %v378_v50  ;;  %4979 = vrcp.f32 %v339_v28  ;;  %vm362_vm3 = vmor %vm360_vm14, %vm361_vm13  ;;  %v396_v6 = vand.u32 2147483648, %v339_v28  ;;  %v394_v11 = vand.u32 2147483647, %v339_v28 }
 0x23e   :  { %v5380_v55 = vsel %vm402_vm10, %v5377_v54, -1.0  ;;  %v357_v56 = vsub.f32 1.0, %v356_v51  ;;  %vm390_vm6 = vweird.f32 %v339_v28  ;;  %vm7281_vm10 = vcmp.ne.s32.totalorder %v5320_v48, 0 }
 0x23f   :  { %418 = vperm.xlu1 %4428, %v5380_v55   ;;  %v397_v12 = vor.u32 1.1754944e-38, %v396_v6  ;;  %vm395_vm9 = vcmp.eq.f32.partialorder %v394_v11, 8.507059e+37 }
 0x240   :  { %v358_v10 = vmul.f32 %v4978_v45, %v357_v56  ;;  %v5413_v35 = vpop.permute.xlu0 %724 }
 0x241   :  { %7385 = vst [vmem:[#allocation14_spill] sm:$0xff] %v5413_v35 }
 0x242   :  { %v359_v1 = vadd.f32 %v4978_v45, %v358_v10 }
 0x243   :  { %v4980_v59 = vpop.eup %4979 }
 0x244   :  { %v363_v62 = vsel %vm362_vm3, %v4978_v45, %v359_v1  ;;  %v386_v8 = vmul.f32 %v4980_v59, %v339_v28  ;;  %vm391_vm5 = vweird.f32 %v4980_v59  ;;  %v5401_v23 = vpop.permute.xlu1 %672 }
 0x245   :  { %v5386_v63 = vsel %vm365_vm4, %v367_v60, %v363_v62  ;;  %vm392_vm8 = vmor %vm390_vm6, %vm391_vm5  ;;  %vm7280_vm14 = vcmp.ne.s32.totalorder %v5401_v23, 0 }
 0x246   :  { %v5389_v0 = vsel %vm401_vm15, %v5386_v63, -1.0  ;;  %v387_v5 = vsub.f32 1.0, %v386_v8 }
 0x247   :  { %414 = vperm.xlu0 %4429, %v5389_v0  }
 0x248   :  { %v388_v7 = vmul.f32 %v4980_v59, %v387_v5  ;;  %v5417_v36 = vpop.permute.xlu0 %789 }
 0x249   :  { %7387 = vst [vmem:[#allocation16_spill] sm:$0xff] %v5417_v36 }
 0x24a   :  { %v389_v4 = vadd.f32 %v4980_v59, %v388_v7 }
 0x24c   :  { %v393_v15 = vsel %vm392_vm8, %v4980_v59, %v389_v4  ;;  %v5403_v26 = vpop.permute.xlu1 %685  ;;  %vm7292_vm8 = vcmp.ne.s32.totalorder %v5384_v61, 0 }
 0x24d   :  { %v5393_v16 = vsel %vm395_vm9, %v397_v12, %v393_v15 }
 0x24e   :  { %v5396_v17 = vsel %vm403_vm7, %v5393_v16, -1.0 }
 0x24f   :  { %422 = vperm.xlu2 %4427, %v5396_v17  }
 0x250   :  { %v5430_v50 = vpop.permute.xlu0 %627 }
 0x254   :  { %v5405_v30 = vpop.permute.xlu1 %705 }
 0x255   :  { %7382 = vst [vmem:[#allocation11_spill] sm:$0xff] %v5405_v30 }
 0x258   :  { %v5467_v6 = vpop.permute.xlu0 %692 }
 0x25c   :  { %v5407_v3 = vpop.permute.xlu1 %718 }
 0x25d   :  { %7383 = vst [vmem:[#allocation12_spill] sm:$0xff] %v5407_v3 }
 0x264   :  { %v5411_v33 = vpop.permute.xlu1 %737 }
 0x265   :  { %7384 = vst [vmem:[#allocation13_spill] sm:$0xff] %v5411_v33 }
 0x26c   :  { %v5415_v2 = vpop.permute.xlu1 %750 }
 0x26d   :  { %7386 = vst [vmem:[#allocation15_spill] sm:$0xff] %v5415_v2 }
 0x274   :  { %v5419_v44 = vpop.permute.xlu1 %770 }
 0x275   :  { %7388 = vst [vmem:[#allocation17_spill] sm:$0xff] %v5419_v44 }
 0x27c   :  { %v5439_v56 = vpop.permute.xlu1 %783 }
 0x27d   :  { %7389 = vst [vmem:[#allocation18_spill] sm:$0xff] %v5439_v56 }
 0x284   :  { %v5469_v7 = vpop.permute.xlu1 %802 }
 0x285   :  { %7390 = vst [vmem:[#allocation19_spill] sm:$0xff] %v5469_v7 }
 0x291   :  { %v5421_v45 = vpop.permute.xlu2 %410 }
 0x292   :  { %v427_v41 = vperm.slane %v5421_v45, 3  ;;  %v425_v28 = vperm.slane %v5421_v45, 1  ;;  %v424_v51 = vperm.slane %v5421_v45, 0  ;;  %v431_v59 = vperm.slane %v5421_v45, 7 }
 0x293   :  { %v428_v5 = vperm.slane %v5421_v45, 4  ;;  %v426_v15 = vperm.slane %v5421_v45, 2 }
 0x294   :  { %vm494_vm11 = vcmp.gt.f32.partialorder %v5373_v40, %v427_v41  ;;  %vm558_vm12 = vcmp.eq.f32.partialorder %v5373_v40, %v427_v41  ;;  %vm559_vm13 = vcmp.eq.f32.partialorder %v5389_v0, %v427_v41  ;;  %vm495_vm15 = vcmp.gt.f32.partialorder %v5389_v0, %v427_v41 }
 0x295   :  { %vm868_vm3 = vmand %vm558_vm12, %vm7281_vm10  ;;  %vm554_vm5 = vcmp.eq.f32.partialorder %v5373_v40, %v425_v28  ;;  %vm555_vm7 = vcmp.eq.f32.partialorder %v5389_v0, %v425_v28  ;;  %vm490_vm12 = vcmp.gt.f32.partialorder %v5373_v40, %v425_v28  ;;  %vm488_vm1 = vcmp.gt.f32.partialorder %v5373_v40, %v424_v51 }
 0x296   :  { %vm869_vm4 = vmand %vm559_vm13, %vm7280_vm14  ;;  %vm491_vm13 = vcmp.gt.f32.partialorder %v5389_v0, %v425_v28  ;;  %vm489_vm14 = vcmp.gt.f32.partialorder %v5389_v0, %v424_v51  ;;  %vm503_vm10 = vcmp.gt.f32.partialorder %v5389_v0, %v431_v59 }
 0x297   :  { %vm932_vm6 = vmor %vm494_vm11, %vm868_vm3  ;;  %vm7283_vm11 = vcmp.ne.s32.totalorder %v5430_v50, 0  ;;  %vm552_vm3 = vcmp.eq.f32.partialorder %v5373_v40, %v424_v51 }
 0x298   :  { %vm933_vm9 = vmor %vm495_vm15, %vm869_vm4  ;;  %v4161_v10 = vsel %vm932_vm6, 1.0, %v7310_v57  ;;  %vm553_vm6 = vcmp.eq.f32.partialorder %v5389_v0, %v424_v51 }
 0x299   :  { %v4162_v58 = vsel %vm933_vm9, 1.0, %v7310_v57  ;;  %vm864_vm0 = vmand %vm554_vm5, %vm7292_vm8  ;;  %vm7282_vm5 = vcmp.ne.s32.totalorder %v5300_v29, 0 }
 0x29a   :  { %v4445_v1 = vpack.i.bf16 %v4162_v58, %v4161_v10  ;;  %vm865_vm15 = vmand %vm555_vm7, %vm7290_vm2  ;;  %v430_v10 = vperm.slane %v5421_v45, 6  ;;  %vm7296_vm2 = vcmp.ne.s32.totalorder %v5331_v52, 0 }
 0x29b   :  { %vm928_vm4 = vmor %vm490_vm12, %vm864_vm0  ;;  %vm566_vm12 = vcmp.eq.f32.partialorder %v5373_v40, %v431_v59 }
 0x29c   :  { %4446 = vperm.xlu0 %4429, %v4445_v1   ;;  %vm929_vm9 = vmor %vm491_vm13, %vm865_vm15  ;;  %v4157_v60 = vsel %vm928_vm4, 1.0, %v7310_v57  ;;  %vm567_vm15 = vcmp.eq.f32.partialorder %v5389_v0, %v431_v59  ;;  %vm7285_vm4 = vcmp.ne.s32.totalorder %v5407_v3, 0  ;;  %v5502_v1 = vpop.permute.xlu0 %757 }
 0x29d   :  { %v4158_v62 = vsel %vm929_vm9, 1.0, %v7310_v57  ;;  %vm862_vm7 = vmand %vm552_vm3, %vm7283_vm11  ;;  %vm502_vm3 = vcmp.gt.f32.partialorder %v5373_v40, %v431_v59  ;;  %vm496_vm11 = vcmp.gt.f32.partialorder %v5373_v40, %v428_v5  ;;  %7391 = vst [vmem:[#allocation20_spill] sm:$0xff] %v5502_v1  ;;  %v5504_v59 = vpop.permute.xlu1 %815 }
 0x29e   :  { %v4435_v8 = vpack.i.bf16 %v4158_v62, %v4157_v60  ;;  %vm863_vm0 = vmand %vm553_vm6, %vm7282_vm5  ;;  %vm7284_vm6 = vcmp.ne.s32.totalorder %v5413_v35, 0  ;;  %7392 = vst [vmem:[#allocation21_spill] sm:$0xff] %v5504_v59 }
 0x29f   :  { %vm926_vm13 = vmor %vm488_vm1, %vm862_vm7  ;;  %vm560_vm7 = vcmp.eq.f32.partialorder %v5373_v40, %v428_v5 }
 0x2a0   :  { %4436 = vperm.xlu2 %4427, %v4435_v8   ;;  %vm927_vm9 = vmor %vm489_vm14, %vm863_vm0  ;;  %v4155_v11 = vsel %vm926_vm13, 1.0, %v7310_v57  ;;  %vm561_vm0 = vcmp.eq.f32.partialorder %v5389_v0, %v428_v5  ;;  %vm7287_vm13 = vcmp.ne.s32.totalorder %v5327_v24, 0  ;;  %v429_v8 = vperm.slane %v5421_v45, 5 }
 0x2a1   :  { %v4156_v4 = vsel %vm927_vm9, 1.0, %v7310_v57  ;;  %vm876_vm5 = vmand %vm566_vm12, %vm7285_vm4  ;;  %vm7286_vm12 = vcmp.ne.s32.totalorder %v5403_v26, 0  ;;  %vm492_vm4 = vcmp.gt.f32.partialorder %v5373_v40, %v426_v15 }
 0x2a2   :  { %v4430_v12 = vpack.i.bf16 %v4156_v4, %v4155_v11  ;;  %vm877_vm1 = vmand %vm567_vm15, %vm7284_vm6  ;;  %vm497_vm15 = vcmp.gt.f32.partialorder %v5389_v0, %v428_v5 }
 0x2a3   :  { %vm940_vm14 = vmor %vm502_vm3, %vm876_vm5  ;;  %vm556_vm3 = vcmp.eq.f32.partialorder %v5373_v40, %v426_v15 }
 0x2a4   :  { %4431 = vperm.xlu1 %4428, %v4430_v12   ;;  %vm941_vm9 = vmor %vm503_vm10, %vm877_vm1  ;;  %v4169_v41 = vsel %vm940_vm14, 1.0, %v7310_v57  ;;  %vm557_vm1 = vcmp.eq.f32.partialorder %v5389_v0, %v426_v15  ;;  %vm7289_vm14 = vcmp.ne.s32.totalorder %v5398_v19, 0 }
 0x2a5   :  { %v4170_v28 = vsel %vm941_vm9, 1.0, %v7310_v57  ;;  %vm870_vm6 = vmand %vm560_vm7, %vm7287_vm13  ;;  %vm7288_vm7 = vcmp.ne.s32.totalorder %v5409_v27, 0  ;;  %vm500_vm13 = vcmp.gt.f32.partialorder %v5373_v40, %v430_v10 }
 0x2a6   :  { %v4465_v51 = vpack.i.bf16 %v4170_v28, %v4169_v41  ;;  %vm871_vm5 = vmand %vm561_vm0, %vm7286_vm12  ;;  %vm7293_vm12 = vcmp.ne.s32.totalorder %v5405_v30, 0 }
 0x2a7   :  { %vm934_vm10 = vmor %vm496_vm11, %vm870_vm6  ;;  %vm493_vm11 = vcmp.gt.f32.partialorder %v5389_v0, %v426_v15 }
 0x2a8   :  { %4466 = vperm.xlu0 %4429, %v4465_v51   ;;  %vm935_vm9 = vmor %vm497_vm15, %vm871_vm5  ;;  %v4163_v58 = vsel %vm934_vm10, 1.0, %v7310_v57  ;;  %vm564_vm15 = vcmp.eq.f32.partialorder %v5373_v40, %v430_v10  ;;  %vm565_vm10 = vcmp.eq.f32.partialorder %v5389_v0, %v430_v10 }
 0x2a9   :  { %v4164_v60 = vsel %vm935_vm9, 1.0, %v7310_v57  ;;  %vm866_vm6 = vmand %vm556_vm3, %vm7289_vm14  ;;  %vm7291_vm3 = vcmp.ne.s32.totalorder %v5339_v49, 0 }
 0x2aa   :  { %v4450_v62 = vpack.i.bf16 %v4164_v60, %v4163_v58  ;;  %vm867_vm0 = vmand %vm557_vm1, %vm7288_vm7  ;;  %vm501_vm1 = vcmp.gt.f32.partialorder %v5389_v0, %v430_v10  ;;  %v5541_v10 = vpop.permute.xlu0 %822 }
 0x2ab   :  { %vm930_vm5 = vmor %vm492_vm4, %vm866_vm6  ;;  %vm7297_vm4 = vcmp.ne.s32.totalorder %v5467_v6, 0  ;;  %7393 = vst [vmem:[#allocation22_spill] sm:$0xff] %v5541_v10 }
 0x2ac   :  { %4451 = vperm.xlu2 %4427, %v4450_v62   ;;  %vm931_vm9 = vmor %vm493_vm11, %vm867_vm0  ;;  %v4159_v5 = vsel %vm930_vm5, 1.0, %v7310_v57  ;;  %vm562_vm11 = vcmp.eq.f32.partialorder %v5373_v40, %v429_v8  ;;  %vm563_vm5 = vcmp.eq.f32.partialorder %v5389_v0, %v429_v8 }
 0x2ad   :  { %v4160_v11 = vsel %vm931_vm9, 1.0, %v7310_v57  ;;  %vm874_vm7 = vmand %vm564_vm15, %vm7293_vm12  ;;  %vm498_vm9 = vcmp.gt.f32.partialorder %v5373_v40, %v429_v8  ;;  %vm499_vm15 = vcmp.gt.f32.partialorder %v5389_v0, %v429_v8 }
 0x2ae   :  { %v4440_v45 = vpack.i.bf16 %v4160_v11, %v4159_v5  ;;  %vm875_vm6 = vmand %vm565_vm10, %vm7291_vm3 }
 0x2af   :  { %vm938_vm0 = vmor %vm500_vm13, %vm874_vm7 }
 0x2b0   :  { %4441 = vperm.xlu1 %4428, %v4440_v45   ;;  %vm939_vm14 = vmor %vm501_vm1, %vm875_vm6  ;;  %v4167_v4 = vsel %vm938_vm0, 1.0, %v7310_v57 }
 0x2b1   :  { %v4168_v12 = vsel %vm939_vm14, 1.0, %v7310_v57  ;;  %vm872_vm10 = vmand %vm562_vm11, %vm7297_vm4  ;;  %v5535_v15 = vpop.permute.xlu1 %418 }
 0x2b2   :  { %v4460_v41 = vpack.i.bf16 %v4168_v12, %v4167_v4  ;;  %vm873_vm13 = vmand %vm563_vm5, %vm7296_vm2  ;;  %v441_v28 = vperm.slane %v5535_v15, 1  ;;  %v444_v51 = vperm.slane %v5535_v15, 4  ;;  %v440_v8 = vperm.slane %v5535_v15, 0 }
 0x2b3   :  { %vm936_vm7 = vmor %vm498_vm9, %vm872_vm10  ;;  %vm7394_vm9 = vcmp.ne.s32.totalorder %v5312_v43, 0  ;;  %v442_v4 = vperm.slane %v5535_v15, 2 }
 0x2b4   :  { %4461 = vperm.xlu2 %4427, %v4460_v41   ;;  %vm937_vm14 = vmor %vm499_vm15, %vm873_vm13  ;;  %v4165_v58 = vsel %vm936_vm7, 1.0, %v7310_v57  ;;  %vm522_vm1 = vcmp.gt.f32.partialorder %v5380_v55, %v441_v28  ;;  %vm586_vm6 = vcmp.eq.f32.partialorder %v5380_v55, %v441_v28  ;;  %vm523_vm11 = vcmp.gt.f32.partialorder %v5396_v17, %v441_v28 }
 0x2b5   :  { %v4166_v60 = vsel %vm937_vm14, 1.0, %v7310_v57  ;;  %vm587_vm0 = vcmp.eq.f32.partialorder %v5396_v17, %v441_v28  ;;  %vm896_vm5 = vmand %vm586_vm6, %vm7292_vm8  ;;  %vm592_vm15 = vcmp.eq.f32.partialorder %v5380_v55, %v444_v51  ;;  %vm593_vm7 = vcmp.eq.f32.partialorder %v5396_v17, %v444_v51 }
 0x2b6   :  { %v4455_v62 = vpack.i.bf16 %v4166_v60, %v4165_v58  ;;  %vm897_vm10 = vmand %vm587_vm0, %vm7394_vm9  ;;  %vm528_vm3 = vcmp.gt.f32.partialorder %v5380_v55, %v444_v51  ;;  %vm529_vm6 = vcmp.gt.f32.partialorder %v5396_v17, %v444_v51  ;;  %vm7395_vm8 = vcmp.ne.s32.totalorder %v5327_v24, 0 }
 0x2b7   :  { %vm960_vm13 = vmor %vm522_vm1, %vm896_vm5  ;;  %vm7396_vm9 = vcmp.ne.s32.totalorder %v5403_v26, 0  ;;  %vm584_vm1 = vcmp.eq.f32.partialorder %v5380_v55, %v440_v8  ;;  %vm585_vm5 = vcmp.eq.f32.partialorder %v5396_v17, %v440_v8 }
 0x2b8   :  { %4456 = vperm.xlu1 %4428, %v4455_v62   ;;  %vm961_vm14 = vmor %vm523_vm11, %vm897_vm10  ;;  %v4189_v5 = vsel %vm960_vm13, 1.0, %v7310_v57  ;;  %vm520_vm13 = vcmp.gt.f32.partialorder %v5380_v55, %v440_v8 }
 0x2b9   :  { %v4190_v11 = vsel %vm961_vm14, 1.0, %v7310_v57  ;;  %vm902_vm0 = vmand %vm592_vm15, %vm7395_vm8  ;;  %v5566_v12 = vpop.permute.xlu0 %414  ;;  %vm521_vm8 = vcmp.gt.f32.partialorder %v5396_v17, %v440_v8  ;;  %vm7397_vm15 = vcmp.ne.s32.totalorder %v5430_v50, 0  ;;  %vm7398_vm14 = vcmp.ne.s32.totalorder %v5300_v29, 0 }
 0x2ba   :  { %v4475_v45 = vpack.i.bf16 %v4190_v11, %v4189_v5  ;;  %vm903_vm12 = vmand %vm593_vm7, %vm7396_vm9  ;;  %v432_v58 = vperm.slane %v5566_v12, 0  ;;  %v443_v5 = vperm.slane %v5535_v15, 3 }
 0x2bb   :  { %vm966_vm11 = vmor %vm528_vm3, %vm902_vm0  ;;  %vm588_vm3 = vcmp.eq.f32.partialorder %v5380_v55, %v442_v4 }
 0x2bc   :  { %4476 = vperm.xlu0 %4429, %v4475_v45   ;;  %vm967_vm10 = vmor %vm529_vm6, %vm903_vm12  ;;  %v4195_v41 = vsel %vm966_vm11, 1.0, %v7310_v57  ;;  %vm589_vm6 = vcmp.eq.f32.partialorder %v5396_v17, %v442_v4  ;;  %vm524_vm11 = vcmp.gt.f32.partialorder %v5380_v55, %v442_v4 }
 0x2bd   :  { %v4196_v28 = vsel %vm967_vm10, 1.0, %v7310_v57  ;;  %vm894_vm7 = vmand %vm584_vm1, %vm7397_vm15  ;;  %vm525_vm1 = vcmp.gt.f32.partialorder %v5396_v17, %v442_v4  ;;  %vm7399_vm10 = vcmp.ne.s32.totalorder %v5398_v19, 0  ;;  %vm7400_vm15 = vcmp.ne.s32.totalorder %v5409_v27, 0 }
 0x2be   :  { %v4490_v51 = vpack.i.bf16 %v4196_v28, %v4195_v41  ;;  %vm895_vm9 = vmand %vm585_vm5, %vm7398_vm14  ;;  %v445_v41 = vperm.slane %v5535_v15, 5 }
 0x2bf   :  { %vm958_vm12 = vmor %vm520_vm13, %vm894_vm7  ;;  %vm568_vm13 = vcmp.eq.f32.partialorder %v5373_v40, %v432_v58  ;;  %vm569_vm7 = vcmp.eq.f32.partialorder %v5389_v0, %v432_v58 }
 0x2c0   :  { %4491 = vperm.xlu2 %4427, %v4490_v51   ;;  %vm959_vm0 = vmor %vm521_vm8, %vm895_vm9  ;;  %v4187_v60 = vsel %vm958_vm12, 1.0, %v7310_v57  ;;  %vm7295_vm9 = vcmp.ne.s32.totalorder %v5345_v53, 0 }
 0x2c1   :  { %v4188_v62 = vsel %vm959_vm0, 1.0, %v7310_v57  ;;  %vm898_vm5 = vmand %vm588_vm3, %vm7399_vm10  ;;  %vm504_vm0 = vcmp.gt.f32.partialorder %v5373_v40, %v432_v58  ;;  %vm7294_vm3 = vcmp.ne.s32.totalorder %v5411_v33, 0 }
 0x2c2   :  { %v4470_v8 = vpack.i.bf16 %v4188_v62, %v4187_v60  ;;  %vm899_vm14 = vmand %vm589_vm6, %vm7400_vm15  ;;  %vm505_vm6 = vcmp.gt.f32.partialorder %v5389_v0, %v432_v58  ;;  %vm591_vm15 = vcmp.eq.f32.partialorder %v5396_v17, %v443_v5  ;;  %v435_v60 = vperm.slane %v5566_v12, 3 }
 0x2c3   :  { %vm962_vm8 = vmor %vm524_vm11, %vm898_vm5  ;;  %vm590_vm5 = vcmp.eq.f32.partialorder %v5380_v55, %v443_v5 }
 0x2c4   :  { %4471 = vperm.xlu1 %4428, %v4470_v8   ;;  %vm963_vm12 = vmor %vm525_vm1, %vm899_vm14  ;;  %v4191_v11 = vsel %vm962_vm8, 1.0, %v7310_v57  ;;  %vm526_vm8 = vcmp.gt.f32.partialorder %v5380_v55, %v443_v5 }
 0x2c5   :  { %v4192_v45 = vsel %vm963_vm12, 1.0, %v7310_v57  ;;  %vm878_vm10 = vmand %vm568_vm13, %vm7295_vm9  ;;  %vm527_vm13 = vcmp.gt.f32.partialorder %v5396_v17, %v443_v5  ;;  %vm7401_vm12 = vcmp.ne.s32.totalorder %v5320_v48, 0 }
 0x2c6   :  { %v4480_v4 = vpack.i.bf16 %v4192_v45, %v4191_v11  ;;  %vm879_vm11 = vmand %vm569_vm7, %vm7294_vm3  ;;  %vm7402_vm3 = vcmp.ne.s32.totalorder %v5401_v23, 0  ;;  %v446_v11 = vperm.slane %v5535_v15, 6 }
 0x2c7   :  { %vm942_vm1 = vmor %vm504_vm0, %vm878_vm10  ;;  %vm594_vm0 = vcmp.eq.f32.partialorder %v5380_v55, %v445_v41  ;;  %vm595_vm10 = vcmp.eq.f32.partialorder %v5396_v17, %v445_v41 }
 0x2c8   :  { %4481 = vperm.xlu0 %4429, %v4480_v4   ;;  %vm943_vm14 = vmor %vm505_vm6, %vm879_vm11  ;;  %v4171_v28 = vsel %vm942_vm1, 1.0, %v7310_v57  ;;  %vm530_vm1 = vcmp.gt.f32.partialorder %v5380_v55, %v445_v41 }
 0x2c9   :  { %v4172_v51 = vsel %vm943_vm14, 1.0, %v7310_v57  ;;  %vm900_vm7 = vmand %vm590_vm5, %vm7401_vm12  ;;  %vm531_vm5 = vcmp.gt.f32.partialorder %v5396_v17, %v445_v41  ;;  %vm574_vm14 = vcmp.eq.f32.partialorder %v5373_v40, %v435_v60 }
 0x2ca   :  { %v4505_v58 = vpack.i.bf16 %v4172_v51, %v4171_v28  ;;  %vm901_vm9 = vmand %vm591_vm15, %vm7402_vm3  ;;  %v434_v28 = vperm.slane %v5566_v12, 2 }
 0x2cb   :  { %vm964_vm6 = vmor %vm526_vm8, %vm900_vm7  ;;  %vm575_vm8 = vcmp.eq.f32.partialorder %v5389_v0, %v435_v60  ;;  %vm510_vm7 = vcmp.gt.f32.partialorder %v5373_v40, %v435_v60 }
 0x2cc   :  { %4506 = vperm.xlu2 %4427, %v4505_v58   ;;  %vm965_vm11 = vmor %vm527_vm13, %vm901_vm9  ;;  %v4193_v62 = vsel %vm964_vm6, 1.0, %v7310_v57  ;;  %vm7309_vm13 = vcmp.ne.s32.totalorder %v5419_v44, 0  ;;  %vm511_vm6 = vcmp.gt.f32.partialorder %v5389_v0, %v435_v60 }
 0x2cd   :  { %v4194_v8 = vsel %vm965_vm11, 1.0, %v7310_v57  ;;  %vm904_vm3 = vmand %vm594_vm0, %vm7297_vm4  ;;  %vm7308_vm0 = vcmp.ne.s32.totalorder %v5355_v42, 0 }
 0x2ce   :  { %v4485_v5 = vpack.i.bf16 %v4194_v8, %v4193_v62  ;;  %vm905_vm15 = vmand %vm595_vm10, %vm7296_vm2  ;;  %vm7404_vm2 = vcmp.ne.s32.totalorder %v5339_v49, 0  ;;  %v439_v62 = vperm.slane %v5566_v12, 7 }
 0x2cf   :  { %vm968_vm9 = vmor %vm530_vm1, %vm904_vm3  ;;  %vm596_vm1 = vcmp.eq.f32.partialorder %v5380_v55, %v446_v11  ;;  %vm597_vm3 = vcmp.eq.f32.partialorder %v5396_v17, %v446_v11 }
 0x2d0   :  { %4486 = vperm.xlu1 %4428, %v4485_v5   ;;  %vm969_vm12 = vmor %vm531_vm5, %vm905_vm15  ;;  %v4197_v45 = vsel %vm968_vm9, 1.0, %v7310_v57  ;;  %vm532_vm9 = vcmp.gt.f32.partialorder %v5380_v55, %v446_v11 }
 0x2d1   :  { %v4198_v4 = vsel %vm969_vm12, 1.0, %v7310_v57  ;;  %vm884_vm10 = vmand %vm574_vm14, %vm7309_vm13  ;;  %vm533_vm14 = vcmp.gt.f32.partialorder %v5396_v17, %v446_v11  ;;  %vm7403_vm12 = vcmp.ne.s32.totalorder %v5405_v30, 0 }
 0x2d2   :  { %v4495_v41 = vpack.i.bf16 %v4198_v4, %v4197_v45  ;;  %vm885_vm11 = vmand %vm575_vm8, %vm7308_vm0  ;;  %v433_v45 = vperm.slane %v5566_v12, 1 }
 0x2d3   :  { %vm948_vm5 = vmor %vm510_vm7, %vm884_vm10  ;;  %vm572_vm7 = vcmp.eq.f32.partialorder %v5373_v40, %v434_v28  ;;  %vm573_vm10 = vcmp.eq.f32.partialorder %v5389_v0, %v434_v28 }
 0x2d4   :  { %4496 = vperm.xlu0 %4429, %v4495_v41   ;;  %vm949_vm15 = vmor %vm511_vm6, %vm885_vm11  ;;  %v4177_v51 = vsel %vm948_vm5, 1.0, %v7310_v57  ;;  %vm7299_vm11 = vcmp.ne.s32.totalorder %v5502_v1, 0 }
 0x2d5   :  { %v4178_v58 = vsel %vm949_vm15, 1.0, %v7310_v57  ;;  %vm906_vm8 = vmand %vm596_vm1, %vm7403_vm12  ;;  %vm508_vm15 = vcmp.gt.f32.partialorder %v5373_v40, %v434_v28  ;;  %vm7298_vm1 = vcmp.ne.s32.totalorder %v5353_v37, 0  ;;  %vm582_vm12 = vcmp.eq.f32.partialorder %v5373_v40, %v439_v62 }
 0x2d6   :  { %v4520_v60 = vpack.i.bf16 %v4178_v58, %v4177_v51  ;;  %vm907_vm4 = vmand %vm597_vm3, %vm7404_vm2  ;;  %vm509_vm2 = vcmp.gt.f32.partialorder %v5389_v0, %v434_v28  ;;  %v437_v51 = vperm.slane %v5566_v12, 5 }
 0x2d7   :  { %vm970_vm6 = vmor %vm532_vm9, %vm906_vm8  ;;  %vm7301_vm8 = vcmp.ne.s32.totalorder %v5541_v10, 0 }
 0x2d8   :  { %4521 = vperm.xlu2 %4427, %v4520_v60   ;;  %vm971_vm5 = vmor %vm533_vm14, %vm907_vm4  ;;  %v4199_v8 = vsel %vm970_vm6, 1.0, %v7310_v57  ;;  %vm583_vm14 = vcmp.eq.f32.partialorder %v5389_v0, %v439_v62 }
 0x2d9   :  { %v4200_v5 = vsel %vm971_vm5, 1.0, %v7310_v57  ;;  %vm882_vm3 = vmand %vm572_vm7, %vm7299_vm11  ;;  %vm518_vm5 = vcmp.gt.f32.partialorder %v5373_v40, %v439_v62  ;;  %vm7300_vm7 = vcmp.ne.s32.totalorder %v5367_v46, 0  ;;  %vm506_vm11 = vcmp.gt.f32.partialorder %v5373_v40, %v433_v45 }
 0x2da   :  { %v4500_v11 = vpack.i.bf16 %v4200_v5, %v4199_v8  ;;  %vm883_vm9 = vmand %vm573_vm10, %vm7298_vm1  ;;  %vm519_vm10 = vcmp.gt.f32.partialorder %v5389_v0, %v439_v62  ;;  %v436_v8 = vperm.slane %v5566_v12, 4  ;;  %v5688_v5 = vpop.permute.xlu2 %422 }
 0x2db   :  { %vm946_vm4 = vmor %vm508_vm15, %vm882_vm3  ;;  %vm570_vm3 = vcmp.eq.f32.partialorder %v5373_v40, %v433_v45 }
 0x2dc   :  { %4501 = vperm.xlu1 %4428, %v4500_v11   ;;  %vm947_vm6 = vmor %vm509_vm2, %vm883_vm9  ;;  %v4175_v4 = vsel %vm946_vm4, 1.0, %v7310_v57  ;;  %vm571_vm9 = vcmp.eq.f32.partialorder %v5389_v0, %v433_v45  ;;  %vm7303_vm4 = vcmp.ne.s32.totalorder %v5348_v39, 0 }
 0x2dd   :  { %v4176_v41 = vsel %vm947_vm6, 1.0, %v7310_v57  ;;  %vm892_vm1 = vmand %vm582_vm12, %vm7301_vm8  ;;  %vm7302_vm12 = vcmp.ne.s32.totalorder %v5415_v2, 0  ;;  %vm7304_vm8 = vcmp.ne.s32.totalorder %v5469_v7, 0 }
 0x2de   :  { %v4515_v28 = vpack.i.bf16 %v4176_v41, %v4175_v4  ;;  %vm893_vm15 = vmand %vm583_vm14, %vm7300_vm7  ;;  %vm507_vm14 = vcmp.gt.f32.partialorder %v5389_v0, %v433_v45  ;;  %v448_v41 = vperm.slane %v5688_v5, 0 }
 0x2df   :  { %vm956_vm2 = vmor %vm518_vm5, %vm892_vm1  ;;  %vm578_vm5 = vcmp.eq.f32.partialorder %v5373_v40, %v437_v51 }
 0x2e0   :  { %4516 = vperm.xlu0 %4429, %v4515_v28   ;;  %vm957_vm6 = vmor %vm519_vm10, %vm893_vm15  ;;  %v4185_v58 = vsel %vm956_vm2, 1.0, %v7310_v57  ;;  %vm579_vm15 = vcmp.eq.f32.partialorder %v5389_v0, %v437_v51  ;;  %vm7307_vm2 = vcmp.ne.s32.totalorder %v5358_v25, 0 }
 0x2e1   :  { %v4186_v60 = vsel %vm957_vm6, 1.0, %v7310_v57  ;;  %vm880_vm7 = vmand %vm570_vm3, %vm7303_vm4  ;;  %vm514_vm3 = vcmp.gt.f32.partialorder %v5373_v40, %v437_v51  ;;  %vm512_vm4 = vcmp.gt.f32.partialorder %v5373_v40, %v436_v8 }
 0x2e2   :  { %v4540_v62 = vpack.i.bf16 %v4186_v60, %v4185_v58  ;;  %vm881_vm1 = vmand %vm571_vm9, %vm7302_vm12  ;;  %vm515_vm9 = vcmp.gt.f32.partialorder %v5389_v0, %v437_v51  ;;  %v438_v60 = vperm.slane %v5566_v12, 6  ;;  %v451_v12 = vperm.slane %v5688_v5, 3 }
 0x2e3   :  { %vm944_vm10 = vmor %vm506_vm11, %vm880_vm7  ;;  %vm576_vm7 = vcmp.eq.f32.partialorder %v5373_v40, %v436_v8 }
 0x2e4   :  { %4541 = vperm.xlu2 %4427, %v4540_v62   ;;  %vm945_vm6 = vmor %vm507_vm14, %vm881_vm1  ;;  %v4173_v11 = vsel %vm944_vm10, 1.0, %v7310_v57  ;;  %vm577_vm1 = vcmp.eq.f32.partialorder %v5389_v0, %v436_v8  ;;  %vm7305_vm10 = vcmp.ne.s32.totalorder %v5439_v56, 0 }
 0x2e5   :  { %v4174_v45 = vsel %vm945_vm6, 1.0, %v7310_v57  ;;  %vm888_vm12 = vmand %vm578_vm5, %vm7307_vm2  ;;  %vm7306_vm5 = vcmp.ne.s32.totalorder %v5417_v36, 0 }
 0x2e6   :  { %v4510_v4 = vpack.i.bf16 %v4174_v45, %v4173_v11  ;;  %vm889_vm11 = vmand %vm579_vm15, %vm7304_vm8  ;;  %vm513_vm15 = vcmp.gt.f32.partialorder %v5389_v0, %v436_v8 }
 0x2e7   :  { %vm952_vm14 = vmor %vm514_vm3, %vm888_vm12  ;;  %vm600_vm3 = vcmp.eq.f32.partialorder %v5380_v55, %v448_v41 }
 0x2e8   :  { %4511 = vperm.xlu1 %4428, %v4510_v4   ;;  %vm953_vm6 = vmor %vm515_vm9, %vm889_vm11  ;;  %v4181_v28 = vsel %vm952_vm14, 1.0, %v7310_v57  ;;  %vm601_vm11 = vcmp.eq.f32.partialorder %v5396_v17, %v448_v41 }
 0x2e9   :  { %v4182_v51 = vsel %vm953_vm6, 1.0, %v7310_v57  ;;  %vm886_vm8 = vmand %vm576_vm7, %vm7305_vm10  ;;  %vm536_vm6 = vcmp.gt.f32.partialorder %v5380_v55, %v448_v41  ;;  %vm537_vm7 = vcmp.gt.f32.partialorder %v5396_v17, %v448_v41  ;;  %vm7405_vm10 = vcmp.ne.s32.totalorder %v5345_v53, 0 }
 0x2ea   :  { %v4530_v58 = vpack.i.bf16 %v4182_v51, %v4181_v28  ;;  %vm887_vm12 = vmand %vm577_vm1, %vm7306_vm5  ;;  %vm7406_vm5 = vcmp.ne.s32.totalorder %v5411_v33, 0  ;;  %v450_v28 = vperm.slane %v5688_v5, 2 }
 0x2eb   :  { %vm950_vm9 = vmor %vm512_vm4, %vm886_vm8  ;;  %vm580_vm8 = vcmp.eq.f32.partialorder %v5373_v40, %v438_v60 }
 0x2ec   :  { %4531 = vperm.xlu0 %4429, %v4530_v58   ;;  %vm951_vm14 = vmor %vm513_vm15, %vm887_vm12  ;;  %v4179_v62 = vsel %vm950_vm9, 1.0, %v7310_v57  ;;  %vm581_vm15 = vcmp.eq.f32.partialorder %v5389_v0, %v438_v60  ;;  %vm7356_vm12 = vcmp.ne.s32.totalorder %v5364_v9, 0  ;;  %v454_v58 = vperm.slane %v5688_v5, 6 }
 0x2ed   :  { %v4180_v8 = vsel %vm951_vm14, 1.0, %v7310_v57  ;;  %vm910_vm1 = vmand %vm600_vm3, %vm7405_vm10  ;;  %vm516_vm14 = vcmp.gt.f32.partialorder %v5373_v40, %v438_v60  ;;  %vm7355_vm10 = vcmp.ne.s32.totalorder %v5504_v59, 0 }
 0x2ee   :  { %v4525_v11 = vpack.i.bf16 %v4180_v8, %v4179_v62  ;;  %vm911_vm2 = vmand %vm601_vm11, %vm7406_vm5  ;;  %vm517_vm5 = vcmp.gt.f32.partialorder %v5389_v0, %v438_v60 }
 0x2ef   :  { %vm974_vm4 = vmor %vm536_vm6, %vm910_vm1  ;;  %vm606_vm6 = vcmp.eq.f32.partialorder %v5380_v55, %v451_v12 }
 0x2f0   :  { %4526 = vperm.xlu1 %4428, %v4525_v11   ;;  %vm975_vm9 = vmor %vm537_vm7, %vm911_vm2  ;;  %v4203_v45 = vsel %vm974_vm4, 1.0, %v7310_v57  ;;  %vm607_vm7 = vcmp.eq.f32.partialorder %v5396_v17, %v451_v12  ;;  %vm542_vm4 = vcmp.gt.f32.partialorder %v5380_v55, %v451_v12  ;;  %v449_v11 = vperm.slane %v5688_v5, 1 }
 0x2f1   :  { %v4204_v4 = vsel %vm975_vm9, 1.0, %v7310_v57  ;;  %vm890_vm3 = vmand %vm580_vm8, %vm7356_vm12  ;;  %vm543_vm8 = vcmp.gt.f32.partialorder %v5396_v17, %v451_v12 }
 0x2f2   :  { %v4545_v41 = vpack.i.bf16 %v4204_v4, %v4203_v45  ;;  %vm891_vm11 = vmand %vm581_vm15, %vm7355_vm10 }
 0x2f3   :  { %vm954_vm2 = vmor %vm516_vm14, %vm890_vm3  ;;  %vm604_vm14 = vcmp.eq.f32.partialorder %v5380_v55, %v450_v28  ;;  %vm605_vm3 = vcmp.eq.f32.partialorder %v5396_v17, %v450_v28 }
 0x2f4   :  { %4546 = vperm.xlu2 %4427, %v4545_v41   ;;  %vm955_vm1 = vmor %vm517_vm5, %vm891_vm11  ;;  %v4183_v40 = vsel %vm954_vm2, 1.0, %v7310_v57  ;;  %vm540_vm2 = vcmp.gt.f32.partialorder %v5380_v55, %v450_v28  ;;  %v453_v41 = vperm.slane %v5688_v5, 5 }
 0x2f5   :  { %v4184_v0 = vsel %vm955_vm1, 1.0, %v7310_v57  ;;  %vm916_vm15 = vmand %vm606_vm6, %vm7309_vm13  ;;  %vm541_vm6 = vcmp.gt.f32.partialorder %v5396_v17, %v450_v28  ;;  %vm7407_vm1 = vcmp.ne.s32.totalorder %v5502_v1, 0 }
 0x2f6   :  { %v4535_v51 = vpack.i.bf16 %v4184_v0, %v4183_v40  ;;  %vm917_vm9 = vmand %vm607_vm7, %vm7308_vm0  ;;  %vm7408_vm0 = vcmp.ne.s32.totalorder %v5353_v37, 0 }
 0x2f7   :  { %vm980_vm5 = vmor %vm542_vm4, %vm916_vm15  ;;  %vm612_vm4 = vcmp.eq.f32.partialorder %v5380_v55, %v454_v58  ;;  %vm613_vm15 = vcmp.eq.f32.partialorder %v5396_v17, %v454_v58 }
 0x2f8   :  { %4536 = vperm.xlu1 %4428, %v4535_v51   ;;  %vm981_vm11 = vmor %vm543_vm8, %vm917_vm9  ;;  %v4209_v60 = vsel %vm980_vm5, 1.0, %v7310_v57  ;;  %vm548_vm5 = vcmp.gt.f32.partialorder %v5380_v55, %v454_v58  ;;  %v452_v51 = vperm.slane %v5688_v5, 4 }
 0x2f9   :  { %v4210_v62 = vsel %vm981_vm11, 1.0, %v7310_v57  ;;  %vm914_vm7 = vmand %vm604_vm14, %vm7407_vm1  ;;  %vm549_vm14 = vcmp.gt.f32.partialorder %v5396_v17, %v454_v58  ;;  %vm602_vm11 = vcmp.eq.f32.partialorder %v5380_v55, %v449_v11  ;;  %vm538_vm1 = vcmp.gt.f32.partialorder %v5380_v55, %v449_v11 }
 0x2fa   :  { %v4560_v8 = vpack.i.bf16 %v4210_v62, %v4209_v60  ;;  %vm915_vm13 = vmand %vm605_vm3, %vm7408_vm0 }
 0x2fb   :  { %vm978_vm8 = vmor %vm540_vm2, %vm914_vm7  ;;  %vm603_vm2 = vcmp.eq.f32.partialorder %v5396_v17, %v449_v11  ;;  %vm539_vm7 = vcmp.gt.f32.partialorder %v5396_v17, %v449_v11 }
 0x2fc   :  { %4561 = vperm.xlu0 %4429, %v4560_v8   ;;  %vm979_vm9 = vmor %vm541_vm6, %vm915_vm13  ;;  %v4207_v12 = vsel %vm978_vm8, 1.0, %v7310_v57  ;;  %v447_v8 = vperm.slane %v5535_v15, 7  ;;  %v455_v15 = vperm.slane %v5688_v5, 7  ;;  %v4437_v5 = vpop.permute.xlu2 %4436 }
 0x2fd   :  { %v4208_v45 = vsel %vm979_vm9, 1.0, %v7310_v57  ;;  %vm922_vm0 = vmand %vm612_vm4, %vm7356_vm12  ;;  %vm7409_vm4 = vcmp.ne.s32.totalorder %v5348_v39, 0 }
 0x2fe   :  { %v4555_v4 = vpack.i.bf16 %v4208_v45, %v4207_v12  ;;  %vm923_vm3 = vmand %vm613_vm15, %vm7355_vm10  ;;  %vm7410_vm15 = vcmp.ne.s32.totalorder %v5415_v2, 0 }
 0x2ff   :  { %vm986_vm13 = vmor %vm548_vm5, %vm922_vm0  ;;  %vm610_vm5 = vcmp.eq.f32.partialorder %v5380_v55, %v453_v41  ;;  %vm611_vm0 = vcmp.eq.f32.partialorder %v5396_v17, %v453_v41 }
 0x300   :  { %4556 = vperm.xlu2 %4427, %v4555_v4   ;;  %vm987_vm6 = vmor %vm549_vm14, %vm923_vm3  ;;  %v4215_v28 = vsel %vm986_vm13, 1.0, %v7310_v57  ;;  %vm546_vm13 = vcmp.gt.f32.partialorder %v5380_v55, %v453_v41 }
 0x301   :  { %v4216_v40 = vsel %vm987_vm6, 1.0, %v7310_v57  ;;  %vm912_vm8 = vmand %vm602_vm11, %vm7409_vm4  ;;  %vm547_vm11 = vcmp.gt.f32.partialorder %v5396_v17, %v453_v41  ;;  %vm7411_vm6 = vcmp.ne.s32.totalorder %v5358_v25, 0  ;;  %vm7412_vm4 = vcmp.ne.s32.totalorder %v5469_v7, 0 }
 0x302   :  { %v4580_v0 = vpack.i.bf16 %v4216_v40, %v4215_v28  ;;  %vm913_vm9 = vmand %vm603_vm2, %vm7410_vm15 }
 0x303   :  { %vm976_vm14 = vmor %vm538_vm1, %vm912_vm8  ;;  %vm608_vm1 = vcmp.eq.f32.partialorder %v5380_v55, %v452_v51  ;;  %vm609_vm8 = vcmp.eq.f32.partialorder %v5396_v17, %v452_v51 }
 0x304   :  { %4581 = vperm.xlu0 %4429, %v4580_v0   ;;  %vm977_vm3 = vmor %vm539_vm7, %vm913_vm9  ;;  %v4205_v58 = vsel %vm976_vm14, 1.0, %v7310_v57  ;;  %vm544_vm14 = vcmp.gt.f32.partialorder %v5380_v55, %v452_v51 }
 0x305   :  { %v4206_v60 = vsel %vm977_vm3, 1.0, %v7310_v57  ;;  %vm920_vm2 = vmand %vm610_vm5, %vm7411_vm6  ;;  %vm545_vm5 = vcmp.gt.f32.partialorder %v5396_v17, %v452_v51  ;;  %vm7413_vm3 = vcmp.ne.s32.totalorder %v5439_v56, 0  ;;  %vm7414_vm6 = vcmp.ne.s32.totalorder %v5417_v36, 0 }
 0x306   :  { %v4550_v62 = vpack.i.bf16 %v4206_v60, %v4205_v58  ;;  %vm921_vm15 = vmand %vm611_vm0, %vm7412_vm4 }
 0x307   :  { %vm984_vm7 = vmor %vm546_vm13, %vm920_vm2  ;;  %vm598_vm13 = vcmp.eq.f32.partialorder %v5380_v55, %v447_v8  ;;  %vm599_vm2 = vcmp.eq.f32.partialorder %v5396_v17, %v447_v8 }
 0x308   :  { %4551 = vperm.xlu1 %4428, %v4550_v62   ;;  %vm985_vm9 = vmor %vm547_vm11, %vm921_vm15  ;;  %v4213_v11 = vsel %vm984_vm7, 1.0, %v7310_v57  ;;  %vm534_vm7 = vcmp.gt.f32.partialorder %v5380_v55, %v447_v8 }
 0x309   :  { %v4214_v12 = vsel %vm985_vm9, 1.0, %v7310_v57  ;;  %vm918_vm0 = vmand %vm608_vm1, %vm7413_vm3  ;;  %vm535_vm1 = vcmp.gt.f32.partialorder %v5396_v17, %v447_v8  ;;  %vm7415_vm9 = vcmp.ne.s32.totalorder %v5407_v3, 0  ;;  %vm7416_vm3 = vcmp.ne.s32.totalorder %v5413_v35, 0 }
 0x30a   :  { %v4570_v45 = vpack.i.bf16 %v4214_v12, %v4213_v11  ;;  %vm919_vm4 = vmand %vm609_vm8, %vm7414_vm6 }
 0x30b   :  { %vm982_vm11 = vmor %vm544_vm14, %vm918_vm0  ;;  %vm614_vm14 = vcmp.eq.f32.partialorder %v5380_v55, %v455_v15 }
 0x30c   :  { %4571 = vperm.xlu2 %4427, %v4570_v45   ;;  %vm983_vm15 = vmor %vm545_vm5, %vm919_vm4  ;;  %v4211_v4 = vsel %vm982_vm11, 1.0, %v7310_v57  ;;  %vm615_vm5 = vcmp.eq.f32.partialorder %v5396_v17, %v455_v15  ;;  %vm550_vm11 = vcmp.gt.f32.partialorder %v5380_v55, %v455_v15  ;;  %v4452_v55 = vpop.permute.xlu2 %4451  ;;  %v4439_v45 = vunpack.i.h.bf16 %v4437_v5 }
 0x30d   :  { %v4212_v41 = vsel %vm983_vm15, 1.0, %v7310_v57  ;;  %vm908_vm8 = vmand %vm598_vm13, %vm7415_vm9  ;;  %vm551_vm13 = vcmp.gt.f32.partialorder %v5396_v17, %v455_v15  ;;  %vm7417_vm15 = vcmp.ne.s32.totalorder %v5541_v10, 0  ;;  %v4438_v15 = vunpack.i.l.bf16 %v4437_v5 }
 0x30e   :  { %v4565_v28 = vpack.i.bf16 %v4212_v41, %v4211_v4  ;;  %vm909_vm6 = vmand %vm599_vm2, %vm7416_vm3  ;;  %vm7418_vm2 = vcmp.ne.s32.totalorder %v5367_v46, 0  ;;  %v4447_v11 = vpop.permute.xlu0 %4446  ;;  %v4453_v10 = vunpack.i.l.bf16 %v4452_v55 }
 0x30f   :  { %vm972_vm0 = vmor %vm534_vm7, %vm908_vm8 }
 0x310   :  { %4566 = vperm.xlu1 %4428, %v4565_v28   ;;  %vm973_vm4 = vmor %vm535_vm1, %vm909_vm6  ;;  %v4201_v40 = vsel %vm972_vm0, 1.0, %v7310_v57  ;;  %v1378_v28 = vperm.slane %v4439_v45, %v5184_v14  ;;  %vm7354_vm1 = vcmask 1041409   ;;  %vm7419_vm6 = vcmask 130112  }
 0x311   :  { %v4202_v0 = vsel %vm973_vm4, 1.0, %v7310_v57  ;;  %vm924_vm9 = vmand %vm614_vm14, %vm7417_vm15  ;;  %vm7353_vm0 = vcmask 1042434   ;;  %vm7352_vm4 = vcmask 1043459   ;;  %vm7350_vm15 = vcmask 1045509  }
 0x312   :  { %v4575_v51 = vpack.i.bf16 %v4202_v0, %v4201_v40  ;;  %vm925_vm3 = vmand %vm615_vm5, %vm7418_vm2  ;;  %v1377_v40 = vperm.slane %v4438_v15, %v5181_v13  ;;  %vm7349_vm2 = vcmask 1046534  }
 0x313   :  { %vm988_vm7 = vmor %vm550_vm11, %vm924_vm9 }
 0x314   :  { %4576 = vperm.xlu2 %4427, %v4575_v51   ;;  %vm989_vm8 = vmor %vm551_vm13, %vm925_vm3  ;;  %v4217_v58 = vsel %vm988_vm7, 1.0, %v7310_v57  ;;  %v4462_v0 = vpop.permute.xlu2 %4461  ;;  %vm7351_vm13 = vcmask 1044484   ;;  %vm7348_vm3 = vcmask 1047559  }
 0x315   :  { %v4218_v60 = vsel %vm989_vm8, 1.0, %v7310_v57  ;;  %v4449_v57 = vunpack.i.h.bf16 %v4447_v11  ;;  %vm7420_vm14 = vmmov %vm7419_vm6  ;;  %v4464_v15 = vunpack.i.h.bf16 %v4462_v0  ;;  %v4463_v56 = vunpack.i.l.bf16 %v4462_v0 }
 0x316   :  { %v4585_v62 = vpack.i.bf16 %v4218_v60, %v4217_v58  ;;  %v4432_v8 = vpop.permute.xlu1 %4431  ;;  %v4448_v58 = vunpack.i.l.bf16 %v4447_v11  ;;  %vm7421_vm5 = vmmov %vm7419_vm6 }
 0x317   :  { %v4434_v17 = vunpack.i.h.bf16 %v4432_v8  ;;  %v4433_v12 = vunpack.i.l.bf16 %v4432_v8  ;;  %v1384_v36 = vperm.slane %v4449_v57, %v5184_v14  ;;  %v1393_v57 = vperm.slane %v4464_v15, %v5184_v14  ;;  %vm7422_vm11 = vmmov %vm7421_vm5 }
 0x318   :  { %4586 = vperm.xlu1 %4428, %v4585_v62   ;;  %v1383_v11 = vperm.slane %v4448_v58, %v5181_v13  ;;  %vm7423_vm9 = vmmov %vm7421_vm5 }
 0x319   :  { %v1375_v4 = vperm.slane %v4434_v17, %v5184_v14  ;;  %v1374_v41 = vperm.slane %v4433_v12, %v5181_v13  ;;  %v1379_v17 = vsel %vm7420_vm14, %v1378_v28, %v1377_v40  ;;  %v4454_v12 = vunpack.i.h.bf16 %v4452_v55  ;;  %vm7424_vm7 = vmmov %vm7421_vm5 }
 0x31a   :  { %v4467_v45 = vpop.permute.xlu0 %4466  ;;  %v1386_v55 = vperm.slane %v4453_v10, %v5181_v13  ;;  %v1385_v58 = vsel %vm7422_vm11, %v1384_v36, %v1383_v11  ;;  %vm7425_vm8 = vmmov %vm7421_vm5  ;;  %vm7427_vm14 = vcmask 130048  }
 0x31b   :  { %v1376_v46 = vsel %vm7419_vm6, %v1375_v4, %v1374_v41  ;;  %v4469_v41 = vunpack.i.h.bf16 %v4467_v45  ;;  %v1387_v28 = vperm.slane %v4454_v12, %v5184_v14  ;;  %vm7426_vm6 = vmmov %vm7421_vm5 }
 0x31c   :  { %v1470_v4 = vsel %vm7354_vm1, %v1379_v17, %v1376_v46  ;;  %v5842_v40 = vpop.permute.xlu2 %4491  ;;  %v1392_v46 = vperm.slane %v4463_v56, %v5181_v13  ;;  %vm7428_vm11 = vmmov %vm7421_vm5 }
 0x31d   :  { %v1396_v17 = vperm.slane %v4469_v41, %v5184_v14  ;;  %v1388_v15 = vsel %vm7423_vm9, %v1387_v28, %v1386_v55  ;;  %v4493_v25 = vunpack.i.l.bf16 %v5842_v40  ;;  %vm7429_vm9 = vmmov %vm7421_vm5 }
 0x322   :  { %v4442_v51 = vpop.permute.xlu1 %4441 }
 0x323   :  { %v4444_v60 = vunpack.i.h.bf16 %v4442_v51  ;;  %v4443_v62 = vunpack.i.l.bf16 %v4442_v51 }
 0x325   :  { %v1381_v8 = vperm.slane %v4444_v60, %v5184_v14  ;;  %v1380_v5 = vperm.slane %v4443_v62, %v5181_v13  ;;  %v4468_v60 = vunpack.i.l.bf16 %v4467_v45 }
 0x327   :  { %v1382_v51 = vsel %vm7421_vm5, %v1381_v8, %v1380_v5  ;;  %v1395_v12 = vperm.slane %v4468_v60, %v5181_v13 }
 0x328   :  { %v1471_v62 = vsel %vm7353_vm0, %v1382_v51, %v1470_v4 }
 0x329   :  { %v1472_v5 = vsel %vm7352_vm4, %v1385_v58, %v1471_v62  ;;  %v1397_v51 = vsel %vm7426_vm6, %v1396_v17, %v1395_v12  ;;  %v4507_v62 = vpop.permute.xlu2 %4506  ;;  %vm7432_vm6 = vmmov %vm7421_vm5 }
 0x32a   :  { %v4457_v7 = vpop.permute.xlu1 %4456  ;;  %v1473_v56 = vsel %vm7351_vm13, %v1388_v15, %v1472_v5  ;;  %v4509_v12 = vunpack.i.h.bf16 %v4507_v62 }
 0x32b   :  { %v4459_v8 = vunpack.i.h.bf16 %v4457_v7  ;;  %v4458_v0 = vunpack.i.l.bf16 %v4457_v7  ;;  %v1394_v7 = vsel %vm7425_vm8, %v1393_v57, %v1392_v46  ;;  %vm7431_vm8 = vmmov %vm7421_vm5 }
 0x32c   :  { %v1399_v59 = vperm.slane %v4509_v12, %v5184_v14 }
 0x32d   :  { %v1390_v10 = vperm.slane %v4459_v8, %v5184_v14  ;;  %v1389_v45 = vperm.slane %v4458_v0, %v5181_v13 }
 0x32e   :  { %v4477_v28 = vpop.permute.xlu0 %4476 }
 0x32f   :  { %v1391_v36 = vsel %vm7424_vm7, %v1390_v10, %v1389_v45  ;;  %v4508_v45 = vunpack.i.l.bf16 %v4507_v62  ;;  %v4479_v15 = vunpack.i.h.bf16 %v4477_v28  ;;  %vm7430_vm7 = vmmov %vm7421_vm5 }
 0x330   :  { %v1474_v11 = vsel %vm7350_vm15, %v1391_v36, %v1473_v56  ;;  %v4478_v56 = vunpack.i.l.bf16 %v4477_v28 }
 0x331   :  { %v1475_v4 = vsel %vm7349_vm2, %v1394_v7, %v1474_v11  ;;  %v1398_v9 = vperm.slane %v4508_v45, %v5181_v13  ;;  %v1426_v2 = vperm.slane %v4479_v15, %v5184_v14  ;;  %v1434_v45 = vperm.slane %v4493_v25, %v5181_v13 }
 0x332   :  { %v1476_v41 = vsel %vm7348_vm3, %v1397_v51, %v1475_v4  ;;  %v4522_v58 = vpop.permute.xlu2 %4521  ;;  %v1425_v28 = vperm.slane %v4478_v56, %v5181_v13 }
 0x333   :  { %v1502_v60 = vsel %vm7427_vm14, %v1476_v41, 0.0  ;;  %v4524_v37 = vunpack.i.h.bf16 %v4522_v58  ;;  %v4523_v30 = vunpack.i.l.bf16 %v4522_v58  ;;  %vm7433_vm14 = vmmov %vm7421_vm5 }
 0x334   :  { %1503 = vadd.xlane.f32.xlu0 %v1502_v60  ;;  %v4494_v60 = vunpack.i.h.bf16 %v5842_v40  ;;  %v1427_v25 = vsel %vm7428_vm11, %v1426_v2, %v1425_v28  ;;  %vm7434_vm11 = vmmov %vm7421_vm5 }
 0x336   :  { %v4472_v55 = vpop.permute.xlu1 %4471  ;;  %v1435_v12 = vperm.slane %v4494_v60, %v5184_v14  ;;  %v1408_v60 = vperm.slane %v4524_v37, %v5184_v14 }
 0x337   :  { %v4474_v7 = vunpack.i.h.bf16 %v4472_v55  ;;  %v4473_v11 = vunpack.i.l.bf16 %v4472_v55 }
 0x339   :  { %v1423_v42 = vperm.slane %v4474_v7, %v5184_v14 }
 0x33a   :  { %v4482_v8 = vpop.permute.xlu0 %4481 }
 0x33b   :  { %v4484_v62 = vunpack.i.h.bf16 %v4482_v8  ;;  %v4483_v39 = vunpack.i.l.bf16 %v4482_v8  ;;  %v1400_v8 = vsel %vm7421_vm5, %v1399_v59, %v1398_v9 }
 0x33d   :  { %v1429_v56 = vperm.slane %v4484_v62, %v5184_v14 }
 0x33e   :  { %v5861_v5 = vpop.permute.xlu2 %4541 }
 0x342   :  { %v4487_v0 = vpop.permute.xlu1 %4486 }
 0x343   :  { %v4489_v15 = vunpack.i.h.bf16 %v4487_v0  ;;  %v4488_v49 = vunpack.i.l.bf16 %v4487_v0 }
 0x345   :  { %v1432_v59 = vperm.slane %v4489_v15, %v5184_v14 }
 0x346   :  { %v5863_v57 = vpop.permute.xlu0 %4496 }
 0x347   :  { %v4499_v58 = vunpack.i.h.bf16 %v5863_v57  ;;  %v4498_v62 = vunpack.i.l.bf16 %v5863_v57  ;;  %v4544_v57 = vunpack.i.h.bf16 %v5861_v5 }
 0x34e   :  { %v5865_v46 = vpop.permute.xlu1 %4501  ;;  %v5867_v17 = vpop.permute.xlu2 %4546 }
 0x352   :  { %v4517_v10 = vpop.permute.xlu0 %4516 }
 0x353   :  { %v4519_v55 = vunpack.i.h.bf16 %v4517_v10  ;;  %v4518_v1 = vunpack.i.l.bf16 %v4517_v10  ;;  %v1428_v10 = vperm.slane %v4483_v39, %v5181_v13  ;;  %v1431_v39 = vperm.slane %v4488_v49, %v5181_v13 }
 0x35a   :  { %v4512_v36 = vpop.permute.xlu1 %4511  ;;  %v5869_v51 = vpop.permute.xlu2 %4556 }
 0x35b   :  { %v4514_v4 = vunpack.i.h.bf16 %v4512_v36  ;;  %v4513_v41 = vunpack.i.l.bf16 %v4512_v36  ;;  %v1422_v36 = vperm.slane %v4473_v11, %v5181_v13  ;;  %v1405_v11 = vperm.slane %v4519_v55, %v5184_v14 }
 0x35c   :  { %v1430_v55 = vsel %vm7431_vm8, %v1429_v56, %v1428_v10  ;;  %v1438_v56 = vperm.slane %v4499_v58, %v5184_v14  ;;  %v4543_v10 = vunpack.i.l.bf16 %v5861_v5  ;;  %vm7437_vm8 = vmmov %vm7421_vm5 }
 0x35d   :  { %v1402_v44 = vperm.slane %v4514_v4, %v5184_v14  ;;  %v1401_v40 = vperm.slane %v4513_v41, %v5181_v13  ;;  %v1404_v4 = vperm.slane %v4518_v1, %v5181_v13  ;;  %v1424_v0 = vsel %vm7429_vm9, %v1423_v42, %v1422_v36  ;;  %vm7435_vm9 = vmmov %vm7421_vm5 }
 0x35e   :  { %v4532_v35 = vpop.permute.xlu0 %4531  ;;  %v1407_v1 = vperm.slane %v4523_v30, %v5181_v13  ;;  %v1484_v36 = vsel %vm7354_vm1, %v1427_v25, %v1424_v0  ;;  %v4504_v30 = vunpack.i.h.bf16 %v5865_v46  ;;  %v1436_v25 = vsel %vm7421_vm5, %v1435_v12, %v1434_v45 }
 0x35f   :  { %v1403_v9 = vsel %vm7430_vm7, %v1402_v44, %v1401_v40  ;;  %v4534_v37 = vunpack.i.h.bf16 %v4532_v35  ;;  %v4533_v2 = vunpack.i.l.bf16 %v4532_v35  ;;  %v1406_v42 = vsel %vm7432_vm6, %v1405_v11, %v1404_v4  ;;  %vm7436_vm7 = vmmov %vm7421_vm5 }
 0x360   :  { %v1477_v44 = vsel %vm7354_vm1, %v1403_v9, %v1400_v8  ;;  %v4503_v40 = vunpack.i.l.bf16 %v5865_v46  ;;  %v1485_v15 = vsel %vm7353_vm0, %v1430_v55, %v1484_v36  ;;  %v1433_v35 = vsel %vm7433_vm14, %v1432_v59, %v1431_v39  ;;  %vm7438_vm6 = vmmov %vm7421_vm5 }
 0x361   :  { %v1437_v8 = vperm.slane %v4498_v62, %v5181_v13  ;;  %v1413_v11 = vperm.slane %v4533_v2, %v5181_v13  ;;  %v1409_v59 = vsel %vm7435_vm9, %v1408_v60, %v1407_v1  ;;  %v1441_v39 = vperm.slane %v4504_v30, %v5184_v14  ;;  %vm7439_vm14 = vmmov %vm7421_vm5 }
 0x362   :  { %v4527_v7 = vpop.permute.xlu1 %4526  ;;  %v1440_v58 = vperm.slane %v4503_v40, %v5181_v13  ;;  %v1486_v5 = vsel %vm7352_vm4, %v1433_v35, %v1485_v15  ;;  %v1420_v45 = vperm.slane %v4544_v57, %v5184_v14  ;;  %v1419_v2 = vperm.slane %v4543_v10, %v5181_v13 }
 0x363   :  { %v4529_v41 = vunpack.i.h.bf16 %v4527_v7  ;;  %v4528_v3 = vunpack.i.l.bf16 %v4527_v7  ;;  %vm7441_vm9 = vcmask 130048  }
 0x364   :  { %v1442_v36 = vsel %vm7438_vm6, %v1441_v39, %v1440_v58  ;;  %vm7444_vm6 = vmmov %vm7421_vm5 }
 0x365   :  { %v1411_v28 = vperm.slane %v4529_v41, %v5184_v14  ;;  %v1410_v49 = vperm.slane %v4528_v3, %v5181_v13  ;;  %v1414_v3 = vperm.slane %v4534_v37, %v5184_v14  ;;  %v1478_v41 = vsel %vm7353_vm0, %v1406_v42, %v1477_v44 }
 0x366   :  { %v5898_v7 = vpop.permute.xlu2 %4571  ;;  %v1439_v37 = vsel %vm7436_vm7, %v1438_v56, %v1437_v8  ;;  %v1479_v12 = vsel %vm7352_vm4, %v1409_v59, %v1478_v41  ;;  %v1421_v56 = vsel %vm7421_vm5, %v1420_v45, %v1419_v2  ;;  %vm7442_vm7 = vmmov %vm7441_vm9 }
 0x367   :  { %v1412_v46 = vsel %vm7434_vm11, %v1411_v28, %v1410_v49  ;;  %v1415_v60 = vsel %vm7437_vm8, %v1414_v3, %v1413_v11  ;;  %v1487_v49 = vsel %vm7351_vm13, %v1436_v25, %v1486_v5  ;;  %vm7440_vm11 = vmmov %vm7421_vm5  ;;  %v4559_v5 = vunpack.i.h.bf16 %v5869_v51 }
 0x368   :  { %v1480_v1 = vsel %vm7351_vm13, %v1412_v46, %v1479_v12  ;;  %v1488_v30 = vsel %vm7350_vm15, %v1439_v37, %v1487_v49  ;;  %v4549_v46 = vunpack.i.h.bf16 %v5867_v17  ;;  %vm7443_vm8 = vmmov %vm7421_vm5 }
 0x369   :  { %v1481_v35 = vsel %vm7350_vm15, %v1415_v60, %v1480_v1  ;;  %v1489_v3 = vsel %vm7349_vm2, %v1442_v36, %v1488_v30  ;;  %v1453_v60 = vperm.slane %v4559_v5, %v5184_v14 }
 0x36a   :  { %v4537_v4 = vpop.permute.xlu1 %4536 }
 0x36b   :  { %v4539_v0 = vunpack.i.h.bf16 %v4537_v4  ;;  %v4538_v9 = vunpack.i.l.bf16 %v4537_v4 }
 0x36d   :  { %v1417_v62 = vperm.slane %v4539_v0, %v5184_v14  ;;  %v1416_v55 = vperm.slane %v4538_v9, %v5181_v13  ;;  %v4548_v0 = vunpack.i.l.bf16 %v5867_v17 }
 0x36e   :  { %v4577_v42 = vpop.permute.xlu2 %4576  ;;  %v4562_v9 = vpop.permute.xlu0 %4561 }
 0x36f   :  { %v4579_v44 = vunpack.i.h.bf16 %v4577_v42  ;;  %v4578_v28 = vunpack.i.l.bf16 %v4577_v42  ;;  %v1418_v40 = vsel %vm7439_vm14, %v1417_v62, %v1416_v55  ;;  %v4558_v62 = vunpack.i.l.bf16 %v5869_v51  ;;  %vm7445_vm14 = vmmov %vm7421_vm5 }
 0x370   :  { %v1482_v8 = vsel %vm7349_vm2, %v1418_v40, %v1481_v35  ;;  %v1447_v55 = vperm.slane %v4549_v46, %v5184_v14  ;;  %v1446_v37 = vperm.slane %v4548_v0, %v5181_v13  ;;  %v4564_v2 = vunpack.i.h.bf16 %v4562_v9 }
 0x371   :  { %v1444_v15 = vperm.slane %v4579_v44, %v5184_v14  ;;  %v1443_v57 = vperm.slane %v4578_v28, %v5181_v13  ;;  %v1483_v11 = vsel %vm7348_vm3, %v1421_v56, %v1482_v8  ;;  %v4563_v42 = vunpack.i.l.bf16 %v4562_v9 }
 0x372   :  { %v1505_v41 = vsel %vm7441_vm9, %v1483_v11, 0.0  ;;  %v1452_v1 = vperm.slane %v4558_v62, %v5181_v13  ;;  %v1448_v44 = vsel %vm7444_vm6, %v1447_v55, %v1446_v37  ;;  %v4574_v51 = vunpack.i.h.bf16 %v5898_v7  ;;  %vm7447_vm9 = vmmov %vm7421_vm5 }
 0x373   :  { %v1445_v10 = vsel %vm7440_vm11, %v1444_v15, %v1443_v57  ;;  %1506 = vadd.xlane.f32.xlu2 %v1505_v41  ;;  %v4573_v28 = vunpack.i.l.bf16 %v5898_v7  ;;  %v1456_v30 = vperm.slane %v4564_v2, %v5184_v14  ;;  %v1455_v40 = vperm.slane %v4563_v42, %v5181_v13  ;;  %vm7446_vm11 = vmmov %vm7421_vm5 }
 0x374   :  { %v1490_v4 = vsel %vm7348_vm3, %v1445_v10, %v1489_v3  ;;  %v1454_v56 = vsel %vm7445_vm14, %v1453_v60, %v1452_v1  ;;  %vm7450_vm6 = vcmask 130048  }
 0x375   :  { %v1508_v25 = vsel %vm7442_vm7, %v1490_v4, 0.0  ;;  %v1462_v4 = vperm.slane %v4574_v51, %v5184_v14  ;;  %v1461_v41 = vperm.slane %v4573_v28, %v5181_v13  ;;  %vm7448_vm7 = vmmov %vm7421_vm5  ;;  %v4951_v51 = vld [vmem:[%s7267_s3] ss:$0 sm:$0xff] }
 0x376   :  { %1509 = vadd.xlane.f32.xlu1 %v1508_v25  ;;  %v4582_v15 = vpop.permute.xlu0 %4581  ;;  %v1457_v25 = vsel %vm7421_vm5, %v1456_v30, %v1455_v40 }
 0x377   :  { %v4584_v11 = vunpack.i.h.bf16 %v4582_v15  ;;  %v4583_v7 = vunpack.i.l.bf16 %v4582_v15  ;;  %v1463_v55 = vsel %vm7447_vm9, %v1462_v4, %v1461_v41  ;;  %v1532_v41 = vmul.f32 %v5370_v31, %v5294_v18 }
 0x37a   :  { %v4552_v59 = vpop.permute.xlu1 %4551 }
 0x37b   :  { %v4554_v39 = vunpack.i.h.bf16 %v4552_v59  ;;  %v4553_v58 = vunpack.i.l.bf16 %v4552_v59  ;;  %v1465_v59 = vperm.slane %v4584_v11, %v5184_v14  ;;  %v4399_v11 = vld [vmem:[%s7268_s7 + $0x8] sm:$0xff] }
 0x37c   :  { %1607 = vmatpush.bf16.msrb.mxu3 %v4399_v11 }
 0x37d   :  { %v1450_v12 = vperm.slane %v4554_v39, %v5184_v14  ;;  %v1449_v45 = vperm.slane %v4553_v58, %v5181_v13  ;;  %v1464_v39 = vperm.slane %v4583_v7, %v5181_v13  ;;  %v4398_v7 = vld [vmem:[%s7268_s7] sm:$0xff] }
 0x37f   :  { %v1451_v17 = vsel %vm7443_vm8, %v1450_v12, %v1449_v45  ;;  %v1466_v2 = vsel %vm7448_vm7, %v1465_v59, %v1464_v39  ;;  %vm7449_vm8 = vmmov %vm7421_vm5 }
 0x380   :  { %v1491_v49 = vsel %vm7354_vm1, %v1451_v17, %v1448_v44  ;;  %v5051_v44 = vmov 1   ;;  %1608 = vmatpush.bf16.msrb.mxu3 %v4398_v7 }
 0x381   :  { %v1492_v3 = vsel %vm7353_vm0, %v1454_v56, %v1491_v49  ;;  %4590 = vset.pattern.permute.xlu2 %v5051_v44  ;;  %4596 = vset.pattern.permute.xlu1 %v5051_v44 }
 0x382   :  { %v4567_v36 = vpop.permute.xlu1 %4566  ;;  %v1493_v0 = vsel %vm7352_vm4, %v1457_v25, %v1492_v3  ;;  %4602 = vset.pattern.permute.xlu0 %v5051_v44  ;;  %v1533_v25 = vmul.f32 %v5386_v63, %v5310_v38 }
 0x383   :  { %v4569_v57 = vunpack.i.h.bf16 %v4567_v36  ;;  %v4568_v35 = vunpack.i.l.bf16 %v4567_v36  ;;  %v7451_v36 = vmov 0.0  }
 0x385   :  { %v1459_v8 = vperm.slane %v4569_v57, %v5184_v14  ;;  %v1458_v10 = vperm.slane %v4568_v35, %v5181_v13  ;;  %v4952_v57 = vld [vmem:[%s7267_s3 + $0x1] ss:$0 sm:$0xff] }
 0x387   :  { %v1460_v46 = vsel %vm7446_vm11, %v1459_v8, %v1458_v10 }
 0x388   :  { %v1494_v9 = vsel %vm7351_vm13, %v1460_v46, %v1493_v0 }
 0x389   :  { %v1495_v37 = vsel %vm7350_vm15, %v1463_v55, %v1494_v9 }
 0x38a   :  { %v4587_v58 = vpop.permute.xlu1 %4586  ;;  %v1496_v17 = vsel %vm7349_vm2, %v1466_v2, %v1495_v37 }
 0x38b   :  { %v4589_v5 = vunpack.i.h.bf16 %v4587_v58  ;;  %v4588_v62 = vunpack.i.l.bf16 %v4587_v58 }
 0x38d   :  { %v1468_v12 = vperm.slane %v4589_v5, %v5184_v14  ;;  %v1467_v45 = vperm.slane %v4588_v62, %v5181_v13 }
 0x38f   :  { %v1469_v42 = vsel %vm7449_vm8, %v1468_v12, %v1467_v45  ;;  %vm7452_vm8 = vmmov %vm7450_vm6 }
 0x390   :  { %v1497_v60 = vsel %vm7348_vm3, %v1469_v42, %v1496_v17 }
 0x391   :  { %v1511_v1 = vsel %vm7450_vm6, %v1497_v60, 0.0  ;;  %vm7453_vm6 = vcmask 261120   ;;  %v1534_v60 = vmul.f32 %v5377_v54, %v5303_v32 }
 0x392   :  { %1512 = vadd.xlane.f32.xlu0 %v1511_v1  ;;  %v1535_v1 = vmul.f32 %v5393_v16, %v5318_v47 }
 0x3a7   :  { %v1504_v28 = vpop.xlane.xlu0 %1503 }
 0x3a8   :  { %vm1520_vm14 = vcmp.lt.f32.partialorder %v1504_v28, %v4951_v51 }
 0x3a9   :  { %v5987_v30 = vsel %vm1520_vm14, 1.0, %v7451_v36  ;;  %vm7454_vm14 = vmmov %vm7452_vm8 }
 0x3e6   :  { %v1507_v49 = vpop.xlane.xlu2 %1506 }
 0x3e7   :  { %vm1521_vm5 = vcmp.lt.f32.partialorder %v1507_v49, %v4951_v51 }
 0x3e8   :  { %v5990_v40 = vsel %vm1521_vm5, 1.0, %v7451_v36  ;;  %vm7455_vm5 = vmmov %vm7448_vm7 }
 0x3e9   :  { %v4591_v15 = vpack.i.bf16 %v5990_v40, %v5987_v30  ;;  %v1510_v35 = vpop.xlane.xlu1 %1509 }
 0x3ea   :  { %vm1522_vm11 = vcmp.lt.f32.partialorder %v1510_v35, %v4952_v57 }
 0x3eb   :  { %4592 = vperm.xlu2 %4590, %v4591_v15   ;;  %v5998_v8 = vsel %vm1522_vm11, 1.0, %v7451_v36  ;;  %vm7456_vm11 = vmmov %vm7452_vm8 }
 0x405   :  { %v1513_v56 = vpop.xlane.xlu0 %1512 }
 0x406   :  { %vm1523_vm9 = vcmp.lt.f32.partialorder %v1513_v56, %v4952_v57 }
 0x407   :  { %v6001_v10 = vsel %vm1523_vm9, 1.0, %v7451_v36  ;;  %vm7457_vm9 = vmmov %vm7452_vm8 }
 0x408   :  { %v4597_v3 = vpack.i.bf16 %v6001_v10, %v5998_v8 }
 0x40a   :  { %4598 = vperm.xlu1 %4596, %v4597_v3  }
 0x445   :  { %v4593_v4 = vpop.permute.xlu2 %4592 }
 0x446   :  { %v4595_v46 = vunpack.i.h.bf16 %v4593_v4  ;;  %v4594_v0 = vunpack.i.l.bf16 %v4593_v4 }
 0x448   :  { %v1557_v9 = vmul.f32 %v4595_v46, %v1533_v25  ;;  %v1621_v59 = vperm.slane %v4595_v46, %v5184_v14  ;;  %v1556_v39 = vmul.f32 %v4594_v0, %v1532_v41  ;;  %v1620_v58 = vperm.slane %v4594_v0, %v5181_v13 }
 0x44a   :  { %v1561_v5 = vmax.f32 %v1557_v9, 0.0  ;;  %v1560_v62 = vmax.f32 %v1556_v39, 0.0  ;;  %v1622_v55 = vsel %vm7448_vm7, %v1621_v59, %v1620_v58  ;;  %vm7458_vm7 = vmmov %vm7453_vm6 }
 0x44b   :  { %v1640_v37 = vmul.f32 %v1622_v55, %v5197_v22  ;;  %v1641_v2 = vmul.f32 %v1622_v55, %v5210_v34 }
 0x44c   :  { %v1570_v12 = vpack.c.bf16 %v1561_v5, %v1561_v5  ;;  %v1569_v45 = vpack.c.bf16 %v1560_v62, %v1560_v62 }
 0x44d   :  { %v1644_v18 = vsel %vm7452_vm8, %v1640_v37, 0.0  ;;  %v1647_v42 = vsel %vm7454_vm14, %v1641_v2, 0.0 }
 0x44e   :  { %v1578_v31 = vunpack.c.l.b16 %v1570_v12  ;;  %v1577_v38 = vunpack.c.l.b16 %v1569_v45  ;;  %1645 = vadd.xlane.f32.xlu0 %v1644_v18 }
 0x450   :  { %v1581_v63 = vpack.c.b16 %v1578_v31, %v1577_v38 }
 0x452   :  { %4231 = vmatmul.msk.bf16.vlgmr.msrb.gmra.mxu3 %vm7453_vm6, %v1581_v63 }
 0x456   :  { %1648 = vadd.xlane.f32.xlu0 %v1647_v42 }
 0x47c   :  { %v4599_v17 = vpop.permute.xlu1 %4598 }
 0x47d   :  { %v4601_v44 = vunpack.i.h.bf16 %v4599_v17  ;;  %v4600_v51 = vunpack.i.l.bf16 %v4599_v17 }
 0x47f   :  { %v1559_v28 = vmul.f32 %v4601_v44, %v1535_v1  ;;  %v1624_v49 = vperm.slane %v4601_v44, %v5184_v14  ;;  %v1558_v15 = vmul.f32 %v4600_v51, %v1534_v60  ;;  %v1623_v57 = vperm.slane %v4600_v51, %v5181_v13 }
 0x481   :  { %v1563_v35 = vmax.f32 %v1559_v28, 0.0  ;;  %v1562_v56 = vmax.f32 %v1558_v15, 0.0  ;;  %v1625_v3 = vsel %vm7455_vm5, %v1624_v49, %v1623_v57 }
 0x482   :  { %v1643_v11 = vmul.f32 %v1625_v3, %v5193_v20  ;;  %v1642_v7 = vmul.f32 %v1625_v3, %v5195_v21 }
 0x483   :  { %v1572_v32 = vpack.c.bf16 %v1563_v35, %v1563_v35  ;;  %v1571_v54 = vpack.c.bf16 %v1562_v56, %v1562_v56  ;;  %v5041_v35 = vld [vmem:[%s7264_s1] sm:$0xff] }
 0x484   :  { %v1653_v47 = vsel %vm7456_vm11, %v1643_v11, 0.0  ;;  %v1650_v16 = vsel %vm7457_vm9, %v1642_v7, 0.0 }
 0x485   :  { %v1580_v4 = vunpack.c.l.b16 %v1572_v32  ;;  %v1579_v41 = vunpack.c.l.b16 %v1571_v54  ;;  %1654 = vadd.xlane.f32.xlu2 %v1653_v47  ;;  %1651 = vadd.xlane.f32.xlu0 %v1650_v16 }
 0x487   :  { %v1582_v25 = vpack.c.b16 %v1580_v4, %v1579_v41 }
 0x489   :  { %4232 = vmatmul.msk.bf16.gmra.mxu3 %vm7458_vm7, %v1582_v25  ;;  %vm7459_vm7 = vcmask 130048  }
 0x4c1   :  { %v1646_v46 = vpop.xlane.xlu0 %1645 }
 0x4c2   :  { %v1656_v0 = vadd.f32 1.0, %v1646_v46 }
 0x4c4   :  { %4981 = vrsqrt.f32 %v1656_v0  ;;  %vm1666_vm6 = vweird.f32 %v1656_v0 }
 0x4c9   :  { %v1649_v9 = vpop.xlane.xlu0 %1648 }
 0x4ca   :  { %v4982_v59 = vpop.eup %4981  ;;  %v1657_v39 = vadd.f32 1.0, %v1649_v9 }
 0x4cb   :  { %v1661_v58 = vmul.f32 %v4982_v59, %v1656_v0  ;;  %vm1667_vm8 = vweird.f32 %v4982_v59 }
 0x4cc   :  { %4983 = vrsqrt.f32 %v1657_v39  ;;  %vm1668_vm14 = vmor %vm1666_vm6, %vm1667_vm8  ;;  %vm1676_vm11 = vweird.f32 %v1657_v39 }
 0x4cd   :  { %v1662_v5 = vmul.f32 %v4982_v59, %v1661_v58 }
 0x4cf   :  { %v1663_v62 = vmul.f32 0.5, %v1662_v5 }
 0x4d1   :  { %v1664_v55 = vsub.f32 1.5, %v1663_v62 }
 0x4d2   :  { %v4984_v37 = vpop.eup %4983 }
 0x4d3   :  { %v1671_v12 = vmul.f32 %v4984_v37, %v1657_v39  ;;  %v1665_v45 = vmul.f32 %v4982_v59, %v1664_v55  ;;  %vm1677_vm5 = vweird.f32 %v4984_v37 }
 0x4d4   :  { %vm1678_vm9 = vmor %vm1676_vm11, %vm1677_vm5 }
 0x4d5   :  { %v1672_v18 = vmul.f32 %v4984_v37, %v1671_v12  ;;  %v1610_v31 = vpop.f32.mrf.mxu3  ;;  %v1669_v63 = vsel %vm1668_vm14, %v4982_v59, %v1665_v45 }
 0x4d6   :  { %v1700_v42 = vmul.f32 %v1669_v63, %v1610_v31 }
 0x4d7   :  { %v1673_v38 = vmul.f32 0.5, %v1672_v18 }
 0x4d8   :  { %v1704_v44 = vpack.c.bf16 %v1700_v42, %v1700_v42 }
 0x4d9   :  { %v1674_v2 = vsub.f32 1.5, %v1673_v38 }
 0x4da   :  { %v1710_v49 = vunpack.c.l.b16 %v1704_v44 }
 0x4db   :  { %v1675_v17 = vmul.f32 %v4984_v37, %v1674_v2 }
 0x4dd   :  { %v1612_v60 = vpop.f32.mrf.mxu3  ;;  %v1679_v1 = vsel %vm1678_vm9, %v4984_v37, %v1675_v17  ;;  %v5042_v17 = vld [vmem:[%s7264_s1 + $0x8] sm:$0xff] }
 0x4de   :  { %v1701_v51 = vmul.f32 %v1679_v1, %v1612_v60 }
 0x4e0   :  { %v1705_v28 = vpack.c.bf16 %v1701_v51, %v1701_v51 }
 0x4e2   :  { %v1711_v15 = vunpack.c.l.b16 %v1705_v28  ;;  %v4953_v28 = vld [vmem:[%s7269_s8] ss:$0 sm:$0xff] }
 0x4e4   :  { %v1712_v57 = vpack.c.b16 %v1711_v15, %v1710_v49  ;;  %v4954_v15 = vld [vmem:[%s7270_s9] ss:$0 sm:$0xff] }
 0x4e6   :  { %1721 = vmatpush.bf16.msrb.mxu1 %v1712_v57 }
 0x4e9   :  { %4233 = vmatmul.msk.bf16.vlgmr.msrb.gmra.mxu1 %vm7459_vm7, %v5041_v35 }
 0x4f8   :  { %v1655_v56 = vpop.xlane.xlu2 %1654  ;;  %v1652_v3 = vpop.xlane.xlu0 %1651 }
 0x4f9   :  { %v1659_v11 = vadd.f32 1.0, %v1655_v56  ;;  %v1658_v7 = vadd.f32 1.0, %v1652_v3 }
 0x4fb   :  { %4985 = vrsqrt.f32 %v1659_v11  ;;  %vm1686_vm6 = vweird.f32 %v1658_v7  ;;  %vm1696_vm11 = vweird.f32 %v1659_v11 }
 0x4fc   :  { %4987 = vrsqrt.f32 %v1658_v7 }
 0x501   :  { %v4986_v32 = vpop.eup %4985 }
 0x502   :  { %v4988_v54 = vpop.eup %4987  ;;  %v1691_v47 = vmul.f32 %v4986_v32, %v1659_v11  ;;  %vm1697_vm5 = vweird.f32 %v4986_v32 }
 0x503   :  { %v1681_v16 = vmul.f32 %v4988_v54, %v1658_v7  ;;  %vm1687_vm8 = vweird.f32 %v4988_v54  ;;  %vm1698_vm9 = vmor %vm1696_vm11, %vm1697_vm5 }
 0x504   :  { %v1692_v4 = vmul.f32 %v4986_v32, %v1691_v47  ;;  %vm1688_vm14 = vmor %vm1686_vm6, %vm1687_vm8  ;;  %vm7460_vm8 = vcmask 261120  }
 0x505   :  { %v1682_v41 = vmul.f32 %v4988_v54, %v1681_v16  ;;  %vm7461_vm6 = vmmov %vm7460_vm8 }
 0x506   :  { %v1693_v46 = vmul.f32 0.5, %v1692_v4  ;;  %vm7463_vm5 = vmmov %vm7461_vm6 }
 0x507   :  { %v1683_v25 = vmul.f32 0.5, %v1682_v41 }
 0x508   :  { %v1694_v39 = vsub.f32 1.5, %v1693_v46 }
 0x509   :  { %v1684_v0 = vsub.f32 1.5, %v1683_v25 }
 0x50a   :  { %v1695_v5 = vmul.f32 %v4986_v32, %v1694_v39 }
 0x50b   :  { %v1685_v9 = vmul.f32 %v4988_v54, %v1684_v0 }
 0x50c   :  { %v1615_v59 = vpop.f32.mrf.mxu3  ;;  %v1699_v37 = vsel %vm1698_vm9, %v4986_v32, %v1695_v5 }
 0x50d   :  { %v1689_v58 = vsel %vm1688_vm14, %v4988_v54, %v1685_v9  ;;  %vm7462_vm14 = vmmov %vm7461_vm6 }
 0x50e   :  { %v1702_v62 = vmul.f32 %v1689_v58, %v1615_v59 }
 0x510   :  { %v1706_v12 = vpack.c.bf16 %v1702_v62, %v1702_v62 }
 0x512   :  { %v1730_v31 = vunpack.c.l.b16 %v1706_v12 }
 0x514   :  { %v1617_v55 = vpop.f32.mrf.mxu3 }
 0x515   :  { %v1703_v45 = vmul.f32 %v1699_v37, %v1617_v55 }
 0x517   :  { %v1707_v18 = vpack.c.bf16 %v1703_v45, %v1703_v45 }
 0x519   :  { %v1731_v38 = vunpack.c.l.b16 %v1707_v18 }
 0x51b   :  { %v1732_v2 = vpack.c.b16 %v1731_v38, %v1730_v31 }
 0x51d   :  { %1741 = vmatpush.bf16.msrb.mxu2 %v1732_v2 }
 0x520   :  { %4234 = vmatmul.msk.bf16.vlgmr.msrb.gmra.mxu2 %vm7459_vm7, %v5042_v17 }
 0x566   :  { %v1723_v60 = vpop.f32.mrf.mxu1 }
 0x567   :  { %v1724_v44 = vadd.f32 %v1723_v60, %v1700_v42 }
 0x569   :  { %v1748_v49 = vmul.f32 %v1724_v44, %v1669_v63 }
 0x56b   :  { %v6049_v57 = vadd.f32 %v4953_v28, %v1748_v49 }
 0x56d   :  { %v1763_v35 = vmul.f32 %v4954_v15, %v6049_v57 }
 0x56e   :  { %v1725_v56 = vpop.f32.mrf.mxu1 }
 0x56f   :  { %v1726_v3 = vadd.f32 %v1725_v56, %v1701_v51  ;;  %v1767_v11 = vsel %vm7460_vm8, %v1763_v35, 0.0 }
 0x570   :  { %1768 = vadd.xlane.f32.xlu1 %v1767_v11 }
 0x571   :  { %v1749_v7 = vmul.f32 %v1726_v3, %v1679_v1 }
 0x573   :  { %v6053_v42 = vadd.f32 %v4953_v28, %v1749_v7 }
 0x575   :  { %v1764_v32 = vmul.f32 %v4954_v15, %v6053_v42 }
 0x577   :  { %v1770_v63 = vsel %vm7461_vm6, %v1764_v32, 0.0  ;;  %vm1855_vm6 = vcmp.gt.f32.partialorder %v5987_v30, 0.5 }
 0x578   :  { %1771 = vadd.xlane.f32.xlu0 %v1770_v63 }
 0x5a3   :  { %v1743_v54 = vpop.f32.mrf.mxu2 }
 0x5a4   :  { %v1744_v47 = vadd.f32 %v1743_v54, %v1702_v62 }
 0x5a6   :  { %v1750_v16 = vmul.f32 %v1744_v47, %v1689_v58 }
 0x5a8   :  { %v6057_v4 = vadd.f32 %v4953_v28, %v1750_v16 }
 0x5aa   :  { %v1765_v41 = vmul.f32 %v4954_v15, %v6057_v4 }
 0x5ab   :  { %v1745_v25 = vpop.f32.mrf.mxu2 }
 0x5ac   :  { %v1746_v51 = vadd.f32 %v1745_v25, %v1703_v45  ;;  %v1773_v46 = vsel %vm7462_vm14, %v1765_v41, 0.0 }
 0x5ad   :  { %1774 = vadd.xlane.f32.xlu0 %v1773_v46 }
 0x5ae   :  { %v1751_v1 = vmul.f32 %v1746_v51, %v1699_v37 }
 0x5b0   :  { %v6061_v0 = vadd.f32 %v4953_v28, %v1751_v1 }
 0x5b2   :  { %v1766_v9 = vmul.f32 %v4954_v15, %v6061_v0 }
 0x5b4   :  { %v1776_v59 = vsel %vm7463_vm5, %v1766_v9, 0.0 }
 0x5b5   :  { %1777 = vadd.xlane.f32.xlu0 %v1776_v59 }
 0x5e3   :  { %v1769_v39 = vpop.xlane.xlu1 %1768 }
 0x5e4   :  { %v4235_v5 = vmul.f32 -1.442695, %v1769_v39 }
 0x5e6   :  { %4989 = vpow2.f32 %v4235_v5 }
 0x5eb   :  { %v1772_v58 = vpop.xlane.xlu0 %1771 }
 0x5ec   :  { %v4990_v62 = vpop.eup %4989  ;;  %v4236_v55 = vmul.f32 -1.442695, %v1772_v58 }
 0x5ed   :  { %v1791_v12 = vadd.f32 1.0, %v4990_v62 }
 0x5ee   :  { %4991 = vpow2.f32 %v4236_v55 }
 0x5ef   :  { %4993 = vrcp.f32 %v1791_v12  ;;  %v1806_v2 = vand.u32 2147483648, %v1791_v12  ;;  %v1804_v60 = vand.u32 2147483647, %v1791_v12  ;;  %vm1800_vm9 = vweird.f32 %v1791_v12 }
 0x5f1   :  { %v1807_v49 = vor.u32 1.1754944e-38, %v1806_v2  ;;  %vm1805_vm8 = vcmp.eq.f32.partialorder %v1804_v60, 8.507059e+37 }
 0x5f4   :  { %v4992_v45 = vpop.eup %4991 }
 0x5f5   :  { %v4994_v18 = vpop.eup %4993  ;;  %v1792_v31 = vadd.f32 1.0, %v4992_v45 }
 0x5f6   :  { %v1796_v37 = vmul.f32 %v4994_v18, %v1791_v12  ;;  %vm1801_vm11 = vweird.f32 %v4994_v18 }
 0x5f7   :  { %4995 = vrcp.f32 %v1792_v31  ;;  %vm1802_vm7 = vmor %vm1800_vm9, %vm1801_vm11  ;;  %v1821_v7 = vand.u32 2147483648, %v1792_v31  ;;  %v1819_v63 = vand.u32 2147483647, %v1792_v31  ;;  %vm1815_vm5 = vweird.f32 %v1792_v31 }
 0x5f8   :  { %v1797_v38 = vsub.f32 1.0, %v1796_v37 }
 0x5f9   :  { %v1822_v47 = vor.u32 1.1754944e-38, %v1821_v7  ;;  %vm1820_vm9 = vcmp.eq.f32.partialorder %v1819_v63, 8.507059e+37 }
 0x5fa   :  { %v1798_v17 = vmul.f32 %v4994_v18, %v1797_v38 }
 0x5fc   :  { %v1799_v44 = vadd.f32 %v4994_v18, %v1798_v17 }
 0x5fd   :  { %v4996_v28 = vpop.eup %4995 }
 0x5fe   :  { %v1803_v15 = vsel %vm1802_vm7, %v4994_v18, %v1799_v44  ;;  %v1811_v35 = vmul.f32 %v4996_v28, %v1792_v31  ;;  %vm1816_vm14 = vweird.f32 %v4996_v28  ;;  %vm1856_vm7 = vcmp.gt.f32.partialorder %v5990_v40, 0.5 }
 0x5ff   :  { %v6066_v56 = vsel %vm1805_vm8, %v1807_v49, %v1803_v15  ;;  %vm1817_vm11 = vmor %vm1815_vm5, %vm1816_vm14 }
 0x600   :  { %v6069_v3 = vsel %vm1855_vm6, %v6066_v56, -1.0  ;;  %v1812_v11 = vsub.f32 1.0, %v1811_v35 }
 0x601   :  { %1865 = vperm.xlu0 %4602, %v6069_v3  }
 0x602   :  { %v1813_v32 = vmul.f32 %v4996_v28, %v1812_v11 }
 0x604   :  { %v1814_v54 = vadd.f32 %v4996_v28, %v1813_v32 }
 0x606   :  { %v1818_v16 = vsel %vm1817_vm11, %v4996_v28, %v1814_v54  ;;  %vm1857_vm11 = vcmp.gt.f32.partialorder %v5998_v8, 0.5 }
 0x607   :  { %v6073_v30 = vsel %vm1820_vm9, %v1822_v47, %v1818_v16 }
 0x608   :  { %v6076_v41 = vsel %vm1856_vm7, %v6073_v30, -1.0 }
 0x609   :  { %1869 = vperm.xlu2 %4590, %v6076_v41  }
 0x620   :  { %v1775_v25 = vpop.xlane.xlu0 %1774 }
 0x621   :  { %v4237_v51 = vmul.f32 -1.442695, %v1775_v25 }
 0x623   :  { %4997 = vpow2.f32 %v4237_v51 }
 0x628   :  { %v1778_v46 = vpop.xlane.xlu0 %1777 }
 0x629   :  { %v4998_v1 = vpop.eup %4997  ;;  %v4238_v9 = vmul.f32 -1.442695, %v1778_v46 }
 0x62a   :  { %v1793_v59 = vadd.f32 1.0, %v4998_v1 }
 0x62b   :  { %4999 = vpow2.f32 %v4238_v9 }
 0x62c   :  { %5001 = vrcp.f32 %v1793_v59  ;;  %v1836_v55 = vand.u32 2147483648, %v1793_v59  ;;  %v1834_v45 = vand.u32 2147483647, %v1793_v59  ;;  %vm1830_vm6 = vweird.f32 %v1793_v59 }
 0x62e   :  { %v1837_v37 = vor.u32 1.1754944e-38, %v1836_v55  ;;  %vm1835_vm5 = vcmp.eq.f32.partialorder %v1834_v45, 8.507059e+37 }
 0x631   :  { %v5000_v39 = vpop.eup %4999 }
 0x632   :  { %v5002_v5 = vpop.eup %5001  ;;  %v1794_v58 = vadd.f32 1.0, %v5000_v39 }
 0x633   :  { %v1826_v40 = vmul.f32 %v5002_v5, %v1793_v59  ;;  %vm1831_vm8 = vweird.f32 %v5002_v5 }
 0x634   :  { %5003 = vrcp.f32 %v1794_v58  ;;  %vm1832_vm14 = vmor %vm1830_vm6, %vm1831_vm8  ;;  %v1851_v28 = vand.u32 2147483648, %v1794_v58  ;;  %v1849_v15 = vand.u32 2147483647, %v1794_v58  ;;  %vm1845_vm7 = vweird.f32 %v1794_v58 }
 0x635   :  { %v1827_v62 = vsub.f32 1.0, %v1826_v40 }
 0x636   :  { %v1852_v11 = vor.u32 1.1754944e-38, %v1851_v28  ;;  %vm1850_vm6 = vcmp.eq.f32.partialorder %v1849_v15, 8.507059e+37 }
 0x637   :  { %v1828_v12 = vmul.f32 %v5002_v5, %v1827_v62 }
 0x639   :  { %v1829_v18 = vadd.f32 %v5002_v5, %v1828_v12 }
 0x63a   :  { %v5004_v31 = vpop.eup %5003 }
 0x63b   :  { %v1833_v38 = vsel %vm1832_vm14, %v5002_v5, %v1829_v18  ;;  %v1841_v2 = vmul.f32 %v5004_v31, %v1794_v58  ;;  %vm1846_vm9 = vweird.f32 %v5004_v31  ;;  %vm1858_vm14 = vcmp.gt.f32.partialorder %v6001_v10, 0.5 }
 0x63c   :  { %v6080_v17 = vsel %vm1835_vm5, %v1837_v37, %v1833_v38  ;;  %vm1847_vm8 = vmor %vm1845_vm7, %vm1846_vm9 }
 0x63d   :  { %v6083_v60 = vsel %vm1857_vm11, %v6080_v17, -1.0  ;;  %v1842_v44 = vsub.f32 1.0, %v1841_v2 }
 0x63e   :  { %1873 = vperm.xlu1 %4596, %v6083_v60  }
 0x63f   :  { %v1843_v49 = vmul.f32 %v5004_v31, %v1842_v44 }
 0x641   :  { %v1844_v35 = vadd.f32 %v5004_v31, %v1843_v49 }
 0x643   :  { %v1848_v7 = vsel %vm1847_vm8, %v5004_v31, %v1844_v35  ;;  %vm7464_vm8 = vcmp.ne.s32.totalorder %v5398_v19, 0 }
 0x644   :  { %v6087_v8 = vsel %vm1850_vm6, %v1852_v11, %v1848_v7 }
 0x645   :  { %v6090_v32 = vsel %vm1858_vm14, %v6087_v8, -1.0  ;;  %vm7465_vm14 = vcmp.ne.s32.totalorder %v5409_v27, 0 }
 0x646   :  { %1877 = vperm.xlu2 %4590, %v6090_v32  }
 0x663   :  { %v6140_v55 = vpop.permute.xlu2 %1869 }
 0x664   :  { %v1887_v31 = vperm.slane %v6140_v55, 0 }
 0x673   :  { %v6093_v63 = vpop.permute.xlu0 %1865 }
 0x674   :  { %v1881_v54 = vperm.slane %v6093_v63, 2  ;;  %v1880_v47 = vperm.slane %v6093_v63, 1  ;;  %v1879_v10 = vperm.slane %v6093_v63, 0  ;;  %v1884_v46 = vperm.slane %v6093_v63, 5 }
 0x675   :  { %v1883_v39 = vperm.slane %v6093_v63, 4  ;;  %v1882_v62 = vperm.slane %v6093_v63, 3  ;;  %v1886_v44 = vperm.slane %v6093_v63, 7  ;;  %v1885_v35 = vperm.slane %v6093_v63, 6 }
 0x676   :  { %vm1947_vm5 = vcmp.gt.f32.partialorder %v6069_v3, %v1881_v54  ;;  %vm2011_vm11 = vcmp.eq.f32.partialorder %v6069_v3, %v1881_v54  ;;  %vm2012_vm9 = vcmp.eq.f32.partialorder %v6076_v41, %v1881_v54  ;;  %vm1948_vm7 = vcmp.gt.f32.partialorder %v6076_v41, %v1881_v54  ;;  %v7478_v54 = vld [vmem:[#allocation12_spill] sm:$0xff] }
 0x677   :  { %vm2075_vm6 = vmand %vm2011_vm11, %vm7464_vm8  ;;  %vm2009_vm2 = vcmp.eq.f32.partialorder %v6069_v3, %v1880_v47  ;;  %vm2010_vm13 = vcmp.eq.f32.partialorder %v6076_v41, %v1880_v47  ;;  %vm1945_vm0 = vcmp.gt.f32.partialorder %v6069_v3, %v1880_v47  ;;  %vm1946_vm1 = vcmp.gt.f32.partialorder %v6076_v41, %v1880_v47 }
 0x678   :  { %vm2076_vm3 = vmand %vm2012_vm9, %vm7465_vm14  ;;  %vm7466_vm11 = vcmp.ne.s32.totalorder %v5384_v61, 0  ;;  %vm7467_vm9 = vcmp.ne.s32.totalorder %v5312_v43, 0  ;;  %v1890_v63 = vperm.slane %v6140_v55, 3 }
 0x679   :  { %vm2139_vm15 = vmor %vm1947_vm5, %vm2075_vm6  ;;  %vm2007_vm5 = vcmp.eq.f32.partialorder %v6069_v3, %v1879_v10  ;;  %vm7468_vm6 = vcmp.ne.s32.totalorder %v5430_v50, 0 }
 0x67a   :  { %vm2140_vm4 = vmor %vm1948_vm7, %vm2076_vm3  ;;  %v4243_v16 = vsel %vm2139_vm15, 1.0, %v7451_v36  ;;  %vm2008_vm15 = vcmp.eq.f32.partialorder %v6076_v41, %v1879_v10 }
 0x67b   :  { %v4244_v25 = vsel %vm2140_vm4, 1.0, %v7451_v36  ;;  %vm2073_vm8 = vmand %vm2009_vm2, %vm7466_vm11  ;;  %vm1943_vm4 = vcmp.gt.f32.partialorder %v6069_v3, %v1879_v10  ;;  %vm1944_vm2 = vcmp.gt.f32.partialorder %v6076_v41, %v1879_v10  ;;  %vm7469_vm11 = vcmp.ne.s32.totalorder %v5300_v29, 0  ;;  %v7480_v10 = vld [vmem:[#allocation14_spill] sm:$0xff] }
 0x67c   :  { %v4613_v51 = vpack.i.bf16 %v4244_v25, %v4243_v16  ;;  %vm2074_vm14 = vmand %vm2010_vm13, %vm7467_vm9 }
 0x67d   :  { %vm2137_vm3 = vmor %vm1945_vm0, %vm2073_vm8  ;;  %vm2017_vm0 = vcmp.eq.f32.partialorder %v6069_v3, %v1884_v46  ;;  %vm2018_vm8 = vcmp.eq.f32.partialorder %v6076_v41, %v1884_v46 }
 0x67e   :  { %4614 = vperm.xlu2 %4590, %v4613_v51   ;;  %vm2138_vm7 = vmor %vm1946_vm1, %vm2074_vm14  ;;  %v4241_v1 = vsel %vm2137_vm3, 1.0, %v7451_v36  ;;  %vm1953_vm3 = vcmp.gt.f32.partialorder %v6069_v3, %v1884_v46  ;;  %v7482_v51 = vld [vmem:[#allocation11_spill] sm:$0xff] }
 0x67f   :  { %v4242_v9 = vsel %vm2138_vm7, 1.0, %v7451_v36  ;;  %vm2071_vm13 = vmand %vm2007_vm5, %vm7468_vm6  ;;  %vm1954_vm5 = vcmp.gt.f32.partialorder %v6076_v41, %v1884_v46  ;;  %vm7470_vm7 = vcmp.ne.s32.totalorder %v5467_v6, 0  ;;  %vm7471_vm6 = vcmp.ne.s32.totalorder %v5331_v52, 0 }
 0x680   :  { %v4608_v59 = vpack.i.bf16 %v4242_v9, %v4241_v1  ;;  %vm2072_vm9 = vmand %vm2008_vm15, %vm7469_vm11  ;;  %v7484_v1 = vld [vmem:[#allocation3_spill] sm:$0xff]  ;;  %v1889_v9 = vperm.slane %v6140_v55, 2 }
 0x681   :  { %vm2135_vm1 = vmor %vm1943_vm4, %vm2071_vm13  ;;  %vm2015_vm4 = vcmp.eq.f32.partialorder %v6069_v3, %v1883_v39  ;;  %vm2016_vm13 = vcmp.eq.f32.partialorder %v6076_v41, %v1883_v39 }
 0x682   :  { %4609 = vperm.xlu1 %4596, %v4608_v59   ;;  %vm2136_vm14 = vmor %vm1944_vm2, %vm2072_vm9  ;;  %v4239_v5 = vsel %vm2135_vm1, 1.0, %v7451_v36  ;;  %vm1951_vm1 = vcmp.gt.f32.partialorder %v6069_v3, %v1883_v39 }
 0x683   :  { %v4240_v58 = vsel %vm2136_vm14, 1.0, %v7451_v36  ;;  %vm2081_vm15 = vmand %vm2017_vm0, %vm7470_vm7  ;;  %vm1952_vm0 = vcmp.gt.f32.partialorder %v6076_v41, %v1883_v39  ;;  %vm7473_vm7 = vcmp.ne.s32.totalorder %v5403_v26, 0 }
 0x684   :  { %v4603_v40 = vpack.i.bf16 %v4240_v58, %v4239_v5  ;;  %vm2082_vm11 = vmand %vm2018_vm8, %vm7471_vm6  ;;  %vm7472_vm8 = vcmp.ne.s32.totalorder %v5327_v24, 0  ;;  %v7486_v5 = vld [vmem:[#allocation17_spill] sm:$0xff] }
 0x685   :  { %vm2145_vm2 = vmor %vm1953_vm3, %vm2081_vm15  ;;  %vm2013_vm3 = vcmp.eq.f32.partialorder %v6069_v3, %v1882_v62  ;;  %vm2014_vm15 = vcmp.eq.f32.partialorder %v6076_v41, %v1882_v62 }
 0x686   :  { %4604 = vperm.xlu0 %4602, %v4603_v40   ;;  %vm2146_vm9 = vmor %vm1954_vm5, %vm2082_vm11  ;;  %v4249_v12 = vsel %vm2145_vm2, 1.0, %v7451_v36  ;;  %vm1949_vm2 = vcmp.gt.f32.partialorder %v6069_v3, %v1882_v62  ;;  %v7488_v40 = vld [vmem:[#allocation7_spill] sm:$0xff] }
 0x687   :  { %v4250_v45 = vsel %vm2146_vm9, 1.0, %v7451_v36  ;;  %vm2079_vm14 = vmand %vm2015_vm4, %vm7472_vm8  ;;  %vm1950_vm4 = vcmp.gt.f32.partialorder %v6076_v41, %v1882_v62  ;;  %vm7474_vm9 = vcmp.ne.s32.totalorder %v5320_v48, 0  ;;  %vm7475_vm8 = vcmp.ne.s32.totalorder %v5401_v23, 0 }
 0x688   :  { %v4628_v18 = vpack.i.bf16 %v4250_v45, %v4249_v12  ;;  %vm2080_vm6 = vmand %vm2016_vm13, %vm7473_vm7  ;;  %v1888_v62 = vperm.slane %v6140_v55, 1 }
 0x689   :  { %vm2143_vm5 = vmor %vm1951_vm1, %vm2079_vm14  ;;  %vm2023_vm1 = vcmp.eq.f32.partialorder %v6069_v3, %v1887_v31  ;;  %vm2024_vm14 = vcmp.eq.f32.partialorder %v6076_v41, %v1887_v31 }
 0x68a   :  { %4629 = vperm.xlu2 %4590, %v4628_v18   ;;  %vm2144_vm11 = vmor %vm1952_vm0, %vm2080_vm6  ;;  %v4247_v37 = vsel %vm2143_vm5, 1.0, %v7451_v36  ;;  %vm1959_vm5 = vcmp.gt.f32.partialorder %v6069_v3, %v1887_v31  ;;  %v7490_v18 = vld [vmem:[#allocation20_spill] sm:$0xff] }
 0x68b   :  { %v4248_v38 = vsel %vm2144_vm11, 1.0, %v7451_v36  ;;  %vm2077_vm13 = vmand %vm2013_vm3, %vm7474_vm9  ;;  %vm1960_vm3 = vcmp.gt.f32.partialorder %v6076_v41, %v1887_v31  ;;  %vm7476_vm11 = vcmp.ne.s32.totalorder %v5345_v53, 0  ;;  %vm7477_vm9 = vcmp.ne.s32.totalorder %v5411_v33, 0 }
 0x68c   :  { %v4623_v2 = vpack.i.bf16 %v4248_v38, %v4247_v37  ;;  %vm2078_vm7 = vmand %vm2014_vm15, %vm7475_vm8  ;;  %v7492_v37 = vld [vmem:[#allocation6_spill] sm:$0xff]  ;;  %v1893_v38 = vperm.slane %v6140_v55, 6 }
 0x68d   :  { %vm2141_vm0 = vmor %vm1949_vm2, %vm2077_vm13  ;;  %vm2021_vm2 = vcmp.eq.f32.partialorder %v6069_v3, %v1886_v44  ;;  %vm2022_vm13 = vcmp.eq.f32.partialorder %v6076_v41, %v1886_v44 }
 0x68e   :  { %4624 = vperm.xlu1 %4596, %v4623_v2   ;;  %vm2142_vm6 = vmor %vm1950_vm4, %vm2078_vm7  ;;  %v4245_v28 = vsel %vm2141_vm0, 1.0, %v7451_v36  ;;  %vm1957_vm0 = vcmp.gt.f32.partialorder %v6069_v3, %v1886_v44 }
 0x68f   :  { %v4246_v49 = vsel %vm2142_vm6, 1.0, %v7451_v36  ;;  %vm2087_vm15 = vmand %vm2023_vm1, %vm7476_vm11  ;;  %vm1958_vm1 = vcmp.gt.f32.partialorder %v6076_v41, %v1886_v44  ;;  %vm7479_vm6 = vcmp.ne.s32.totalorder %v7478_v54, 0  ;;  %vm7481_vm11 = vcmp.ne.s32.totalorder %v7480_v10, 0 }
 0x690   :  { %v4618_v15 = vpack.i.bf16 %v4246_v49, %v4245_v28  ;;  %vm2088_vm8 = vmand %vm2024_vm14, %vm7477_vm9  ;;  %v7494_v28 = vld [vmem:[#allocation5_spill] sm:$0xff] }
 0x691   :  { %vm2151_vm4 = vmor %vm1959_vm5, %vm2087_vm15  ;;  %vm2019_vm5 = vcmp.eq.f32.partialorder %v6069_v3, %v1885_v35  ;;  %vm2020_vm15 = vcmp.eq.f32.partialorder %v6076_v41, %v1885_v35 }
 0x692   :  { %4619 = vperm.xlu0 %4602, %v4618_v15   ;;  %vm2152_vm7 = vmor %vm1960_vm3, %vm2088_vm8  ;;  %v4255_v11 = vsel %vm2151_vm4, 1.0, %v7451_v36  ;;  %vm1955_vm4 = vcmp.gt.f32.partialorder %v6069_v3, %v1885_v35  ;;  %v7496_v15 = vld [vmem:[#allocation15_spill] sm:$0xff] }
 0x693   :  { %v4256_v7 = vsel %vm2152_vm7, 1.0, %v7451_v36  ;;  %vm2085_vm14 = vmand %vm2021_vm2, %vm7479_vm6  ;;  %vm1956_vm2 = vcmp.gt.f32.partialorder %v6076_v41, %v1885_v35  ;;  %vm7483_vm7 = vcmp.ne.s32.totalorder %v7482_v51, 0  ;;  %vm7485_vm6 = vcmp.ne.s32.totalorder %v7484_v1, 0 }
 0x694   :  { %v4643_v47 = vpack.i.bf16 %v4256_v7, %v4255_v11  ;;  %vm2086_vm9 = vmand %vm2022_vm13, %vm7481_vm11  ;;  %v1892_v35 = vperm.slane %v6140_v55, 5 }
 0x695   :  { %vm2149_vm3 = vmor %vm1957_vm0, %vm2085_vm14  ;;  %vm2029_vm0 = vcmp.eq.f32.partialorder %v6069_v3, %v1890_v63  ;;  %vm2030_vm14 = vcmp.eq.f32.partialorder %v6076_v41, %v1890_v63 }
 0x696   :  { %4644 = vperm.xlu2 %4590, %v4643_v47   ;;  %vm2150_vm8 = vmor %vm1958_vm1, %vm2086_vm9  ;;  %v4253_v16 = vsel %vm2149_vm3, 1.0, %v7451_v36  ;;  %vm1965_vm3 = vcmp.gt.f32.partialorder %v6069_v3, %v1890_v63  ;;  %v7498_v47 = vld [vmem:[#allocation9_spill] sm:$0xff] }
 0x697   :  { %v4254_v25 = vsel %vm2150_vm8, 1.0, %v7451_v36  ;;  %vm2083_vm13 = vmand %vm2019_vm5, %vm7483_vm7  ;;  %vm1966_vm5 = vcmp.gt.f32.partialorder %v6076_v41, %v1890_v63  ;;  %vm7487_vm8 = vcmp.ne.s32.totalorder %v7486_v5, 0  ;;  %vm7489_vm7 = vcmp.ne.s32.totalorder %v7488_v40, 0 }
 0x698   :  { %v4638_v46 = vpack.i.bf16 %v4254_v25, %v4253_v16  ;;  %vm2084_vm11 = vmand %vm2020_vm15, %vm7485_vm6  ;;  %v7499_v16 = vld [vmem:[#allocation21_spill] sm:$0xff]  ;;  %v1891_v25 = vperm.slane %v6140_v55, 4 }
 0x699   :  { %vm2147_vm1 = vmor %vm1955_vm4, %vm2083_vm13  ;;  %vm2027_vm4 = vcmp.eq.f32.partialorder %v6069_v3, %v1889_v9  ;;  %vm2028_vm13 = vcmp.eq.f32.partialorder %v6076_v41, %v1889_v9 }
 0x69a   :  { %4639 = vperm.xlu1 %4596, %v4638_v46   ;;  %vm2148_vm9 = vmor %vm1956_vm2, %vm2084_vm11  ;;  %v4251_v59 = vsel %vm2147_vm1, 1.0, %v7451_v36  ;;  %vm1963_vm1 = vcmp.gt.f32.partialorder %v6069_v3, %v1889_v9 }
 0x69b   :  { %v4252_v39 = vsel %vm2148_vm9, 1.0, %v7451_v36  ;;  %vm2093_vm15 = vmand %vm2029_vm0, %vm7487_vm8  ;;  %vm1964_vm0 = vcmp.gt.f32.partialorder %v6076_v41, %v1889_v9  ;;  %vm7491_vm9 = vcmp.ne.s32.totalorder %v7490_v18, 0  ;;  %vm7493_vm8 = vcmp.ne.s32.totalorder %v7492_v37, 0 }
 0x69c   :  { %v4633_v58 = vpack.i.bf16 %v4252_v39, %v4251_v59  ;;  %vm2094_vm6 = vmand %vm2030_vm14, %vm7489_vm7  ;;  %v7500_v59 = vld [vmem:[#allocation8_spill] sm:$0xff] }
 0x69d   :  { %vm2157_vm2 = vmor %vm1965_vm3, %vm2093_vm15  ;;  %vm2025_vm3 = vcmp.eq.f32.partialorder %v6069_v3, %v1888_v62  ;;  %vm2026_vm15 = vcmp.eq.f32.partialorder %v6076_v41, %v1888_v62 }
 0x69e   :  { %4634 = vperm.xlu0 %4602, %v4633_v58   ;;  %vm2158_vm11 = vmor %vm1966_vm5, %vm2094_vm6  ;;  %v4261_v12 = vsel %vm2157_vm2, 1.0, %v7451_v36  ;;  %vm1961_vm2 = vcmp.gt.f32.partialorder %v6069_v3, %v1888_v62  ;;  %v7502_v58 = vld [vmem:[#allocation19_spill] sm:$0xff] }
 0x69f   :  { %v4262_v45 = vsel %vm2158_vm11, 1.0, %v7451_v36  ;;  %vm2091_vm14 = vmand %vm2027_vm4, %vm7491_vm9  ;;  %vm1962_vm4 = vcmp.gt.f32.partialorder %v6076_v41, %v1888_v62  ;;  %vm7495_vm11 = vcmp.ne.s32.totalorder %v7494_v28, 0  ;;  %vm7497_vm9 = vcmp.ne.s32.totalorder %v7496_v15, 0 }
 0x6a0   :  { %v4658_v31 = vpack.i.bf16 %v4262_v45, %v4261_v12  ;;  %vm2092_vm7 = vmand %vm2028_vm13, %vm7493_vm8  ;;  %v1894_v62 = vperm.slane %v6140_v55, 7  ;;  %v7506_v55 = vld [vmem:[#allocation16_spill] sm:$0xff] }
 0x6a1   :  { %vm2155_vm5 = vmor %vm1963_vm1, %vm2091_vm14  ;;  %vm2035_vm1 = vcmp.eq.f32.partialorder %v6069_v3, %v1893_v38  ;;  %vm2036_vm14 = vcmp.eq.f32.partialorder %v6076_v41, %v1893_v38 }
 0x6a2   :  { %4659 = vperm.xlu2 %4590, %v4658_v31   ;;  %vm2156_vm6 = vmor %vm1964_vm0, %vm2092_vm7  ;;  %v4259_v2 = vsel %vm2155_vm5, 1.0, %v7451_v36  ;;  %vm1971_vm5 = vcmp.gt.f32.partialorder %v6069_v3, %v1893_v38 }
 0x6a3   :  { %v4260_v44 = vsel %vm2156_vm6, 1.0, %v7451_v36  ;;  %vm2089_vm13 = vmand %vm2025_vm3, %vm7495_vm11  ;;  %vm1972_vm3 = vcmp.gt.f32.partialorder %v6076_v41, %v1893_v38  ;;  %vm2034_vm11 = vcmp.eq.f32.partialorder %v6076_v41, %v1892_v35  ;;  %v7504_v38 = vld [vmem:[#allocation18_spill] sm:$0xff] }
 0x6a4   :  { %v4653_v49 = vpack.i.bf16 %v4260_v44, %v4259_v2  ;;  %vm2090_vm8 = vmand %vm2026_vm15, %vm7497_vm9  ;;  %vm1969_vm9 = vcmp.gt.f32.partialorder %v6069_v3, %v1892_v35 }
 0x6a5   :  { %vm2153_vm0 = vmor %vm1961_vm2, %vm2089_vm13  ;;  %vm2033_vm2 = vcmp.eq.f32.partialorder %v6069_v3, %v1892_v35 }
 0x6a6   :  { %4654 = vperm.xlu1 %4596, %v4653_v49   ;;  %vm2154_vm7 = vmor %vm1962_vm4, %vm2090_vm8  ;;  %v4257_v11 = vsel %vm2153_vm0, 1.0, %v7451_v36  ;;  %vm1970_vm8 = vcmp.gt.f32.partialorder %v6076_v41, %v1892_v35 }
 0x6a7   :  { %v4258_v7 = vsel %vm2154_vm7, 1.0, %v7451_v36  ;;  %vm2099_vm15 = vmand %vm2035_vm1, %vm7356_vm12  ;;  %vm7501_vm1 = vcmp.ne.s32.totalorder %v7500_v59, 0 }
 0x6a8   :  { %v4648_v63 = vpack.i.bf16 %v4258_v7, %v4257_v11  ;;  %vm2100_vm6 = vmand %vm2036_vm14, %vm7355_vm10  ;;  %vm7503_vm14 = vcmp.ne.s32.totalorder %v7502_v58, 0  ;;  %v7508_v11 = vld [vmem:[#allocation22_spill] sm:$0xff]  ;;  %vm7512_vm10 = vcmp.ne.s32.totalorder %v5384_v61, 0 }
 0x6a9   :  { %vm2163_vm4 = vmor %vm1971_vm5, %vm2099_vm15  ;;  %vm2031_vm5 = vcmp.eq.f32.partialorder %v6069_v3, %v1891_v25  ;;  %vm2032_vm15 = vcmp.eq.f32.partialorder %v6076_v41, %v1891_v25 }
 0x6aa   :  { %4649 = vperm.xlu0 %4602, %v4648_v63   ;;  %vm2164_vm13 = vmor %vm1972_vm3, %vm2100_vm6  ;;  %v4267_v46 = vsel %vm2163_vm4, 1.0, %v7451_v36  ;;  %vm1967_vm4 = vcmp.gt.f32.partialorder %v6069_v3, %v1891_v25  ;;  %v7510_v63 = vld [vmem:[#allocation10_spill] sm:$0xff] }
 0x6ab   :  { %v4268_v9 = vsel %vm2164_vm13, 1.0, %v7451_v36  ;;  %vm2097_vm0 = vmand %vm2033_vm2, %vm7501_vm1  ;;  %vm1968_vm2 = vcmp.gt.f32.partialorder %v6076_v41, %v1891_v25 }
 0x6ac   :  { %v4673_v39 = vpack.i.bf16 %v4268_v9, %v4267_v46  ;;  %vm2098_vm7 = vmand %vm2034_vm11, %vm7503_vm14  ;;  %vm7505_vm11 = vcmp.ne.s32.totalorder %v7504_v38, 0  ;;  %vm2038_vm14 = vcmp.eq.f32.partialorder %v6076_v41, %v1894_v62 }
 0x6ad   :  { %vm2161_vm3 = vmor %vm1969_vm9, %vm2097_vm0  ;;  %vm7507_vm9 = vcmp.ne.s32.totalorder %v7506_v55, 0  ;;  %vm2037_vm0 = vcmp.eq.f32.partialorder %v6069_v3, %v1894_v62 }
 0x6ae   :  { %4674 = vperm.xlu2 %4590, %v4673_v39   ;;  %vm2162_vm6 = vmor %vm1970_vm8, %vm2098_vm7  ;;  %v4265_v12 = vsel %vm2161_vm3, 1.0, %v7451_v36  ;;  %vm1973_vm3 = vcmp.gt.f32.partialorder %v6069_v3, %v1894_v62 }
 0x6af   :  { %v4266_v31 = vsel %vm2162_vm6, 1.0, %v7451_v36  ;;  %vm2095_vm13 = vmand %vm2031_vm5, %vm7505_vm11  ;;  %vm1974_vm5 = vcmp.gt.f32.partialorder %v6076_v41, %v1894_v62  ;;  %vm7509_vm6 = vcmp.ne.s32.totalorder %v7508_v11, 0  ;;  %vm7511_vm11 = vcmp.ne.s32.totalorder %v7510_v63, 0 }
 0x6b0   :  { %v6255_v45 = vpop.permute.xlu1 %1873  ;;  %v4668_v2 = vpack.i.bf16 %v4266_v31, %v4265_v12  ;;  %vm2096_vm1 = vmand %vm2032_vm15, %vm7507_vm9 }
 0x6b1   :  { %v1896_v44 = vperm.slane %v6255_v45, 1  ;;  %vm2159_vm8 = vmor %vm1967_vm4, %vm2095_vm13  ;;  %v1895_v25 = vperm.slane %v6255_v45, 0  ;;  %v1899_v3 = vperm.slane %v6255_v45, 4  ;;  %v1897_v31 = vperm.slane %v6255_v45, 2 }
 0x6b2   :  { %4669 = vperm.xlu1 %4596, %v4668_v2   ;;  %vm2160_vm7 = vmor %vm1968_vm2, %vm2096_vm1  ;;  %v4263_v49 = vsel %vm2159_vm8, 1.0, %v7451_v36 }
 0x6b3   :  { %v4264_v35 = vsel %vm2160_vm7, 1.0, %v7451_v36  ;;  %vm2101_vm15 = vmand %vm2037_vm0, %vm7509_vm6  ;;  %vm2041_vm4 = vcmp.eq.f32.partialorder %v6083_v60, %v1896_v44  ;;  %vm2042_vm13 = vcmp.eq.f32.partialorder %v6090_v32, %v1896_v44  ;;  %vm1977_vm8 = vcmp.gt.f32.partialorder %v6083_v60, %v1896_v44 }
 0x6b4   :  { %v4663_v7 = vpack.i.bf16 %v4264_v35, %v4263_v49  ;;  %vm2102_vm9 = vmand %vm2038_vm14, %vm7511_vm11  ;;  %vm1978_vm7 = vcmp.gt.f32.partialorder %v6090_v32, %v1896_v44  ;;  %vm7513_vm6 = vcmp.ne.s32.totalorder %v5312_v43, 0  ;;  %vm2039_vm14 = vcmp.eq.f32.partialorder %v6083_v60, %v1895_v25 }
 0x6b5   :  { %vm2165_vm2 = vmor %vm1973_vm3, %vm2101_vm15  ;;  %vm1975_vm11 = vcmp.gt.f32.partialorder %v6083_v60, %v1895_v25  ;;  %v1898_v35 = vperm.slane %v6255_v45, 3 }
 0x6b6   :  { %4664 = vperm.xlu0 %4602, %v4663_v7   ;;  %vm2166_vm1 = vmor %vm1974_vm5, %vm2102_vm9  ;;  %v4269_v41 = vsel %vm2165_vm2, 1.0, %v7451_v36  ;;  %vm2040_vm5 = vcmp.eq.f32.partialorder %v6090_v32, %v1895_v25  ;;  %vm7514_vm9 = vcmp.ne.s32.totalorder %v5430_v50, 0  ;;  %vm7515_vm2 = vcmp.ne.s32.totalorder %v5300_v29, 0  ;;  %v6309_v7 = vpop.permute.xlu2 %1877 }
 0x6b7   :  { %vm2105_vm0 = vmand %vm2041_vm4, %vm7512_vm10  ;;  %v4270_v46 = vsel %vm2166_vm1, 1.0, %v7451_v36  ;;  %vm1976_vm10 = vcmp.gt.f32.partialorder %v6090_v32, %v1895_v25  ;;  %vm2047_vm1 = vcmp.eq.f32.partialorder %v6083_v60, %v1899_v3 }
 0x6b8   :  { %vm2106_vm12 = vmand %vm2042_vm13, %vm7513_vm6  ;;  %v4678_v62 = vpack.i.bf16 %v4270_v46, %v4269_v41  ;;  %vm1984_vm6 = vcmp.gt.f32.partialorder %v6090_v32, %v1899_v3  ;;  %v1903_v46 = vperm.slane %v6309_v7, 0 }
 0x6b9   :  { %vm2169_vm3 = vmor %vm1977_vm8, %vm2105_vm0  ;;  %vm2048_vm8 = vcmp.eq.f32.partialorder %v6090_v32, %v1899_v3  ;;  %vm1983_vm0 = vcmp.gt.f32.partialorder %v6083_v60, %v1899_v3 }
 0x6ba   :  { %vm2170_vm15 = vmor %vm1978_vm7, %vm2106_vm12  ;;  %v4273_v9 = vsel %vm2169_vm3, 1.0, %v7451_v36 }
 0x6bb   :  { %v4274_v39 = vsel %vm2170_vm15, 1.0, %v7451_v36  ;;  %vm2103_vm4 = vmand %vm2039_vm14, %vm7514_vm9  ;;  %vm7516_vm14 = vcmp.ne.s32.totalorder %v5327_v24, 0  ;;  %vm2044_vm9 = vcmp.eq.f32.partialorder %v6090_v32, %v1897_v31 }
 0x6bc   :  { %v4688_v12 = vpack.i.bf16 %v4274_v39, %v4273_v9  ;;  %vm2104_vm13 = vmand %vm2040_vm5, %vm7515_vm2  ;;  %vm7517_vm5 = vcmp.ne.s32.totalorder %v5403_v26, 0  ;;  %vm1979_vm2 = vcmp.gt.f32.partialorder %v6083_v60, %v1897_v31 }
 0x6bd   :  { %vm2167_vm12 = vmor %vm1975_vm11, %vm2103_vm4  ;;  %vm2043_vm11 = vcmp.eq.f32.partialorder %v6083_v60, %v1897_v31 }
 0x6be   :  { %4679 = vperm.xlu0 %4602, %v4678_v62   ;;  %4689 = vperm.xlu2 %4590, %v4688_v12   ;;  %vm2168_vm7 = vmor %vm1976_vm10, %vm2104_vm13  ;;  %v4271_v2 = vsel %vm2167_vm12, 1.0, %v7451_v36  ;;  %vm1980_vm13 = vcmp.gt.f32.partialorder %v6090_v32, %v1897_v31  ;;  %v1900_v12 = vperm.slane %v6255_v45, 5 }
 0x6bf   :  { %v4272_v44 = vsel %vm2168_vm7, 1.0, %v7451_v36  ;;  %vm2111_vm3 = vmand %vm2047_vm1, %vm7516_vm14  ;;  %vm7518_vm1 = vcmp.ne.s32.totalorder %v5398_v19, 0  ;;  %vm2046_vm14 = vcmp.eq.f32.partialorder %v6090_v32, %v1898_v35 }
 0x6c0   :  { %v4683_v49 = vpack.i.bf16 %v4272_v44, %v4271_v2  ;;  %vm2112_vm15 = vmand %vm2048_vm8, %vm7517_vm5  ;;  %vm7519_vm8 = vcmp.ne.s32.totalorder %v5409_v27, 0  ;;  %vm1981_vm5 = vcmp.gt.f32.partialorder %v6083_v60, %v1898_v35 }
 0x6c1   :  { %vm2175_vm10 = vmor %vm1983_vm0, %vm2111_vm3  ;;  %vm2045_vm0 = vcmp.eq.f32.partialorder %v6083_v60, %v1898_v35 }
 0x6c2   :  { %4684 = vperm.xlu1 %4596, %v4683_v49   ;;  %vm2176_vm4 = vmor %vm1984_vm6, %vm2112_vm15  ;;  %v4279_v25 = vsel %vm2175_vm10, 1.0, %v7451_v36  ;;  %vm1982_vm15 = vcmp.gt.f32.partialorder %v6090_v32, %v1898_v35  ;;  %v1901_v49 = vperm.slane %v6255_v45, 6 }
 0x6c3   :  { %v4280_v3 = vsel %vm2176_vm4, 1.0, %v7451_v36  ;;  %vm2107_vm12 = vmand %vm2043_vm11, %vm7518_vm1  ;;  %vm7520_vm11 = vcmp.ne.s32.totalorder %v5320_v48, 0  ;;  %vm2056_vm1 = vcmp.eq.f32.partialorder %v6090_v32, %v1903_v46 }
 0x6c4   :  { %v4703_v41 = vpack.i.bf16 %v4280_v3, %v4279_v25  ;;  %vm2108_vm7 = vmand %vm2044_vm9, %vm7519_vm8  ;;  %vm7521_vm9 = vcmp.ne.s32.totalorder %v5401_v23, 0  ;;  %vm1991_vm8 = vcmp.gt.f32.partialorder %v6083_v60, %v1903_v46 }
 0x6c5   :  { %vm2171_vm6 = vmor %vm1979_vm2, %vm2107_vm12  ;;  %vm2055_vm2 = vcmp.eq.f32.partialorder %v6083_v60, %v1903_v46 }
 0x6c6   :  { %4704 = vperm.xlu0 %4602, %v4703_v41   ;;  %vm2172_vm3 = vmor %vm1980_vm13, %vm2108_vm7  ;;  %v4275_v9 = vsel %vm2171_vm6, 1.0, %v7451_v36  ;;  %vm1992_vm7 = vcmp.gt.f32.partialorder %v6090_v32, %v1903_v46  ;;  %v1905_v41 = vperm.slane %v6309_v7, 2 }
 0x6c7   :  { %v4276_v39 = vsel %vm2172_vm3, 1.0, %v7451_v36  ;;  %vm2109_vm10 = vmand %vm2045_vm0, %vm7520_vm11  ;;  %vm7522_vm0 = vcmp.ne.s32.totalorder %v5345_v53, 0  ;;  %vm2050_vm11 = vcmp.eq.f32.partialorder %v6090_v32, %v1900_v12 }
 0x6c8   :  { %v4693_v62 = vpack.i.bf16 %v4276_v39, %v4275_v9  ;;  %vm2110_vm4 = vmand %vm2046_vm14, %vm7521_vm9  ;;  %vm7523_vm14 = vcmp.ne.s32.totalorder %v5411_v33, 0  ;;  %vm1985_vm9 = vcmp.gt.f32.partialorder %v6083_v60, %v1900_v12 }
 0x6c9   :  { %vm2173_vm13 = vmor %vm1981_vm5, %vm2109_vm10  ;;  %vm2049_vm5 = vcmp.eq.f32.partialorder %v6083_v60, %v1900_v12 }
 0x6ca   :  { %4694 = vperm.xlu2 %4590, %v4693_v62   ;;  %vm2174_vm12 = vmor %vm1982_vm15, %vm2110_vm4  ;;  %v4277_v31 = vsel %vm2173_vm13, 1.0, %v7451_v36  ;;  %vm1986_vm4 = vcmp.gt.f32.partialorder %v6090_v32, %v1900_v12  ;;  %v1906_v62 = vperm.slane %v6309_v7, 3 }
 0x6cb   :  { %v4278_v2 = vsel %vm2174_vm12, 1.0, %v7451_v36  ;;  %vm2119_vm6 = vmand %vm2055_vm2, %vm7522_vm0  ;;  %vm7524_vm2 = vcmp.ne.s32.totalorder %v5467_v6, 0  ;;  %vm2052_vm0 = vcmp.eq.f32.partialorder %v6090_v32, %v1901_v49 }
 0x6cc   :  { %v4698_v44 = vpack.i.bf16 %v4278_v2, %v4277_v31  ;;  %vm2120_vm3 = vmand %vm2056_vm1, %vm7523_vm14  ;;  %vm7525_vm1 = vcmp.ne.s32.totalorder %v5331_v52, 0  ;;  %vm1987_vm14 = vcmp.gt.f32.partialorder %v6083_v60, %v1901_v49 }
 0x6cd   :  { %vm2183_vm15 = vmor %vm1991_vm8, %vm2119_vm6  ;;  %vm2051_vm8 = vcmp.eq.f32.partialorder %v6083_v60, %v1901_v49 }
 0x6ce   :  { %4699 = vperm.xlu1 %4596, %v4698_v44   ;;  %vm2184_vm10 = vmor %vm1992_vm7, %vm2120_vm3  ;;  %v4287_v35 = vsel %vm2183_vm15, 1.0, %v7451_v36  ;;  %vm1988_vm3 = vcmp.gt.f32.partialorder %v6090_v32, %v1901_v49  ;;  %v1904_v44 = vperm.slane %v6309_v7, 1 }
 0x6cf   :  { %v4288_v25 = vsel %vm2184_vm10, 1.0, %v7451_v36  ;;  %vm2113_vm13 = vmand %vm2049_vm5, %vm7524_vm2  ;;  %vm7526_vm5 = vcmp.ne.s32.totalorder %v7482_v51, 0  ;;  %vm2060_vm2 = vcmp.eq.f32.partialorder %v6090_v32, %v1905_v41 }
 0x6d0   :  { %v4718_v3 = vpack.i.bf16 %v4288_v25, %v4287_v35  ;;  %vm2114_vm12 = vmand %vm2050_vm11, %vm7525_vm1  ;;  %vm7527_vm11 = vcmp.ne.s32.totalorder %v7484_v1, 0  ;;  %vm1995_vm1 = vcmp.gt.f32.partialorder %v6083_v60, %v1905_v41 }
 0x6d1   :  { %vm2177_vm7 = vmor %vm1985_vm9, %vm2113_vm13  ;;  %vm2059_vm9 = vcmp.eq.f32.partialorder %v6083_v60, %v1905_v41 }
 0x6d2   :  { %4719 = vperm.xlu0 %4602, %v4718_v3   ;;  %vm2178_vm6 = vmor %vm1986_vm4, %vm2114_vm12  ;;  %v4281_v46 = vsel %vm2177_vm7, 1.0, %v7451_v36  ;;  %vm1996_vm12 = vcmp.gt.f32.partialorder %v6090_v32, %v1905_v41  ;;  %v1908_v3 = vperm.slane %v6309_v7, 5 }
 0x6d3   :  { %v4282_v9 = vsel %vm2178_vm6, 1.0, %v7451_v36  ;;  %vm2115_vm15 = vmand %vm2051_vm8, %vm7526_vm5  ;;  %vm7528_vm8 = vcmp.ne.s32.totalorder %v7490_v18, 0  ;;  %vm2062_vm5 = vcmp.eq.f32.partialorder %v6090_v32, %v1906_v62 }
 0x6d4   :  { %v4708_v39 = vpack.i.bf16 %v4282_v9, %v4281_v46  ;;  %vm2116_vm10 = vmand %vm2052_vm0, %vm7527_vm11  ;;  %vm7529_vm0 = vcmp.ne.s32.totalorder %v7492_v37, 0  ;;  %vm1997_vm11 = vcmp.gt.f32.partialorder %v6083_v60, %v1906_v62 }
 0x6d5   :  { %vm2179_vm4 = vmor %vm1987_vm14, %vm2115_vm15  ;;  %vm2061_vm14 = vcmp.eq.f32.partialorder %v6083_v60, %v1906_v62 }
 0x6d6   :  { %4709 = vperm.xlu2 %4590, %v4708_v39   ;;  %vm2180_vm13 = vmor %vm1988_vm3, %vm2116_vm10  ;;  %v4283_v12 = vsel %vm2179_vm4, 1.0, %v7451_v36  ;;  %vm1998_vm10 = vcmp.gt.f32.partialorder %v6090_v32, %v1906_v62  ;;  %v1909_v39 = vperm.slane %v6309_v7, 6 }
 0x6d7   :  { %v4284_v31 = vsel %vm2180_vm13, 1.0, %v7451_v36  ;;  %vm2123_vm7 = vmand %vm2059_vm9, %vm7528_vm8  ;;  %vm7530_vm9 = vcmp.ne.s32.totalorder %v7486_v5, 0  ;;  %vm2058_vm8 = vcmp.eq.f32.partialorder %v6090_v32, %v1904_v44 }
 0x6d8   :  { %v4713_v2 = vpack.i.bf16 %v4284_v31, %v4283_v12  ;;  %vm2124_vm6 = vmand %vm2060_vm2, %vm7529_vm0  ;;  %vm7531_vm2 = vcmp.ne.s32.totalorder %v7488_v40, 0  ;;  %vm1993_vm0 = vcmp.gt.f32.partialorder %v6083_v60, %v1904_v44 }
 0x6d9   :  { %vm2187_vm3 = vmor %vm1995_vm1, %vm2123_vm7  ;;  %vm2057_vm1 = vcmp.eq.f32.partialorder %v6083_v60, %v1904_v44 }
 0x6da   :  { %4714 = vperm.xlu1 %4596, %v4713_v2   ;;  %vm2188_vm15 = vmor %vm1996_vm12, %vm2124_vm6  ;;  %v4291_v49 = vsel %vm2187_vm3, 1.0, %v7451_v36  ;;  %vm1994_vm6 = vcmp.gt.f32.partialorder %v6090_v32, %v1904_v44  ;;  %v1907_v2 = vperm.slane %v6309_v7, 4 }
 0x6db   :  { %v4292_v35 = vsel %vm2188_vm15, 1.0, %v7451_v36  ;;  %vm2125_vm4 = vmand %vm2061_vm14, %vm7530_vm9  ;;  %vm7532_vm14 = vcmp.ne.s32.totalorder %v7494_v28, 0  ;;  %vm2066_vm9 = vcmp.eq.f32.partialorder %v6090_v32, %v1908_v3 }
 0x6dc   :  { %v4728_v25 = vpack.i.bf16 %v4292_v35, %v4291_v49  ;;  %vm2126_vm13 = vmand %vm2062_vm5, %vm7531_vm2  ;;  %vm7533_vm5 = vcmp.ne.s32.totalorder %v7496_v15, 0  ;;  %vm2001_vm2 = vcmp.gt.f32.partialorder %v6083_v60, %v1908_v3 }
 0x6dd   :  { %vm2189_vm12 = vmor %vm1997_vm11, %vm2125_vm4  ;;  %vm2065_vm11 = vcmp.eq.f32.partialorder %v6083_v60, %v1908_v3 }
 0x6de   :  { %4729 = vperm.xlu0 %4602, %v4728_v25   ;;  %vm2190_vm7 = vmor %vm1998_vm10, %vm2126_vm13  ;;  %v4293_v41 = vsel %vm2189_vm12, 1.0, %v7451_v36  ;;  %vm2002_vm13 = vcmp.gt.f32.partialorder %v6090_v32, %v1908_v3  ;;  %v1902_v25 = vperm.slane %v6255_v45, 7  ;;  %v1910_v45 = vperm.slane %v6309_v7, 7 }
 0x6df   :  { %v4294_v46 = vsel %vm2190_vm7, 1.0, %v7451_v36  ;;  %vm2121_vm3 = vmand %vm2057_vm1, %vm7532_vm14  ;;  %vm7534_vm1 = vcmp.ne.s32.totalorder %v7500_v59, 0  ;;  %vm2068_vm14 = vcmp.eq.f32.partialorder %v6090_v32, %v1909_v39 }
 0x6e0   :  { %v4733_v9 = vpack.i.bf16 %v4294_v46, %v4293_v41  ;;  %vm2122_vm15 = vmand %vm2058_vm8, %vm7533_vm5  ;;  %vm7535_vm8 = vcmp.ne.s32.totalorder %v7502_v58, 0  ;;  %vm2003_vm5 = vcmp.gt.f32.partialorder %v6083_v60, %v1909_v39 }
 0x6e1   :  { %vm2185_vm10 = vmor %vm1993_vm0, %vm2121_vm3  ;;  %vm2067_vm0 = vcmp.eq.f32.partialorder %v6083_v60, %v1909_v39 }
 0x6e2   :  { %4734 = vperm.xlu2 %4590, %v4733_v9   ;;  %vm2186_vm4 = vmor %vm1994_vm6, %vm2122_vm15  ;;  %v4289_v62 = vsel %vm2185_vm10, 1.0, %v7451_v36  ;;  %vm2004_vm15 = vcmp.gt.f32.partialorder %v6090_v32, %v1909_v39 }
 0x6e3   :  { %v4290_v12 = vsel %vm2186_vm4, 1.0, %v7451_v36  ;;  %vm2129_vm12 = vmand %vm2065_vm11, %vm7534_vm1  ;;  %vm7536_vm11 = vcmp.ne.s32.totalorder %v7498_v47, 0  ;;  %vm2064_vm1 = vcmp.eq.f32.partialorder %v6090_v32, %v1907_v2 }
 0x6e4   :  { %v4723_v31 = vpack.i.bf16 %v4290_v12, %v4289_v62  ;;  %vm2130_vm7 = vmand %vm2066_vm9, %vm7535_vm8  ;;  %vm7537_vm9 = vcmp.ne.s32.totalorder %v7499_v16, 0  ;;  %vm1999_vm8 = vcmp.gt.f32.partialorder %v6083_v60, %v1907_v2 }
 0x6e5   :  { %vm2193_vm6 = vmor %vm2001_vm2, %vm2129_vm12  ;;  %vm2063_vm2 = vcmp.eq.f32.partialorder %v6083_v60, %v1907_v2 }
 0x6e6   :  { %4724 = vperm.xlu1 %4596, %v4723_v31   ;;  %vm2194_vm3 = vmor %vm2002_vm13, %vm2130_vm7  ;;  %v4297_v44 = vsel %vm2193_vm6, 1.0, %v7451_v36  ;;  %vm2000_vm7 = vcmp.gt.f32.partialorder %v6090_v32, %v1907_v2 }
 0x6e7   :  { %v4298_v49 = vsel %vm2194_vm3, 1.0, %v7451_v36  ;;  %vm2131_vm10 = vmand %vm2067_vm0, %vm7536_vm11  ;;  %vm7538_vm0 = vcmp.ne.s32.totalorder %v7504_v38, 0  ;;  %vm2054_vm11 = vcmp.eq.f32.partialorder %v6090_v32, %v1902_v25 }
 0x6e8   :  { %v4743_v35 = vpack.i.bf16 %v4298_v49, %v4297_v44  ;;  %vm2132_vm4 = vmand %vm2068_vm14, %vm7537_vm9  ;;  %vm7539_vm14 = vcmp.ne.s32.totalorder %v7506_v55, 0  ;;  %vm1989_vm9 = vcmp.gt.f32.partialorder %v6083_v60, %v1902_v25 }
 0x6e9   :  { %vm2195_vm13 = vmor %vm2003_vm5, %vm2131_vm10  ;;  %vm2053_vm5 = vcmp.eq.f32.partialorder %v6083_v60, %v1902_v25 }
 0x6ea   :  { %4744 = vperm.xlu0 %4602, %v4743_v35   ;;  %vm2196_vm12 = vmor %vm2004_vm15, %vm2132_vm4  ;;  %v4299_v3 = vsel %vm2195_vm13, 1.0, %v7451_v36  ;;  %vm1990_vm4 = vcmp.gt.f32.partialorder %v6090_v32, %v1902_v25  ;;  %v4615_v25 = vpop.permute.xlu2 %4614 }
 0x6eb   :  { %v4300_v41 = vsel %vm2196_vm12, 1.0, %v7451_v36  ;;  %vm2127_vm6 = vmand %vm2063_vm2, %vm7538_vm0  ;;  %vm7540_vm2 = vcmp.ne.s32.totalorder %v7478_v54, 0 }
 0x6ec   :  { %v4748_v46 = vpack.i.bf16 %v4300_v41, %v4299_v3  ;;  %vm2128_vm3 = vmand %vm2064_vm1, %vm7539_vm14  ;;  %vm7541_vm1 = vcmp.ne.s32.totalorder %v7480_v10, 0  ;;  %vm2005_vm14 = vcmp.gt.f32.partialorder %v6083_v60, %v1910_v45 }
 0x6ed   :  { %vm2191_vm15 = vmor %vm1999_vm8, %vm2127_vm6  ;;  %vm2069_vm8 = vcmp.eq.f32.partialorder %v6083_v60, %v1910_v45 }
 0x6ee   :  { %4749 = vperm.xlu2 %4590, %v4748_v46   ;;  %vm2192_vm10 = vmor %vm2000_vm7, %vm2128_vm3  ;;  %v4295_v9 = vsel %vm2191_vm15, 1.0, %v7451_v36  ;;  %vm2070_vm7 = vcmp.eq.f32.partialorder %v6090_v32, %v1910_v45  ;;  %vm2006_vm3 = vcmp.gt.f32.partialorder %v6090_v32, %v1910_v45 }
 0x6ef   :  { %v4296_v39 = vsel %vm2192_vm10, 1.0, %v7451_v36  ;;  %vm2117_vm13 = vmand %vm2053_vm5, %vm7540_vm2  ;;  %vm7542_vm5 = vcmp.ne.s32.totalorder %v7508_v11, 0 }
 0x6f0   :  { %v4738_v62 = vpack.i.bf16 %v4296_v39, %v4295_v9  ;;  %vm2118_vm12 = vmand %vm2054_vm11, %vm7541_vm1  ;;  %vm7543_vm11 = vcmp.ne.s32.totalorder %v7510_v63, 0  ;;  %vm7546_vm1 = vcmask 1041409  }
 0x6f1   :  { %vm2181_vm0 = vmor %vm1989_vm9, %vm2117_vm13 }
 0x6f2   :  { %4739 = vperm.xlu1 %4596, %v4738_v62   ;;  %vm2182_vm6 = vmor %vm1990_vm4, %vm2118_vm12  ;;  %v4285_v7 = vsel %vm2181_vm0, 1.0, %v7451_v36  ;;  %vm7544_vm4 = vcmask 130112   ;;  %vm7549_vm0 = vcmask 1042434  }
 0x6f3   :  { %v4286_v12 = vsel %vm2182_vm6, 1.0, %v7451_v36  ;;  %vm2133_vm15 = vmand %vm2069_vm8, %vm7542_vm5  ;;  %vm7551_vm6 = vcmask 1043459  }
 0x6f4   :  { %v4753_v31 = vpack.i.bf16 %v4286_v12, %v4285_v7  ;;  %vm2134_vm10 = vmand %vm2070_vm7, %vm7543_vm11  ;;  %v4610_v60 = vpop.permute.xlu1 %4609  ;;  %vm7556_vm11 = vcmask 1045509  }
 0x6f5   :  { %vm2197_vm9 = vmor %vm2005_vm14, %vm2133_vm15  ;;  %v4612_v32 = vunpack.i.h.bf16 %v4610_v60  ;;  %v4611_v3 = vunpack.i.l.bf16 %v4610_v60  ;;  %vm7552_vm14 = vcmask 1044484  }
 0x6f6   :  { %4754 = vperm.xlu0 %4602, %v4753_v31   ;;  %vm2198_vm2 = vmor %vm2006_vm3, %vm2134_vm10  ;;  %v4301_v2 = vsel %vm2197_vm9, 1.0, %v7451_v36  ;;  %v4617_v31 = vunpack.i.h.bf16 %v4615_v25  ;;  %vm7557_vm10 = vcmask 1046534   ;;  %vm7558_vm9 = vcmask 1047559  }
 0x6f7   :  { %v4302_v44 = vsel %vm2198_vm2, 1.0, %v7451_v36  ;;  %v2587_v9 = vperm.slane %v4612_v32, %v5184_v14  ;;  %v2586_v39 = vperm.slane %v4611_v3, %v5181_v13  ;;  %vm7545_vm13 = vmmov %vm7544_vm4  ;;  %vm7559_vm2 = vcmask 130048  }
 0x6f8   :  { %v4758_v49 = vpack.i.bf16 %v4302_v44, %v4301_v2  ;;  %v4605_v35 = vpop.permute.xlu0 %4604  ;;  %v4616_v2 = vunpack.i.l.bf16 %v4615_v25  ;;  %v2590_v3 = vperm.slane %v4617_v31, %v5184_v14  ;;  %vm7547_vm12 = vmmov %vm7544_vm4 }
 0x6f9   :  { %v4607_v41 = vunpack.i.h.bf16 %v4605_v35  ;;  %v4606_v46 = vunpack.i.l.bf16 %v4605_v35  ;;  %v2588_v60 = vsel %vm7544_vm4, %v2587_v9, %v2586_v39  ;;  %vm7548_vm8 = vmmov %vm7544_vm4 }
 0x6fa   :  { %4759 = vperm.xlu1 %4596, %v4758_v49   ;;  %vm7550_vm7 = vmmov %vm7544_vm4 }
 0x6fb   :  { %v2584_v62 = vperm.slane %v4607_v41, %v5184_v14  ;;  %v2583_v7 = vperm.slane %v4606_v46, %v5181_v13  ;;  %v2589_v41 = vperm.slane %v4616_v2, %v5181_v13  ;;  %v4630_v46 = vpop.permute.xlu2 %4629  ;;  %vm7553_vm3 = vmmov %vm7544_vm4 }
 0x6fc   :  { %v4631_v40 = vunpack.i.l.bf16 %v4630_v46  ;;  %vm7554_vm5 = vmmov %vm7553_vm3 }
 0x6fd   :  { %v2585_v35 = vsel %vm7545_vm13, %v2584_v62, %v2583_v7  ;;  %v2591_v62 = vsel %vm7548_vm8, %v2590_v3, %v2589_v41  ;;  %vm7555_vm15 = vmmov %vm7553_vm3 }
 0x6fe   :  { %v2679_v47 = vsel %vm7546_vm1, %v2588_v60, %v2585_v35  ;;  %vm7560_vm4 = vmmov %vm7553_vm3 }
 0x6ff   :  { %v2680_v31 = vsel %vm7549_vm0, %v2591_v62, %v2679_v47  ;;  %vm7561_vm13 = vmmov %vm7553_vm3 }
 0x700   :  { %v4625_v45 = vpop.permute.xlu1 %4624  ;;  %vm7562_vm1 = vmmov %vm7553_vm3 }
 0x701   :  { %v4627_v63 = vunpack.i.h.bf16 %v4625_v45  ;;  %v4626_v11 = vunpack.i.l.bf16 %v4625_v45  ;;  %v4632_v45 = vunpack.i.h.bf16 %v4630_v46  ;;  %vm7564_vm8 = vmmov %vm7549_vm0 }
 0x702   :  { %vm7565_vm0 = vmmov %vm7562_vm1 }
 0x703   :  { %v2596_v25 = vperm.slane %v4627_v63, %v5184_v14  ;;  %v2599_v60 = vperm.slane %v4632_v45, %v5184_v14  ;;  %v2598_v63 = vperm.slane %v4631_v40, %v5181_v13  ;;  %v4645_v45 = vpop.permute.xlu2 %4644 }
 0x704   :  { %v4620_v12 = vpop.permute.xlu0 %4619 }
 0x705   :  { %v4622_v44 = vunpack.i.h.bf16 %v4620_v12  ;;  %v4621_v49 = vunpack.i.l.bf16 %v4620_v12  ;;  %v2595_v12 = vperm.slane %v4626_v11, %v5181_v13 }
 0x707   :  { %v2593_v16 = vperm.slane %v4622_v44, %v5184_v14  ;;  %v2592_v32 = vperm.slane %v4621_v49, %v5181_v13  ;;  %v2597_v2 = vsel %vm7550_vm7, %v2596_v25, %v2595_v12  ;;  %v2600_v25 = vsel %vm7553_vm3, %v2599_v60, %v2598_v63  ;;  %vm7566_vm7 = vmmov %vm7565_vm0 }
 0x708   :  { %v4646_v60 = vunpack.i.l.bf16 %v4645_v45  ;;  %vm7568_vm3 = vcmask 1044484  }
 0x709   :  { %v2594_v9 = vsel %vm7547_vm12, %v2593_v16, %v2592_v32  ;;  %vm7563_vm12 = vcmask 1041409  }
 0x70a   :  { %v2681_v49 = vsel %vm7551_vm6, %v2594_v9, %v2680_v31 }
 0x70b   :  { %v2682_v3 = vsel %vm7552_vm14, %v2597_v2, %v2681_v49  ;;  %v4660_v63 = vpop.permute.xlu2 %4659  ;;  %vm7567_vm14 = vmmov %vm7565_vm0 }
 0x70c   :  { %v4640_v39 = vpop.permute.xlu1 %4639  ;;  %v2683_v9 = vsel %vm7556_vm11, %v2600_v25, %v2682_v3 }
 0x70d   :  { %v4642_v7 = vunpack.i.h.bf16 %v4640_v39  ;;  %v4641_v44 = vunpack.i.l.bf16 %v4640_v39 }
 0x70f   :  { %v2605_v11 = vperm.slane %v4642_v7, %v5184_v14  ;;  %v2604_v35 = vperm.slane %v4641_v44, %v5181_v13 }
 0x710   :  { %v4635_v16 = vpop.permute.xlu0 %4634 }
 0x711   :  { %v4637_v32 = vunpack.i.h.bf16 %v4635_v16  ;;  %v4636_v46 = vunpack.i.l.bf16 %v4635_v16  ;;  %v2606_v12 = vsel %vm7554_vm5, %v2605_v11, %v2604_v35  ;;  %v4647_v16 = vunpack.i.h.bf16 %v4645_v45  ;;  %vm7569_vm5 = vmmov %vm7556_vm11 }
 0x712   :  { %v4661_v45 = vunpack.i.l.bf16 %v4660_v63  ;;  %vm7571_vm11 = vmmov %vm7565_vm0 }
 0x713   :  { %v2602_v41 = vperm.slane %v4637_v32, %v5184_v14  ;;  %v2601_v47 = vperm.slane %v4636_v46, %v5181_v13  ;;  %v2608_v3 = vperm.slane %v4647_v16, %v5184_v14 }
 0x714   :  { %v2616_v16 = vperm.slane %v4661_v45, %v5181_v13 }
 0x715   :  { %v2603_v40 = vsel %vm7555_vm15, %v2602_v41, %v2601_v47  ;;  %v2607_v41 = vperm.slane %v4646_v60, %v5181_v13  ;;  %v4675_v60 = vpop.permute.xlu2 %4674  ;;  %vm7570_vm15 = vmmov %vm7565_vm0 }
 0x716   :  { %v2684_v39 = vsel %vm7557_vm10, %v2603_v40, %v2683_v9  ;;  %v4662_v9 = vunpack.i.h.bf16 %v4660_v63 }
 0x717   :  { %v2685_v62 = vsel %vm7558_vm9, %v2606_v12, %v2684_v39  ;;  %v2609_v39 = vsel %vm7561_vm13, %v2608_v3, %v2607_v41  ;;  %vm7573_vm13 = vmmov %vm7565_vm0 }
 0x718   :  { %v2711_v7 = vsel %vm7559_vm2, %v2685_v62, 0.0  ;;  %v4655_v44 = vpop.permute.xlu1 %4654 }
 0x719   :  { %2712 = vadd.xlane.f32.xlu2 %v2711_v7  ;;  %v4657_v11 = vunpack.i.h.bf16 %v4655_v44  ;;  %v4656_v35 = vunpack.i.l.bf16 %v4655_v44 }
 0x71b   :  { %v2614_v47 = vperm.slane %v4657_v11, %v5184_v14  ;;  %v2613_v25 = vperm.slane %v4656_v35, %v5181_v13 }
 0x71c   :  { %v4650_v31 = vpop.permute.xlu0 %4649 }
 0x71d   :  { %v4652_v2 = vunpack.i.h.bf16 %v4650_v31  ;;  %v4651_v49 = vunpack.i.l.bf16 %v4650_v31  ;;  %v2615_v62 = vsel %vm7562_vm1, %v2614_v47, %v2613_v25  ;;  %v4677_v47 = vunpack.i.h.bf16 %v4675_v60  ;;  %vm7574_vm1 = vmmov %vm7563_vm12 }
 0x71e   :  { %v4676_v25 = vunpack.i.l.bf16 %v4675_v60 }
 0x71f   :  { %v2611_v32 = vperm.slane %v4652_v2, %v5184_v14  ;;  %v2610_v46 = vperm.slane %v4651_v49, %v5181_v13  ;;  %v2617_v49 = vperm.slane %v4662_v9, %v5184_v14 }
 0x721   :  { %v2612_v12 = vsel %vm7560_vm4, %v2611_v32, %v2610_v46  ;;  %vm7572_vm4 = vmmov %vm7565_vm0 }
 0x722   :  { %v2686_v7 = vsel %vm7563_vm12, %v2612_v12, %v2609_v39  ;;  %v2618_v12 = vsel %vm7565_vm0, %v2617_v49, %v2616_v16  ;;  %vm7575_vm12 = vmmov %vm7565_vm0 }
 0x723   :  { %v2687_v32 = vsel %vm7564_vm8, %v2615_v62, %v2686_v7  ;;  %v2626_v62 = vperm.slane %v4677_v47, %v5184_v14  ;;  %v2625_v7 = vperm.slane %v4676_v25, %v5181_v13  ;;  %vm7576_vm8 = vmmov %vm7565_vm0 }
 0x724   :  { %v4670_v40 = vpop.permute.xlu1 %4669  ;;  %v2688_v9 = vsel %vm7551_vm6, %v2618_v12, %v2687_v32  ;;  %vm7578_vm6 = vmmov %vm7574_vm1 }
 0x725   :  { %v4672_v44 = vunpack.i.h.bf16 %v4670_v40  ;;  %v4671_v31 = vunpack.i.l.bf16 %v4670_v40  ;;  %v2627_v16 = vsel %vm7570_vm15, %v2626_v62, %v2625_v7  ;;  %vm7582_vm15 = vmmov %vm7565_vm0 }
 0x727   :  { %v2623_v63 = vperm.slane %v4672_v44, %v5184_v14  ;;  %v2622_v46 = vperm.slane %v4671_v31, %v5181_v13 }
 0x728   :  { %v4665_v2 = vpop.permute.xlu0 %4664 }
 0x729   :  { %v4667_v11 = vunpack.i.h.bf16 %v4665_v2  ;;  %v4666_v35 = vunpack.i.l.bf16 %v4665_v2  ;;  %v2624_v45 = vsel %vm7567_vm14, %v2623_v63, %v2622_v46  ;;  %vm7579_vm14 = vcmask 1042434  }
 0x72b   :  { %v2620_v3 = vperm.slane %v4667_v11, %v5184_v14  ;;  %v2619_v41 = vperm.slane %v4666_v35, %v5181_v13 }
 0x72d   :  { %v2621_v40 = vsel %vm7566_vm7, %v2620_v3, %v2619_v41  ;;  %v4690_v41 = vpop.permute.xlu2 %4689  ;;  %vm7577_vm7 = vmmov %vm7565_vm0 }
 0x72e   :  { %v2689_v39 = vsel %vm7568_vm3, %v2621_v40, %v2688_v9  ;;  %v4691_v62 = vunpack.i.l.bf16 %v4690_v41  ;;  %vm7580_vm3 = vcmask 1043459  }
 0x72f   :  { %v2690_v11 = vsel %vm7569_vm5, %v2624_v45, %v2689_v39  ;;  %v4692_v39 = vunpack.i.h.bf16 %v4690_v41  ;;  %vm7581_vm5 = vmmov %vm7565_vm0 }
 0x730   :  { %v4680_v44 = vpop.permute.xlu0 %4679  ;;  %v2691_v32 = vsel %vm7557_vm10, %v2627_v16, %v2690_v11  ;;  %v2634_v11 = vperm.slane %v4691_v62, %v5181_v13  ;;  %vm7584_vm10 = vmmov %vm7579_vm14 }
 0x731   :  { %v4682_v31 = vunpack.i.h.bf16 %v4680_v44  ;;  %v4681_v2 = vunpack.i.l.bf16 %v4680_v44 }
 0x733   :  { %v2629_v60 = vperm.slane %v4682_v31, %v5184_v14  ;;  %v2628_v49 = vperm.slane %v4681_v2, %v5181_v13  ;;  %v2635_v2 = vperm.slane %v4692_v39, %v5184_v14 }
 0x734   :  { %v4685_v3 = vpop.permute.xlu1 %4684 }
 0x735   :  { %v2630_v35 = vsel %vm7571_vm11, %v2629_v60, %v2628_v49  ;;  %v4695_v12 = vpop.permute.xlu2 %4694  ;;  %v4687_v7 = vunpack.i.h.bf16 %v4685_v3  ;;  %v4686_v44 = vunpack.i.l.bf16 %v4685_v3  ;;  %v2636_v41 = vsel %vm7572_vm4, %v2635_v2, %v2634_v11  ;;  %vm7583_vm11 = vmmov %vm7565_vm0 }
 0x736   :  { %v2692_v63 = vsel %vm7558_vm9, %v2630_v35, %v2691_v32  ;;  %v4697_v60 = vunpack.i.h.bf16 %v4695_v12  ;;  %v4696_v49 = vunpack.i.l.bf16 %v4695_v12  ;;  %vm7585_vm9 = vmmov %vm7565_vm0 }
 0x737   :  { %v2714_v46 = vsel %vm7559_vm2, %v2692_v63, 0.0  ;;  %v2632_v16 = vperm.slane %v4687_v7, %v5184_v14  ;;  %v2631_v35 = vperm.slane %v4686_v44, %v5181_v13  ;;  %vm7586_vm2 = vcmask 1044484   ;;  %vm7587_vm4 = vmmov %vm7565_vm0 }
 0x738   :  { %2715 = vadd.xlane.f32.xlu0 %v2714_v46  ;;  %v4705_v47 = vpop.permute.xlu0 %4704  ;;  %v2638_v3 = vperm.slane %v4697_v60, %v5184_v14  ;;  %v2637_v62 = vperm.slane %v4696_v49, %v5181_v13 }
 0x739   :  { %v2633_v12 = vsel %vm7573_vm13, %v2632_v16, %v2631_v35  ;;  %v4707_v59 = vunpack.i.h.bf16 %v4705_v47  ;;  %v4706_v7 = vunpack.i.l.bf16 %v4705_v47  ;;  %vm7588_vm13 = vmmov %vm7565_vm0 }
 0x73a   :  { %v2693_v35 = vsel %vm7574_vm1, %v2636_v41, %v2633_v12  ;;  %vm7589_vm1 = vmmov %vm7580_vm3 }
 0x73d   :  { %v6517_v45 = vpop.permute.xlu2 %4709 }
 0x740   :  { %v4700_v25 = vpop.permute.xlu1 %4699 }
 0x741   :  { %v4702_v55 = vunpack.i.h.bf16 %v4700_v25  ;;  %v4701_v38 = vunpack.i.l.bf16 %v4700_v25 }
 0x743   :  { %v2641_v25 = vperm.slane %v4702_v55, %v5184_v14  ;;  %v2640_v2 = vperm.slane %v4701_v38, %v5181_v13  ;;  %v2644_v55 = vperm.slane %v4707_v59, %v5184_v14  ;;  %v2643_v38 = vperm.slane %v4706_v7, %v5181_v13 }
 0x744   :  { %v4720_v40 = vpop.permute.xlu0 %4719 }
 0x745   :  { %v4735_v5 = vpop.permute.xlu2 %4734  ;;  %v4722_v58 = vunpack.i.h.bf16 %v4720_v40  ;;  %v4721_v39 = vunpack.i.l.bf16 %v4720_v40  ;;  %v4712_v40 = vunpack.i.h.bf16 %v6517_v45 }
 0x746   :  { %v4737_v33 = vunpack.i.h.bf16 %v4735_v5  ;;  %v4736_v44 = vunpack.i.l.bf16 %v4735_v5  ;;  %v4711_v5 = vunpack.i.l.bf16 %v6517_v45  ;;  %v2639_v45 = vsel %vm7565_vm0, %v2638_v3, %v2637_v62 }
 0x747   :  { %v2656_v49 = vperm.slane %v4722_v58, %v5184_v14  ;;  %v2655_v16 = vperm.slane %v4721_v39, %v5181_v13  ;;  %v2642_v58 = vsel %vm7576_vm8, %v2641_v25, %v2640_v2  ;;  %vm7591_vm8 = vmmov %vm7586_vm2  ;;  %vm7592_vm0 = vcmask 1046534  }
 0x748   :  { %v2664_v28 = vperm.slane %v4736_v44, %v5181_v13  ;;  %v2646_v62 = vperm.slane %v4711_v5, %v5181_v13 }
 0x74c   :  { %v4715_v9 = vpop.permute.xlu1 %4714 }
 0x74d   :  { %v4717_v47 = vunpack.i.h.bf16 %v4715_v9  ;;  %v4750_v41 = vpop.permute.xlu2 %4749 }
 0x74f   :  { %v2650_v59 = vperm.slane %v4717_v47, %v5184_v14 }
 0x750   :  { %v4730_v31 = vpop.permute.xlu0 %4729 }
 0x751   :  { %v4732_v11 = vunpack.i.h.bf16 %v4730_v31  ;;  %v4731_v60 = vunpack.i.l.bf16 %v4730_v31 }
 0x753   :  { %v2662_v39 = vperm.slane %v4732_v11, %v5184_v14  ;;  %v2661_v37 = vperm.slane %v4731_v60, %v5181_v13 }
 0x758   :  { %v4725_v32 = vpop.permute.xlu1 %4724 }
 0x759   :  { %v4727_v63 = vunpack.i.h.bf16 %v4725_v32  ;;  %v4726_v46 = vunpack.i.l.bf16 %v4725_v32 }
 0x75b   :  { %v2659_v53 = vperm.slane %v4727_v63, %v5184_v14  ;;  %v2658_v32 = vperm.slane %v4726_v46, %v5181_v13  ;;  %v4716_v63 = vunpack.i.l.bf16 %v4715_v9  ;;  %v2665_v46 = vperm.slane %v4737_v33, %v5184_v14 }
 0x75c   :  { %v4745_v15 = vpop.permute.xlu0 %4744  ;;  %v2647_v9 = vperm.slane %v4712_v40, %v5184_v14  ;;  %v2657_v33 = vsel %vm7577_vm7, %v2656_v49, %v2655_v16  ;;  %v2645_v40 = vsel %vm7582_vm15, %v2644_v55, %v2643_v38  ;;  %v2663_v49 = vsel %vm7583_vm11, %v2662_v39, %v2661_v37  ;;  %vm7593_vm7 = vmmov %vm7587_vm4 }
 0x75d   :  { %v2660_v31 = vsel %vm7575_vm12, %v2659_v53, %v2658_v32  ;;  %v2649_v12 = vperm.slane %v4716_v63, %v5181_v13  ;;  %v4747_v7 = vunpack.i.h.bf16 %v4745_v15  ;;  %v2694_v32 = vsel %vm7579_vm14, %v2639_v45, %v2693_v35  ;;  %vm7598_vm15 = vmmov %vm7587_vm4 }
 0x75e   :  { %v2700_v53 = vsel %vm7578_vm6, %v2660_v31, %v2657_v33  ;;  %v4746_v25 = vunpack.i.l.bf16 %v4745_v15  ;;  %v2695_v3 = vsel %vm7580_vm3, %v2642_v58, %v2694_v32  ;;  %v2666_v60 = vsel %vm7581_vm5, %v2665_v46, %v2664_v28  ;;  %vm7594_vm6 = vmmov %vm7587_vm4 }
 0x75f   :  { %v4752_v16 = vunpack.i.h.bf16 %v4750_v41  ;;  %v2701_v35 = vsel %vm7584_vm10, %v2663_v49, %v2700_v53  ;;  %v4751_v15 = vunpack.i.l.bf16 %v4750_v41  ;;  %v2671_v31 = vperm.slane %v4747_v7, %v5184_v14  ;;  %vm7599_vm11 = vmmov %vm7587_vm4 }
 0x760   :  { %v2651_v58 = vsel %vm7585_vm9, %v2650_v59, %v2649_v12  ;;  %v2696_v5 = vsel %vm7586_vm2, %v2645_v40, %v2695_v3  ;;  %v2670_v28 = vperm.slane %v4746_v25, %v5181_v13  ;;  %v2648_v38 = vsel %vm7588_vm13, %v2647_v9, %v2646_v62  ;;  %vm7600_vm10 = vmmov %vm7592_vm0 }
 0x761   :  { %v2702_v39 = vsel %vm7589_vm1, %v2666_v60, %v2701_v35  ;;  %vm7590_vm12 = vcmask 1045509   ;;  %v2674_v12 = vperm.slane %v4752_v16, %v5184_v14  ;;  %v2673_v7 = vperm.slane %v4751_v15, %v5181_v13 }
 0x762   :  { %v2697_v53 = vsel %vm7590_vm12, %v2648_v38, %v2696_v5  ;;  %vm7595_vm14 = vcmask 1047559   ;;  %vm7596_vm3 = vmmov %vm7590_vm12  ;;  %vm7597_vm5 = vcmask 130048   ;;  %v5044_v38 = vld [vmem:[%s7267_s3 + $0x1] ss:$0 sm:$0xff] }
 0x763   :  { %v2698_v32 = vsel %vm7592_vm0, %v2651_v58, %v2697_v53  ;;  %v2675_v16 = vsel %vm7598_vm15, %v2674_v12, %v2673_v7  ;;  %vm7601_vm9 = vmmov %vm7595_vm14  ;;  %v5043_v58 = vld [vmem:[%s7267_s3] ss:$0 sm:$0xff] }
 0x764   :  { %v4740_v44 = vpop.permute.xlu1 %4739  ;;  %vm7602_vm2 = vmmov %vm7597_vm5  ;;  %v4400_v12 = vld [vmem:[%s7271_s10] sm:$0xff] }
 0x765   :  { %v4742_v2 = vunpack.i.h.bf16 %v4740_v44  ;;  %v4741_v11 = vunpack.i.l.bf16 %v4740_v44  ;;  %vm7604_vm0 = vmmov %vm7602_vm2 }
 0x766   :  { %vm7609_vm15 = vmmov %vm7604_vm0 }
 0x767   :  { %v2668_v47 = vperm.slane %v4742_v2, %v5184_v14  ;;  %v2667_v63 = vperm.slane %v4741_v11, %v5181_v13  ;;  %v2672_v11 = vsel %vm7594_vm6, %v2671_v31, %v2670_v28  ;;  %v5052_v31 = vmov 2  }
 0x768   :  { %v4755_v45 = vpop.permute.xlu0 %4754  ;;  %4763 = vset.pattern.permute.xlu0 %v5052_v31  ;;  %4769 = vset.pattern.permute.xlu1 %v5052_v31 }
 0x769   :  { %v2669_v46 = vsel %vm7587_vm4, %v2668_v47, %v2667_v63  ;;  %v4757_v37 = vunpack.i.h.bf16 %v4755_v45  ;;  %v4756_v55 = vunpack.i.l.bf16 %v4755_v45  ;;  %4775 = vset.pattern.permute.xlu2 %v5052_v31  ;;  %v2738_v31 = vmul.f32 %v6087_v8, %v6061_v0 }
 0x76a   :  { %v2703_v59 = vsel %vm7591_vm8, %v2669_v46, %v2702_v39  ;;  %vm7603_vm8 = vmmov %vm7594_vm6 }
 0x76b   :  { %v2653_v33 = vperm.slane %v4757_v37, %v5184_v14  ;;  %v2652_v41 = vperm.slane %v4756_v55, %v5181_v13  ;;  %v2704_v62 = vsel %vm7596_vm3, %v2672_v11, %v2703_v59  ;;  %v4401_v59 = vld [vmem:[%s7271_s10 + $0x8] sm:$0xff] }
 0x76c   :  { %v4760_v44 = vpop.permute.xlu1 %4759  ;;  %v2705_v63 = vsel %vm7600_vm10, %v2675_v16, %v2704_v62  ;;  %2810 = vmatpush.bf16.msrb.mxu0 %v4401_v59 }
 0x76d   :  { %v4762_v25 = vunpack.i.h.bf16 %v4760_v44  ;;  %v4761_v2 = vunpack.i.l.bf16 %v4760_v44  ;;  %v2654_v9 = vsel %vm7593_vm7, %v2653_v33, %v2652_v41  ;;  %v2735_v44 = vmul.f32 %v6066_v56, %v6049_v57 }
 0x76e   :  { %v2699_v3 = vsel %vm7595_vm14, %v2654_v9, %v2698_v32  ;;  %v2736_v32 = vmul.f32 %v6073_v30, %v6053_v42  ;;  %vm7605_vm7 = vcmask 261120   ;;  %vm7606_vm14 = vmmov %vm7604_vm0 }
 0x76f   :  { %v2677_v60 = vperm.slane %v4762_v25, %v5184_v14  ;;  %v2676_v40 = vperm.slane %v4761_v2, %v5181_v13  ;;  %v2717_v49 = vsel %vm7597_vm5, %v2699_v3, 0.0  ;;  %vm7607_vm3 = vmmov %vm7605_vm7 }
 0x770   :  { %2718 = vadd.xlane.f32.xlu1 %v2717_v49  ;;  %2811 = vmatpush.bf16.msrb.mxu0 %v4400_v12  ;;  %vm7608_vm5 = vmmov %vm7604_vm0 }
 0x771   :  { %v2678_v47 = vsel %vm7599_vm11, %v2677_v60, %v2676_v40 }
 0x772   :  { %v2706_v35 = vsel %vm7601_vm9, %v2678_v47, %v2705_v63 }
 0x773   :  { %v2720_v15 = vsel %vm7602_vm2, %v2706_v35, 0.0 }
 0x774   :  { %2721 = vadd.xlane.f32.xlu2 %v2720_v15  ;;  %v2737_v15 = vmul.f32 %v6080_v17, %v6057_v4 }
 0x78c   :  { %v2713_v45 = vpop.xlane.xlu2 %2712 }
 0x78d   :  { %vm2723_vm4 = vcmp.lt.f32.partialorder %v2713_v45, %v5043_v58 }
 0x78e   :  { %v6589_v28 = vsel %vm2723_vm4, 1.0, %v7451_v36 }
 0x7ab   :  { %v2716_v5 = vpop.xlane.xlu0 %2715 }
 0x7ac   :  { %vm2724_vm13 = vcmp.lt.f32.partialorder %v2716_v5, %v5043_v58 }
 0x7ad   :  { %v6592_v46 = vsel %vm2724_vm13, 1.0, %v7451_v36 }
 0x7ae   :  { %v4764_v37 = vpack.i.bf16 %v6592_v46, %v6589_v28 }
 0x7b0   :  { %4765 = vperm.xlu0 %4763, %v4764_v37  }
 0x7e3   :  { %v2719_v55 = vpop.xlane.xlu1 %2718 }
 0x7e4   :  { %vm2725_vm1 = vcmp.lt.f32.partialorder %v2719_v55, %v5044_v38 }
 0x7e5   :  { %v6600_v33 = vsel %vm2725_vm1, 1.0, %v7451_v36 }
 0x7e7   :  { %v2722_v39 = vpop.xlane.xlu2 %2721 }
 0x7e8   :  { %vm2726_vm12 = vcmp.lt.f32.partialorder %v2722_v39, %v5044_v38 }
 0x7e9   :  { %v6603_v41 = vsel %vm2726_vm12, 1.0, %v7451_v36 }
 0x7ea   :  { %v4770_v53 = vpack.i.bf16 %v6603_v41, %v6600_v33 }
 0x7ec   :  { %4771 = vperm.xlu1 %4769, %v4770_v53  }
 0x822   :  { %v4766_v7 = vpop.permute.xlu0 %4765 }
 0x823   :  { %v4768_v25 = vunpack.i.h.bf16 %v4766_v7  ;;  %v4767_v2 = vunpack.i.l.bf16 %v4766_v7 }
 0x825   :  { %v2760_v9 = vmul.f32 %v4768_v25, %v2736_v32  ;;  %v2824_v11 = vperm.slane %v4768_v25, %v5184_v14  ;;  %v2759_v3 = vmul.f32 %v4767_v2, %v2735_v44  ;;  %v2823_v62 = vperm.slane %v4767_v2, %v5181_v13 }
 0x827   :  { %v2764_v60 = vmax.f32 %v2760_v9, 0.0  ;;  %v2763_v40 = vmax.f32 %v2759_v3, 0.0  ;;  %v2825_v49 = vsel %vm7603_vm8, %v2824_v11, %v2823_v62 }
 0x828   :  { %v2843_v16 = vmul.f32 %v2825_v49, %v5197_v22  ;;  %v2844_v25 = vmul.f32 %v2825_v49, %v5210_v34 }
 0x829   :  { %v2773_v47 = vpack.c.bf16 %v2764_v60, %v2764_v60  ;;  %v2772_v63 = vpack.c.bf16 %v2763_v40, %v2763_v40 }
 0x82a   :  { %v2847_v57 = vsel %vm7604_vm0, %v2843_v16, 0.0  ;;  %v2850_v2 = vsel %vm7609_vm15, %v2844_v25, 0.0 }
 0x82b   :  { %v2781_v56 = vunpack.c.l.b16 %v2773_v47  ;;  %v2780_v42 = vunpack.c.l.b16 %v2772_v63  ;;  %2848 = vadd.xlane.f32.xlu2 %v2847_v57 }
 0x82d   :  { %v2784_v30 = vpack.c.b16 %v2781_v56, %v2780_v42 }
 0x82f   :  { %4315 = vmatmul.msk.bf16.vlgmr.msrb.gmra.mxu0 %vm7605_vm7, %v2784_v30 }
 0x85e   :  { %v4772_v35 = vpop.permute.xlu1 %4771 }
 0x85f   :  { %v4774_v45 = vunpack.i.h.bf16 %v4772_v35  ;;  %v4773_v58 = vunpack.i.l.bf16 %v4772_v35 }
 0x861   :  { %v2762_v22 = vmul.f32 %v4774_v45, %v2738_v31  ;;  %v2827_v5 = vperm.slane %v4774_v45, %v5184_v14  ;;  %v2761_v37 = vmul.f32 %v4773_v58, %v2737_v15  ;;  %v2826_v55 = vperm.slane %v4773_v58, %v5181_v13 }
 0x863   :  { %v2766_v38 = vmax.f32 %v2762_v22, 0.0  ;;  %v2765_v39 = vmax.f32 %v2761_v37, 0.0  ;;  %v2828_v53 = vsel %vm7594_vm6, %v2827_v5, %v2826_v55 }
 0x864   :  { %v2845_v59 = vmul.f32 %v2828_v53, %v5195_v21  ;;  %v2846_v44 = vmul.f32 %v2828_v53, %v5193_v20 }
 0x865   :  { %v2775_v12 = vpack.c.bf16 %v2766_v38, %v2766_v38  ;;  %v2774_v7 = vpack.c.bf16 %v2765_v39, %v2765_v39 }
 0x866   :  { %v2853_v4 = vsel %vm7606_vm14, %v2845_v59, 0.0  ;;  %v2856_v32 = vsel %vm7608_vm5, %v2846_v44, 0.0  ;;  %vm7610_vm14 = vmmov %vm7608_vm5 }
 0x867   :  { %v2783_v17 = vunpack.c.l.b16 %v2775_v12  ;;  %v2782_v0 = vunpack.c.l.b16 %v2774_v7  ;;  %2854 = vadd.xlane.f32.xlu2 %v2853_v4 }
 0x869   :  { %v2785_v8 = vpack.c.b16 %v2783_v17, %v2782_v0 }
 0x86b   :  { %4316 = vmatmul.msk.bf16.gmra.mxu0 %vm7607_vm3, %v2785_v8  ;;  %vm7611_vm3 = vmmov %vm7608_vm5  ;;  %vm7612_vm5 = vcmask 261120  }
 0x86c   :  { %vm7613_vm15 = vmmov %vm7612_vm5 }
 0x86f   :  { %2857 = vadd.xlane.f32.xlu2 %v2856_v32 }
 0x877   :  { %2851 = vadd.xlane.f32.xlu2 %v2850_v2 }
 0x89e   :  { %v2849_v21 = vpop.xlane.xlu2 %2848 }
 0x89f   :  { %v2859_v9 = vadd.f32 1.0, %v2849_v21 }
 0x8a1   :  { %5005 = vrsqrt.f32 %v2859_v9  ;;  %vm2869_vm12 = vweird.f32 %v2859_v9 }
 0x8a7   :  { %v5006_v60 = vpop.eup %5005 }
 0x8a8   :  { %v2864_v47 = vmul.f32 %v5006_v60, %v2859_v9  ;;  %vm2870_vm4 = vweird.f32 %v5006_v60 }
 0x8a9   :  { %vm2871_vm8 = vmor %vm2869_vm12, %vm2870_vm4  ;;  %vm3058_vm12 = vcmp.gt.f32.partialorder %v6589_v28, 0.5 }
 0x8aa   :  { %v2865_v34 = vmul.f32 %v5006_v60, %v2864_v47 }
 0x8ac   :  { %v2813_v11 = vpop.f32.mrf.mxu0  ;;  %v2866_v31 = vmul.f32 0.5, %v2865_v34 }
 0x8ae   :  { %v2867_v37 = vsub.f32 1.5, %v2866_v31 }
 0x8b0   :  { %v2868_v12 = vmul.f32 %v5006_v60, %v2867_v37 }
 0x8b2   :  { %v2872_v25 = vsel %vm2871_vm8, %v5006_v60, %v2868_v12  ;;  %v5045_v60 = vld [vmem:[%s7264_s1 + $0x8] sm:$0xff] }
 0x8b4   :  { %v2815_v63 = vpop.f32.mrf.mxu0 }
 0x8da   :  { %v2855_v3 = vpop.xlane.xlu2 %2854 }
 0x8db   :  { %v2861_v62 = vadd.f32 1.0, %v2855_v3 }
 0x8dd   :  { %5007 = vrsqrt.f32 %v2861_v62  ;;  %vm2889_vm10 = vweird.f32 %v2861_v62 }
 0x8e2   :  { %v2858_v40 = vpop.xlane.xlu2 %2857 }
 0x8e3   :  { %v5008_v20 = vpop.eup %5007  ;;  %v2862_v16 = vadd.f32 1.0, %v2858_v40 }
 0x8e4   :  { %v2884_v57 = vmul.f32 %v5008_v20, %v2861_v62  ;;  %vm2890_vm11 = vweird.f32 %v5008_v20  ;;  %v2903_v62 = vmul.f32 %v2872_v25, %v2813_v11 }
 0x8e5   :  { %5009 = vrsqrt.f32 %v2862_v16  ;;  %vm2891_vm9 = vmor %vm2889_vm10, %vm2890_vm11  ;;  %vm2899_vm13 = vweird.f32 %v2862_v16 }
 0x8e6   :  { %v2885_v56 = vmul.f32 %v5008_v20, %v2884_v57  ;;  %v2907_v9 = vpack.c.bf16 %v2903_v62, %v2903_v62  ;;  %vm7614_vm11 = vmmov %vm7612_vm5 }
 0x8e7   :  { %vm7615_vm10 = vmmov %vm7612_vm5 }
 0x8e8   :  { %v2886_v49 = vmul.f32 0.5, %v2885_v56  ;;  %v2818_v58 = vpop.f32.mrf.mxu0 }
 0x8ea   :  { %v2887_v42 = vsub.f32 1.5, %v2886_v49  ;;  %v2852_v30 = vpop.xlane.xlu2 %2851  ;;  %v2913_v49 = vunpack.c.l.b16 %v2907_v9 }
 0x8eb   :  { %v5010_v35 = vpop.eup %5009  ;;  %v2860_v15 = vadd.f32 1.0, %v2852_v30  ;;  %v5046_v30 = vld [vmem:[%s7264_s1] sm:$0xff] }
 0x8ec   :  { %v2894_v45 = vmul.f32 %v5010_v35, %v2862_v16  ;;  %v2888_v22 = vmul.f32 %v5008_v20, %v2887_v42  ;;  %vm2900_vm2 = vweird.f32 %v5010_v35 }
 0x8ed   :  { %5011 = vrsqrt.f32 %v2860_v15  ;;  %vm2901_vm1 = vmor %vm2899_vm13, %vm2900_vm2  ;;  %vm2879_vm7 = vweird.f32 %v2860_v15 }
 0x8ee   :  { %v2895_v5 = vmul.f32 %v5010_v35, %v2894_v45  ;;  %v2892_v38 = vsel %vm2891_vm9, %v5008_v20, %v2888_v22  ;;  %v4956_v22 = vld [vmem:[%s7273_s12] ss:$0 sm:$0xff] }
 0x8ef   :  { %v2905_v59 = vmul.f32 %v2892_v38, %v2818_v58 }
 0x8f0   :  { %v2896_v55 = vmul.f32 0.5, %v2895_v5  ;;  %v2820_v0 = vpop.f32.mrf.mxu0 }
 0x8f1   :  { %v2909_v44 = vpack.c.bf16 %v2905_v59, %v2905_v59 }
 0x8f2   :  { %v2897_v39 = vsub.f32 1.5, %v2896_v55 }
 0x8f3   :  { %v5012_v53 = vpop.eup %5011  ;;  %v2933_v40 = vunpack.c.l.b16 %v2909_v44 }
 0x8f4   :  { %v2874_v7 = vmul.f32 %v5012_v53, %v2860_v15  ;;  %v2898_v4 = vmul.f32 %v5010_v35, %v2897_v39  ;;  %vm2880_vm0 = vweird.f32 %v5012_v53  ;;  %v4955_v15 = vld [vmem:[%s7272_s11] ss:$0 sm:$0xff] }
 0x8f5   :  { %vm2881_vm6 = vmor %vm2879_vm7, %vm2880_vm0 }
 0x8f6   :  { %v2875_v17 = vmul.f32 %v5012_v53, %v2874_v7  ;;  %v2902_v8 = vsel %vm2901_vm1, %v5010_v35, %v2898_v4 }
 0x8f7   :  { %v2906_v32 = vmul.f32 %v2902_v8, %v2820_v0 }
 0x8f8   :  { %v2876_v2 = vmul.f32 0.5, %v2875_v17 }
 0x8f9   :  { %v2910_v21 = vpack.c.bf16 %v2906_v32, %v2906_v32 }
 0x8fa   :  { %v2877_v3 = vsub.f32 1.5, %v2876_v2 }
 0x8fb   :  { %v2934_v20 = vunpack.c.l.b16 %v2910_v21 }
 0x8fc   :  { %v2878_v47 = vmul.f32 %v5012_v53, %v2877_v3 }
 0x8fd   :  { %v2935_v16 = vpack.c.b16 %v2934_v20, %v2933_v40 }
 0x8fe   :  { %v2882_v57 = vsel %vm2881_vm6, %v5012_v53, %v2878_v47 }
 0x8ff   :  { %v2904_v56 = vmul.f32 %v2882_v57, %v2815_v63  ;;  %2944 = vmatpush.bf16.msra.mxu2 %v2935_v16 }
 0x901   :  { %v2908_v34 = vpack.c.bf16 %v2904_v56, %v2904_v56 }
 0x902   :  { %4318 = vmatmul.msk.bf16.vlgmr.msra.gmra.mxu2 %vm7610_vm14, %v5045_v60 }
 0x903   :  { %v2914_v42 = vunpack.c.l.b16 %v2908_v34 }
 0x905   :  { %v2915_v11 = vpack.c.b16 %v2914_v42, %v2913_v49 }
 0x907   :  { %2924 = vmatpush.bf16.msra.mxu1 %v2915_v11 }
 0x90a   :  { %4317 = vmatmul.msk.bf16.vlgmr.msra.gmra.mxu1 %vm7611_vm3, %v5046_v30 }
 0x985   :  { %v2946_v35 = vpop.f32.mrf.mxu2 }
 0x986   :  { %v2947_v63 = vadd.f32 %v2946_v35, %v2905_v59 }
 0x987   :  { %v2926_v31 = vpop.f32.mrf.mxu1 }
 0x988   :  { %v2953_v45 = vmul.f32 %v2947_v63, %v2892_v38  ;;  %v2927_v58 = vadd.f32 %v2926_v31, %v2903_v62 }
 0x98a   :  { %v2951_v5 = vmul.f32 %v2927_v58, %v2872_v25  ;;  %v6651_v37 = vadd.f32 %v4955_v15, %v2953_v45 }
 0x98c   :  { %v2968_v55 = vmul.f32 %v4956_v22, %v6651_v37  ;;  %v6654_v39 = vadd.f32 %v4955_v15, %v2951_v5 }
 0x98d   :  { %v2948_v53 = vpop.f32.mrf.mxu2 }
 0x98e   :  { %v2976_v59 = vsel %vm7612_vm5, %v2968_v55, 0.0  ;;  %v2966_v12 = vmul.f32 %v4956_v22, %v6654_v39  ;;  %v2949_v38 = vadd.f32 %v2948_v53, %v2906_v32 }
 0x98f   :  { %2977 = vadd.xlane.f32.xlu0 %v2976_v59  ;;  %v2928_v7 = vpop.f32.mrf.mxu1 }
 0x990   :  { %v2929_v4 = vadd.f32 %v2928_v7, %v2904_v56  ;;  %v2970_v17 = vsel %vm7613_vm15, %v2966_v12, 0.0  ;;  %v2954_v44 = vmul.f32 %v2949_v38, %v2902_v8  ;;  %vm3059_vm15 = vcmp.gt.f32.partialorder %v6592_v46, 0.5 }
 0x991   :  { %2971 = vadd.xlane.f32.xlu1 %v2970_v17 }
 0x992   :  { %v2952_v0 = vmul.f32 %v2929_v4, %v2882_v57  ;;  %v6662_v21 = vadd.f32 %v4955_v15, %v2954_v44 }
 0x994   :  { %v6659_v25 = vadd.f32 %v4955_v15, %v2952_v0  ;;  %v2969_v62 = vmul.f32 %v4956_v22, %v6662_v21 }
 0x996   :  { %v2967_v2 = vmul.f32 %v4956_v22, %v6659_v25  ;;  %v2979_v40 = vsel %vm7615_vm10, %v2969_v62, 0.0 }
 0x998   :  { %v2973_v3 = vsel %vm7614_vm11, %v2967_v2, 0.0  ;;  %vm3060_vm11 = vcmp.gt.f32.partialorder %v6600_v33, 0.5 }
 0x999   :  { %2974 = vadd.xlane.f32.xlu2 %v2973_v3 }
 0x9a1   :  { %2980 = vadd.xlane.f32.xlu2 %v2979_v40 }
 0xa02   :  { %v2978_v32 = vpop.xlane.xlu0 %2977 }
 0xa03   :  { %v4321_v20 = vmul.f32 -1.442695, %v2978_v32 }
 0xa04   :  { %v2972_v47 = vpop.xlane.xlu1 %2971 }
 0xa05   :  { %5013 = vpow2.f32 %v4321_v20  ;;  %v4319_v16 = vmul.f32 -1.442695, %v2972_v47 }
 0xa07   :  { %5015 = vpow2.f32 %v4319_v16 }
 0xa0b   :  { %v5014_v8 = vpop.eup %5013 }
 0xa0c   :  { %v2996_v57 = vadd.f32 1.0, %v5014_v8  ;;  %v2975_v9 = vpop.xlane.xlu2 %2974 }
 0xa0d   :  { %v5016_v56 = vpop.eup %5015  ;;  %v4320_v34 = vmul.f32 -1.442695, %v2975_v9 }
 0xa0e   :  { %5017 = vrcp.f32 %v2996_v57  ;;  %v2994_v60 = vadd.f32 1.0, %v5016_v56  ;;  %v3039_v2 = vand.u32 2147483648, %v2996_v57  ;;  %vm3033_vm8 = vweird.f32 %v2996_v57 }
 0xa0f   :  { %5019 = vpow2.f32 %v4320_v34  ;;  %v3037_v40 = vand.u32 2147483647, %v2996_v57 }
 0xa10   :  { %5021 = vrcp.f32 %v2994_v60  ;;  %v3007_v22 = vand.u32 2147483647, %v2994_v60  ;;  %v3009_v5 = vand.u32 2147483648, %v2994_v60  ;;  %vm3003_vm2 = vweird.f32 %v2994_v60 }
 0xa11   :  { %v3040_v9 = vor.u32 1.1754944e-38, %v3039_v2  ;;  %vm3038_vm14 = vcmp.eq.f32.partialorder %v3037_v40, 8.507059e+37 }
 0xa12   :  { %vm3008_vm13 = vcmp.eq.f32.partialorder %v3007_v22, 8.507059e+37  ;;  %v3010_v4 = vor.u32 1.1754944e-38, %v3009_v5 }
 0xa14   :  { %v5018_v49 = vpop.eup %5017  ;;  %v2981_v42 = vpop.xlane.xlu2 %2980 }
 0xa15   :  { %v5020_v11 = vpop.eup %5019  ;;  %v3029_v30 = vmul.f32 %v5018_v49, %v2996_v57  ;;  %v4322_v35 = vmul.f32 -1.442695, %v2981_v42  ;;  %vm3034_vm1 = vweird.f32 %v5018_v49 }
 0xa16   :  { %v2995_v63 = vadd.f32 1.0, %v5020_v11  ;;  %v5022_v15 = vpop.eup %5021  ;;  %vm3035_vm0 = vmor %vm3033_vm8, %vm3034_vm1 }
 0xa17   :  { %5023 = vpow2.f32 %v4322_v35  ;;  %v3030_v31 = vsub.f32 1.0, %v3029_v30  ;;  %v2999_v45 = vmul.f32 %v5022_v15, %v2994_v60  ;;  %vm3004_vm9 = vweird.f32 %v5022_v15 }
 0xa18   :  { %5025 = vrcp.f32 %v2995_v63  ;;  %vm3005_vm4 = vmor %vm3003_vm2, %vm3004_vm9  ;;  %v3024_v20 = vand.u32 2147483648, %v2995_v63  ;;  %v3022_v16 = vand.u32 2147483647, %v2995_v63  ;;  %vm3018_vm6 = vweird.f32 %v2995_v63 }
 0xa19   :  { %v3000_v58 = vsub.f32 1.0, %v2999_v45  ;;  %v3031_v55 = vmul.f32 %v5018_v49, %v3030_v31 }
 0xa1a   :  { %v3025_v34 = vor.u32 1.1754944e-38, %v3024_v20  ;;  %vm3023_vm5 = vcmp.eq.f32.partialorder %v3022_v16, 8.507059e+37 }
 0xa1b   :  { %v3001_v53 = vmul.f32 %v5022_v15, %v3000_v58  ;;  %v3032_v0 = vadd.f32 %v5018_v49, %v3031_v55 }
 0xa1d   :  { %v5024_v59 = vpop.eup %5023  ;;  %v3002_v7 = vadd.f32 %v5022_v15, %v3001_v53  ;;  %v3036_v8 = vsel %vm3035_vm0, %v5018_v49, %v3032_v0 }
 0xa1e   :  { %v5026_v12 = vpop.eup %5025  ;;  %v2997_v38 = vadd.f32 1.0, %v5024_v59  ;;  %v6674_v60 = vsel %vm3038_vm14, %v3040_v9, %v3036_v8  ;;  %vm7617_vm14 = vcmp.ne.s32.totalorder %v5409_v27, 0 }
 0xa1f   :  { %v3014_v17 = vmul.f32 %v5026_v12, %v2995_v63  ;;  %v3006_v44 = vsel %vm3005_vm4, %v5022_v15, %v3002_v7  ;;  %vm3019_vm7 = vweird.f32 %v5026_v12  ;;  %v6684_v35 = vsel %vm3060_vm11, %v6674_v60, -1.0 }
 0xa20   :  { %5027 = vrcp.f32 %v2997_v38  ;;  %v6668_v3 = vsel %vm3008_vm13, %v3010_v4, %v3006_v44  ;;  %vm3020_vm3 = vmor %vm3018_vm6, %vm3019_vm7  ;;  %v3054_v63 = vand.u32 2147483648, %v2997_v38  ;;  %v3052_v31 = vand.u32 2147483647, %v2997_v38 }
 0xa21   :  { %v3015_v62 = vsub.f32 1.0, %v3014_v17  ;;  %v6671_v32 = vsel %vm3058_vm12, %v6668_v3, -1.0  ;;  %vm3048_vm9 = vweird.f32 %v2997_v38  ;;  %vm3061_vm13 = vcmp.gt.f32.partialorder %v6603_v41, 0.5 }
 0xa22   :  { %3068 = vperm.xlu2 %4775, %v6671_v32   ;;  %v3055_v45 = vor.u32 1.1754944e-38, %v3054_v63  ;;  %vm3053_vm4 = vcmp.eq.f32.partialorder %v3052_v31, 8.507059e+37  ;;  %vm7616_vm7 = vcmp.ne.s32.totalorder %v5398_v19, 0 }
 0xa23   :  { %v3016_v47 = vmul.f32 %v5026_v12, %v3015_v62 }
 0xa25   :  { %v3017_v56 = vadd.f32 %v5026_v12, %v3016_v47 }
 0xa26   :  { %v5028_v28 = vpop.eup %5027 }
 0xa27   :  { %v3021_v57 = vsel %vm3020_vm3, %v5026_v12, %v3017_v56  ;;  %v3044_v42 = vmul.f32 %v5028_v28, %v2997_v38  ;;  %vm3049_vm10 = vweird.f32 %v5028_v28 }
 0xa28   :  { %v6677_v11 = vsel %vm3023_vm5, %v3025_v34, %v3021_v57  ;;  %vm3050_vm2 = vmor %vm3048_vm9, %vm3049_vm10 }
 0xa29   :  { %v6681_v49 = vsel %vm3059_vm15, %v6677_v11, -1.0  ;;  %v3045_v30 = vsub.f32 1.0, %v3044_v42 }
 0xa2a   :  { %3072 = vperm.xlu1 %4769, %v6681_v49   ;;  %3076 = vperm.xlu2 %4775, %v6684_v35  }
 0xa2b   :  { %v3046_v15 = vmul.f32 %v5028_v28, %v3045_v30 }
 0xa2d   :  { %v3047_v46 = vadd.f32 %v5028_v28, %v3046_v15 }
 0xa2f   :  { %v3051_v33 = vsel %vm3050_vm2, %v5028_v28, %v3047_v46 }
 0xa30   :  { %v6689_v58 = vsel %vm3053_vm4, %v3055_v45, %v3051_v33  ;;  %vm7618_vm4 = vcmp.ne.s32.totalorder %v5384_v61, 0 }
 0xa31   :  { %v6692_v22 = vsel %vm3061_vm13, %v6689_v58, -1.0 }
 0xa32   :  { %3080 = vperm.xlu2 %4775, %v6692_v22  }
 0xa7c   :  { %v6695_v5 = vpop.permute.xlu2 %3068 }
 0xa7d   :  { %v3084_v55 = vperm.slane %v6695_v5, 2  ;;  %v3083_v53 = vperm.slane %v6695_v5, 1  ;;  %v3082_v41 = vperm.slane %v6695_v5, 0  ;;  %v3086_v38 = vperm.slane %v6695_v5, 4 }
 0xa7e   :  { %v3085_v44 = vperm.slane %v6695_v5, 3  ;;  %v3087_v20 = vperm.slane %v6695_v5, 5  ;;  %v3089_v9 = vperm.slane %v6695_v5, 7  ;;  %v3088_v57 = vperm.slane %v6695_v5, 6 }
 0xa7f   :  { %vm3150_vm1 = vcmp.gt.f32.partialorder %v6671_v32, %v3084_v55  ;;  %vm3214_vm12 = vcmp.eq.f32.partialorder %v6671_v32, %v3084_v55  ;;  %vm3215_vm8 = vcmp.eq.f32.partialorder %v6681_v49, %v3084_v55  ;;  %vm3151_vm0 = vcmp.gt.f32.partialorder %v6681_v49, %v3084_v55 }
 0xa80   :  { %vm3278_vm6 = vmand %vm3214_vm12, %vm7616_vm7  ;;  %vm3212_vm5 = vcmp.eq.f32.partialorder %v6671_v32, %v3083_v53  ;;  %vm3213_vm11 = vcmp.eq.f32.partialorder %v6681_v49, %v3083_v53  ;;  %vm3148_vm9 = vcmp.gt.f32.partialorder %v6671_v32, %v3083_v53  ;;  %vm3149_vm2 = vcmp.gt.f32.partialorder %v6681_v49, %v3083_v53 }
 0xa81   :  { %vm3279_vm3 = vmand %vm3215_vm8, %vm7617_vm14  ;;  %vm7619_vm12 = vcmp.ne.s32.totalorder %v5312_v43, 0  ;;  %vm3211_vm7 = vcmp.eq.f32.partialorder %v6681_v49, %v3082_v41  ;;  %vm3146_vm14 = vcmp.gt.f32.partialorder %v6671_v32, %v3082_v41 }
 0xa82   :  { %vm3342_vm15 = vmor %vm3150_vm1, %vm3278_vm6  ;;  %vm3210_vm1 = vcmp.eq.f32.partialorder %v6671_v32, %v3082_v41 }
 0xa83   :  { %vm3343_vm10 = vmor %vm3151_vm0, %vm3279_vm3  ;;  %v4327_v59 = vsel %vm3342_vm15, 1.0, %v7451_v36  ;;  %vm3147_vm3 = vcmp.gt.f32.partialorder %v6681_v49, %v3082_v41 }
 0xa84   :  { %v4328_v12 = vsel %vm3343_vm10, 1.0, %v7451_v36  ;;  %vm3276_vm13 = vmand %vm3212_vm5, %vm7618_vm4  ;;  %vm7620_vm5 = vcmp.ne.s32.totalorder %v5430_v50, 0  ;;  %vm3219_vm4 = vcmp.eq.f32.partialorder %v6681_v49, %v3086_v38 }
 0xa85   :  { %v4786_v7 = vpack.i.bf16 %v4328_v12, %v4327_v59  ;;  %vm3277_vm8 = vmand %vm3213_vm11, %vm7619_vm12  ;;  %vm7621_vm11 = vcmp.ne.s32.totalorder %v5300_v29, 0  ;;  %vm3154_vm12 = vcmp.gt.f32.partialorder %v6671_v32, %v3086_v38  ;;  %v7633_v59 = vld [vmem:[#allocation6_spill] sm:$0xff] }
 0xa86   :  { %vm3340_vm0 = vmor %vm3148_vm9, %vm3276_vm13  ;;  %vm3218_vm9 = vcmp.eq.f32.partialorder %v6671_v32, %v3086_v38 }
 0xa87   :  { %4787 = vperm.xlu1 %4769, %v4786_v7   ;;  %vm3341_vm6 = vmor %vm3149_vm2, %vm3277_vm8  ;;  %v4325_v4 = vsel %vm3340_vm0, 1.0, %v7451_v36  ;;  %vm3155_vm8 = vcmp.gt.f32.partialorder %v6681_v49, %v3086_v38 }
 0xa88   :  { %v4326_v17 = vsel %vm3341_vm6, 1.0, %v7451_v36  ;;  %vm3274_vm15 = vmand %vm3210_vm1, %vm7620_vm5  ;;  %vm7622_vm1 = vcmp.ne.s32.totalorder %v5327_v24, 0  ;;  %vm3217_vm5 = vcmp.eq.f32.partialorder %v6681_v49, %v3085_v44 }
 0xa89   :  { %v4781_v0 = vpack.i.bf16 %v4326_v17, %v4325_v4  ;;  %vm3275_vm10 = vmand %vm3211_vm7, %vm7621_vm11  ;;  %vm7623_vm7 = vcmp.ne.s32.totalorder %v5403_v26, 0  ;;  %vm3152_vm11 = vcmp.gt.f32.partialorder %v6671_v32, %v3085_v44  ;;  %v7635_v4 = vld [vmem:[#allocation5_spill] sm:$0xff] }
 0xa8a   :  { %vm3338_vm2 = vmor %vm3146_vm14, %vm3274_vm15  ;;  %vm3216_vm14 = vcmp.eq.f32.partialorder %v6671_v32, %v3085_v44 }
 0xa8b   :  { %4782 = vperm.xlu2 %4775, %v4781_v0   ;;  %vm3339_vm13 = vmor %vm3147_vm3, %vm3275_vm10  ;;  %v4323_v2 = vsel %vm3338_vm2, 1.0, %v7451_v36  ;;  %vm3153_vm10 = vcmp.gt.f32.partialorder %v6681_v49, %v3085_v44  ;;  %v7637_v0 = vld [vmem:[#allocation15_spill] sm:$0xff] }
 0xa8c   :  { %v4324_v62 = vsel %vm3339_vm13, 1.0, %v7451_v36  ;;  %vm3282_vm0 = vmand %vm3218_vm9, %vm7622_vm1  ;;  %vm7624_vm9 = vcmp.ne.s32.totalorder %v5320_v48, 0  ;;  %vm3221_vm1 = vcmp.eq.f32.partialorder %v6681_v49, %v3087_v20 }
 0xa8d   :  { %v4776_v40 = vpack.i.bf16 %v4324_v62, %v4323_v2  ;;  %vm3283_vm6 = vmand %vm3219_vm4, %vm7623_vm7  ;;  %vm7625_vm4 = vcmp.ne.s32.totalorder %v5401_v23, 0  ;;  %vm3156_vm7 = vcmp.gt.f32.partialorder %v6671_v32, %v3087_v20 }
 0xa8e   :  { %vm3346_vm3 = vmor %vm3154_vm12, %vm3282_vm0  ;;  %vm3220_vm12 = vcmp.eq.f32.partialorder %v6671_v32, %v3087_v20 }
 0xa8f   :  { %4777 = vperm.xlu0 %4763, %v4776_v40   ;;  %vm3347_vm15 = vmor %vm3155_vm8, %vm3283_vm6  ;;  %v4331_v47 = vsel %vm3346_vm3, 1.0, %v7451_v36  ;;  %vm3157_vm6 = vcmp.gt.f32.partialorder %v6681_v49, %v3087_v20  ;;  %v7639_v40 = vld [vmem:[#allocation4_spill] sm:$0xff] }
 0xa90   :  { %v4332_v16 = vsel %vm3347_vm15, 1.0, %v7451_v36  ;;  %vm3280_vm2 = vmand %vm3216_vm14, %vm7624_vm9  ;;  %vm7626_vm14 = vcmp.ne.s32.totalorder %v5467_v6, 0  ;;  %vm3225_vm9 = vcmp.eq.f32.partialorder %v6681_v49, %v3089_v9 }
 0xa91   :  { %v4796_v8 = vpack.i.bf16 %v4332_v16, %v4331_v47  ;;  %vm3281_vm13 = vmand %vm3217_vm5, %vm7625_vm4  ;;  %vm7627_vm5 = vcmp.ne.s32.totalorder %v5331_v52, 0  ;;  %vm3160_vm4 = vcmp.gt.f32.partialorder %v6671_v32, %v3089_v9  ;;  %v7641_v47 = vld [vmem:[#allocation13_spill] sm:$0xff] }
 0xa92   :  { %vm3344_vm8 = vmor %vm3152_vm11, %vm3280_vm2  ;;  %vm3224_vm11 = vcmp.eq.f32.partialorder %v6671_v32, %v3089_v9 }
 0xa93   :  { %4797 = vperm.xlu1 %4769, %v4796_v8   ;;  %vm3345_vm0 = vmor %vm3153_vm10, %vm3281_vm13  ;;  %v4329_v56 = vsel %vm3344_vm8, 1.0, %v7451_v36  ;;  %vm3161_vm13 = vcmp.gt.f32.partialorder %v6681_v49, %v3089_v9 }
 0xa94   :  { %v4330_v28 = vsel %vm3345_vm0, 1.0, %v7451_v36  ;;  %vm3284_vm3 = vmand %vm3220_vm12, %vm7626_vm14  ;;  %vm7628_vm12 = vcmp.ne.s32.totalorder %v7478_v54, 0 }
 0xa95   :  { %v4791_v34 = vpack.i.bf16 %v4330_v28, %v4329_v56  ;;  %vm3285_vm15 = vmand %vm3221_vm1, %vm7627_vm5  ;;  %vm7629_vm1 = vcmp.ne.s32.totalorder %v7480_v10, 0  ;;  %vm3158_vm5 = vcmp.gt.f32.partialorder %v6671_v32, %v3088_v57  ;;  %v7643_v56 = vld [vmem:[#allocation8_spill] sm:$0xff] }
 0xa96   :  { %vm3348_vm10 = vmor %vm3156_vm7, %vm3284_vm3  ;;  %vm3222_vm7 = vcmp.eq.f32.partialorder %v6671_v32, %v3088_v57 }
 0xa97   :  { %4792 = vperm.xlu2 %4775, %v4791_v34   ;;  %vm3349_vm2 = vmor %vm3157_vm6, %vm3285_vm15  ;;  %v4333_v42 = vsel %vm3348_vm10, 1.0, %v7451_v36  ;;  %vm3223_vm6 = vcmp.eq.f32.partialorder %v6681_v49, %v3088_v57  ;;  %vm3159_vm15 = vcmp.gt.f32.partialorder %v6681_v49, %v3088_v57  ;;  %v7645_v34 = vld [vmem:[#allocation19_spill] sm:$0xff] }
 0xa98   :  { %v4334_v30 = vsel %vm3349_vm2, 1.0, %v7451_v36  ;;  %vm3288_vm8 = vmand %vm3224_vm11, %vm7628_vm12  ;;  %vm7630_vm11 = vcmp.ne.s32.totalorder %v7482_v51, 0 }
 0xa99   :  { %v4801_v63 = vpack.i.bf16 %v4334_v30, %v4333_v42  ;;  %vm3289_vm0 = vmand %vm3225_vm9, %vm7629_vm1  ;;  %vm7631_vm9 = vcmp.ne.s32.totalorder %v7484_v1, 0  ;;  %v6832_v42 = vpop.permute.xlu2 %3076 }
 0xa9a   :  { %vm3352_vm14 = vmor %vm3160_vm4, %vm3288_vm8 }
 0xa9b   :  { %4802 = vperm.xlu0 %4763, %v4801_v63   ;;  %vm3353_vm3 = vmor %vm3161_vm13, %vm3289_vm0  ;;  %v4337_v15 = vsel %vm3352_vm14, 1.0, %v7451_v36 }
 0xa9c   :  { %v6777_v31 = vpop.permute.xlu1 %3072  ;;  %v4338_v46 = vsel %vm3353_vm3, 1.0, %v7451_v36  ;;  %vm3286_vm10 = vmand %vm3222_vm7, %vm7630_vm11  ;;  %vm7632_vm7 = vcmp.ne.s32.totalorder %v7490_v18, 0 }
 0xa9d   :  { %v3092_v45 = vperm.slane %v6777_v31, 2  ;;  %v4811_v33 = vpack.i.bf16 %v4338_v46, %v4337_v15  ;;  %vm3287_vm2 = vmand %vm3223_vm6, %vm7631_vm9  ;;  %v3091_v5 = vperm.slane %v6777_v31, 1  ;;  %vm7634_vm6 = vcmp.ne.s32.totalorder %v7633_v59, 0  ;;  %v7647_v15 = vld [vmem:[#allocation18_spill] sm:$0xff] }
 0xa9e   :  { %vm3350_vm4 = vmor %vm3158_vm5, %vm3286_vm10  ;;  %v3090_v12 = vperm.slane %v6777_v31, 0  ;;  %v3095_v44 = vperm.slane %v6777_v31, 5  ;;  %v3094_v16 = vperm.slane %v6777_v31, 4  ;;  %v3093_v57 = vperm.slane %v6777_v31, 3 }
 0xa9f   :  { %vm3230_vm13 = vcmp.eq.f32.partialorder %v6671_v32, %v3092_v45  ;;  %vm3231_vm12 = vcmp.eq.f32.partialorder %v6681_v49, %v3092_v45  ;;  %4812 = vperm.xlu1 %4769, %v4811_v33   ;;  %vm3351_vm8 = vmor %vm3159_vm15, %vm3287_vm2  ;;  %v4335_v55 = vsel %vm3350_vm4, 1.0, %v7451_v36  ;;  %vm3166_vm1 = vcmp.gt.f32.partialorder %v6671_v32, %v3092_v45 }
 0xaa0   :  { %v4336_v53 = vsel %vm3351_vm8, 1.0, %v7451_v36  ;;  %vm3167_vm0 = vcmp.gt.f32.partialorder %v6681_v49, %v3092_v45  ;;  %vm3294_vm14 = vmand %vm3230_vm13, %vm7632_vm7  ;;  %vm3228_vm5 = vcmp.eq.f32.partialorder %v6671_v32, %v3091_v5  ;;  %vm3229_vm11 = vcmp.eq.f32.partialorder %v6681_v49, %v3091_v5  ;;  %v7649_v45 = vld [vmem:[#allocation16_spill] sm:$0xff] }
 0xaa1   :  { %v4806_v41 = vpack.i.bf16 %v4336_v53, %v4335_v55  ;;  %vm3295_vm3 = vmand %vm3231_vm12, %vm7634_vm6  ;;  %vm3164_vm9 = vcmp.gt.f32.partialorder %v6671_v32, %v3091_v5  ;;  %vm3165_vm2 = vcmp.gt.f32.partialorder %v6681_v49, %v3091_v5  ;;  %vm7636_vm4 = vcmp.ne.s32.totalorder %v7635_v4, 0  ;;  %v7651_v53 = vld [vmem:[#allocation17_spill] sm:$0xff] }
 0xaa2   :  { %vm3358_vm15 = vmor %vm3166_vm1, %vm3294_vm14  ;;  %vm7638_vm12 = vcmp.ne.s32.totalorder %v7637_v0, 0  ;;  %vm3226_vm1 = vcmp.eq.f32.partialorder %v6671_v32, %v3090_v12  ;;  %vm3227_vm7 = vcmp.eq.f32.partialorder %v6681_v49, %v3090_v12  ;;  %vm3162_vm6 = vcmp.gt.f32.partialorder %v6671_v32, %v3090_v12 }
 0xaa3   :  { %4807 = vperm.xlu2 %4775, %v4806_v41   ;;  %vm3359_vm10 = vmor %vm3167_vm0, %vm3295_vm3  ;;  %v4343_v7 = vsel %vm3358_vm15, 1.0, %v7451_v36  ;;  %vm3163_vm3 = vcmp.gt.f32.partialorder %v6681_v49, %v3090_v12  ;;  %v3099_v33 = vperm.slane %v6832_v42, 1  ;;  %v7653_v12 = vld [vmem:[#allocation7_spill] sm:$0xff] }
 0xaa4   :  { %v4344_v38 = vsel %vm3359_vm10, 1.0, %v7451_v36  ;;  %vm3292_vm13 = vmand %vm3228_vm5, %vm7636_vm4  ;;  %vm7640_vm5 = vcmp.ne.s32.totalorder %v7639_v40, 0  ;;  %vm3237_vm4 = vcmp.eq.f32.partialorder %v6681_v49, %v3095_v44 }
 0xaa5   :  { %v4826_v17 = vpack.i.bf16 %v4344_v38, %v4343_v7  ;;  %vm3293_vm8 = vmand %vm3229_vm11, %vm7638_vm12  ;;  %vm7642_vm11 = vcmp.ne.s32.totalorder %v7641_v47, 0  ;;  %vm3172_vm12 = vcmp.gt.f32.partialorder %v6671_v32, %v3095_v44  ;;  %v3098_v7 = vperm.slane %v6832_v42, 0 }
 0xaa6   :  { %vm3356_vm0 = vmor %vm3164_vm9, %vm3292_vm13  ;;  %vm3236_vm9 = vcmp.eq.f32.partialorder %v6671_v32, %v3095_v44 }
 0xaa7   :  { %4827 = vperm.xlu1 %4769, %v4826_v17   ;;  %vm3357_vm14 = vmor %vm3165_vm2, %vm3293_vm8  ;;  %v4341_v2 = vsel %vm3356_vm0, 1.0, %v7451_v36  ;;  %vm3173_vm8 = vcmp.gt.f32.partialorder %v6681_v49, %v3095_v44 }
 0xaa8   :  { %v4342_v62 = vsel %vm3357_vm14, 1.0, %v7451_v36  ;;  %vm3290_vm15 = vmand %vm3226_vm1, %vm7640_vm5  ;;  %vm7644_vm1 = vcmp.ne.s32.totalorder %v7643_v56, 0  ;;  %vm3235_vm5 = vcmp.eq.f32.partialorder %v6681_v49, %v3094_v16 }
 0xaa9   :  { %v4821_v20 = vpack.i.bf16 %v4342_v62, %v4341_v2  ;;  %vm3291_vm10 = vmand %vm3227_vm7, %vm7642_vm11  ;;  %vm7646_vm7 = vcmp.ne.s32.totalorder %v7645_v34, 0  ;;  %vm3170_vm11 = vcmp.gt.f32.partialorder %v6671_v32, %v3094_v16  ;;  %v3096_v2 = vperm.slane %v6777_v31, 6 }
 0xaaa   :  { %vm3354_vm2 = vmor %vm3162_vm6, %vm3290_vm15  ;;  %vm3234_vm6 = vcmp.eq.f32.partialorder %v6671_v32, %v3094_v16 }
 0xaab   :  { %4822 = vperm.xlu2 %4775, %v4821_v20   ;;  %vm3355_vm13 = vmor %vm3163_vm3, %vm3291_vm10  ;;  %v4339_v8 = vsel %vm3354_vm2, 1.0, %v7451_v36  ;;  %vm3171_vm10 = vcmp.gt.f32.partialorder %v6681_v49, %v3094_v16  ;;  %v3100_v20 = vperm.slane %v6832_v42, 2 }
 0xaac   :  { %v4340_v9 = vsel %vm3355_vm13, 1.0, %v7451_v36  ;;  %vm3300_vm0 = vmand %vm3236_vm9, %vm7644_vm1  ;;  %vm7648_vm9 = vcmp.ne.s32.totalorder %v7647_v15, 0  ;;  %vm3233_vm1 = vcmp.eq.f32.partialorder %v6681_v49, %v3093_v57 }
 0xaad   :  { %v4816_v28 = vpack.i.bf16 %v4340_v9, %v4339_v8  ;;  %vm3301_vm14 = vmand %vm3237_vm4, %vm7646_vm7  ;;  %vm7650_vm4 = vcmp.ne.s32.totalorder %v7649_v45, 0  ;;  %vm3168_vm7 = vcmp.gt.f32.partialorder %v6671_v32, %v3093_v57  ;;  %v7659_v8 = vld [vmem:[#allocation9_spill] sm:$0xff] }
 0xaae   :  { %vm3364_vm3 = vmor %vm3172_vm12, %vm3300_vm0  ;;  %vm3232_vm12 = vcmp.eq.f32.partialorder %v6671_v32, %v3093_v57  ;;  %v7661_v9 = vld [vmem:[#allocation21_spill] sm:$0xff] }
 0xaaf   :  { %4817 = vperm.xlu0 %4763, %v4816_v28   ;;  %vm3365_vm15 = vmor %vm3173_vm8, %vm3301_vm14  ;;  %v4349_v30 = vsel %vm3364_vm3, 1.0, %v7451_v36  ;;  %vm3169_vm14 = vcmp.gt.f32.partialorder %v6681_v49, %v3093_v57  ;;  %v3101_v28 = vperm.slane %v6832_v42, 3 }
 0xab0   :  { %v4350_v63 = vsel %vm3365_vm15, 1.0, %v7451_v36  ;;  %vm3298_vm2 = vmand %vm3234_vm6, %vm7648_vm9  ;;  %vm7652_vm6 = vcmp.ne.s32.totalorder %v7651_v53, 0  ;;  %vm3245_vm9 = vcmp.eq.f32.partialorder %v6692_v22, %v3099_v33 }
 0xab1   :  { %v4841_v46 = vpack.i.bf16 %v4350_v63, %v4349_v30  ;;  %vm3299_vm13 = vmand %vm3235_vm5, %vm7650_vm4  ;;  %vm7654_vm5 = vcmp.ne.s32.totalorder %v7653_v12, 0  ;;  %vm3180_vm4 = vcmp.gt.f32.partialorder %v6684_v35, %v3099_v33 }
 0xab2   :  { %vm3362_vm8 = vmor %vm3170_vm11, %vm3298_vm2  ;;  %vm3244_vm11 = vcmp.eq.f32.partialorder %v6684_v35, %v3099_v33 }
 0xab3   :  { %4842 = vperm.xlu1 %4769, %v4841_v46   ;;  %vm3363_vm0 = vmor %vm3171_vm10, %vm3299_vm13  ;;  %v4347_v5 = vsel %vm3362_vm8, 1.0, %v7451_v36  ;;  %vm3181_vm13 = vcmp.gt.f32.partialorder %v6692_v22, %v3099_v33  ;;  %v3097_v46 = vperm.slane %v6777_v31, 7  ;;  %v3103_v31 = vperm.slane %v6832_v42, 5 }
 0xab4   :  { %v4348_v55 = vsel %vm3363_vm0, 1.0, %v7451_v36  ;;  %vm3296_vm3 = vmand %vm3232_vm12, %vm7652_vm6  ;;  %vm7655_vm12 = vcmp.ne.s32.totalorder %v5384_v61, 0  ;;  %vm3243_vm6 = vcmp.eq.f32.partialorder %v6692_v22, %v3098_v7 }
 0xab5   :  { %v4836_v41 = vpack.i.bf16 %v4348_v55, %v4347_v5  ;;  %vm3297_vm15 = vmand %vm3233_vm1, %vm7654_vm5  ;;  %vm7656_vm1 = vcmp.ne.s32.totalorder %v5312_v43, 0  ;;  %vm3178_vm5 = vcmp.gt.f32.partialorder %v6684_v35, %v3098_v7  ;;  %v7667_v55 = vld [vmem:[#allocation22_spill] sm:$0xff] }
 0xab6   :  { %vm3360_vm10 = vmor %vm3168_vm7, %vm3296_vm3  ;;  %vm3242_vm7 = vcmp.eq.f32.partialorder %v6684_v35, %v3098_v7 }
 0xab7   :  { %4837 = vperm.xlu2 %4775, %v4836_v41   ;;  %vm3361_vm2 = vmor %vm3169_vm14, %vm3297_vm15  ;;  %v4345_v38 = vsel %vm3360_vm10, 1.0, %v7451_v36  ;;  %vm3179_vm15 = vcmp.gt.f32.partialorder %v6692_v22, %v3098_v7  ;;  %v7669_v41 = vld [vmem:[#allocation10_spill] sm:$0xff]  ;;  %v3104_v7 = vperm.slane %v6832_v42, 6 }
 0xab8   :  { %v4346_v17 = vsel %vm3361_vm2, 1.0, %v7451_v36  ;;  %vm3308_vm8 = vmand %vm3244_vm11, %vm7655_vm12  ;;  %vm7657_vm11 = vcmp.ne.s32.totalorder %v5430_v50, 0  ;;  %vm3239_vm12 = vcmp.eq.f32.partialorder %v6681_v49, %v3096_v2 }
 0xab9   :  { %v4831_v44 = vpack.i.bf16 %v4346_v17, %v4345_v38  ;;  %vm3309_vm0 = vmand %vm3245_vm9, %vm7656_vm1  ;;  %vm7658_vm9 = vcmp.ne.s32.totalorder %v5300_v29, 0  ;;  %vm3174_vm1 = vcmp.gt.f32.partialorder %v6671_v32, %v3096_v2  ;;  %v3102_v17 = vperm.slane %v6832_v42, 4 }
 0xaba   :  { %vm3372_vm14 = vmor %vm3180_vm4, %vm3308_vm8  ;;  %vm3238_vm4 = vcmp.eq.f32.partialorder %v6671_v32, %v3096_v2 }
 0xabb   :  { %4832 = vperm.xlu0 %4763, %v4831_v44   ;;  %vm3373_vm3 = vmor %vm3181_vm13, %vm3309_vm0  ;;  %v4357_v62 = vsel %vm3372_vm14, 1.0, %v7451_v36  ;;  %vm3175_vm0 = vcmp.gt.f32.partialorder %v6681_v49, %v3096_v2  ;;  %v6933_v44 = vpop.permute.xlu2 %3080 }
 0xabc   :  { %v4358_v61 = vsel %vm3373_vm3, 1.0, %v7451_v36  ;;  %vm3306_vm10 = vmand %vm3242_vm7, %vm7657_vm11  ;;  %vm7660_vm7 = vcmp.ne.s32.totalorder %v7659_v8, 0  ;;  %vm3247_vm11 = vcmp.eq.f32.partialorder %v6692_v22, %v3100_v20 }
 0xabd   :  { %v4861_v43 = vpack.i.bf16 %v4358_v61, %v4357_v62  ;;  %vm3307_vm2 = vmand %vm3243_vm6, %vm7658_vm9  ;;  %vm7662_vm6 = vcmp.ne.s32.totalorder %v7661_v9, 0  ;;  %vm3182_vm9 = vcmp.gt.f32.partialorder %v6684_v35, %v3100_v20  ;;  %v3109_v62 = vperm.slane %v6933_v44, 3 }
 0xabe   :  { %vm3370_vm13 = vmor %vm3178_vm5, %vm3306_vm10  ;;  %vm3246_vm5 = vcmp.eq.f32.partialorder %v6684_v35, %v3100_v20 }
 0xabf   :  { %4862 = vperm.xlu1 %4769, %v4861_v43   ;;  %vm3371_vm8 = vmor %vm3179_vm15, %vm3307_vm2  ;;  %v4355_v16 = vsel %vm3370_vm13, 1.0, %v7451_v36  ;;  %vm3183_vm2 = vcmp.gt.f32.partialorder %v6692_v22, %v3100_v20  ;;  %v3107_v43 = vperm.slane %v6933_v44, 1 }
 0xac0   :  { %v4356_v50 = vsel %vm3371_vm8, 1.0, %v7451_v36  ;;  %vm3302_vm14 = vmand %vm3238_vm4, %vm7660_vm7  ;;  %vm7663_vm4 = vcmp.ne.s32.totalorder %v5398_v19, 0  ;;  %vm3249_vm7 = vcmp.eq.f32.partialorder %v6692_v22, %v3101_v28 }
 0xac1   :  { %v4856_v29 = vpack.i.bf16 %v4356_v50, %v4355_v16  ;;  %vm3303_vm3 = vmand %vm3239_vm12, %vm7662_vm6  ;;  %vm7664_vm12 = vcmp.ne.s32.totalorder %v5409_v27, 0  ;;  %vm3184_vm6 = vcmp.gt.f32.partialorder %v6684_v35, %v3101_v28  ;;  %v3106_v16 = vperm.slane %v6933_v44, 0 }
 0xac2   :  { %vm3366_vm15 = vmor %vm3174_vm1, %vm3302_vm14  ;;  %vm3248_vm1 = vcmp.eq.f32.partialorder %v6684_v35, %v3101_v28 }
 0xac3   :  { %4857 = vperm.xlu2 %4775, %v4856_v29   ;;  %vm3367_vm10 = vmor %vm3175_vm0, %vm3303_vm3  ;;  %v4351_v57 = vsel %vm3366_vm15, 1.0, %v7451_v36  ;;  %vm3185_vm3 = vcmp.gt.f32.partialorder %v6692_v22, %v3101_v28  ;;  %v3112_v29 = vperm.slane %v6933_v44, 6 }
 0xac4   :  { %v4352_v30 = vsel %vm3367_vm10, 1.0, %v7451_v36  ;;  %vm3310_vm13 = vmand %vm3246_vm5, %vm7663_vm4  ;;  %vm7665_vm5 = vcmp.ne.s32.totalorder %v5320_v48, 0  ;;  %vm3241_vm4 = vcmp.eq.f32.partialorder %v6681_v49, %v3097_v46 }
 0xac5   :  { %v4846_v63 = vpack.i.bf16 %v4352_v30, %v4351_v57  ;;  %vm3311_vm8 = vmand %vm3247_vm11, %vm7664_vm12  ;;  %vm7666_vm11 = vcmp.ne.s32.totalorder %v5401_v23, 0  ;;  %vm3176_vm12 = vcmp.gt.f32.partialorder %v6671_v32, %v3097_v46  ;;  %v3110_v57 = vperm.slane %v6933_v44, 4 }
 0xac6   :  { %vm3374_vm0 = vmor %vm3182_vm9, %vm3310_vm13  ;;  %vm3240_vm9 = vcmp.eq.f32.partialorder %v6671_v32, %v3097_v46 }
 0xac7   :  { %4847 = vperm.xlu0 %4763, %v4846_v63   ;;  %vm3375_vm14 = vmor %vm3183_vm2, %vm3311_vm8  ;;  %v4359_v33 = vsel %vm3374_vm0, 1.0, %v7451_v36  ;;  %vm3177_vm8 = vcmp.gt.f32.partialorder %v6681_v49, %v3097_v46  ;;  %v3108_v63 = vperm.slane %v6933_v44, 2 }
 0xac8   :  { %v4360_v19 = vsel %vm3375_vm14, 1.0, %v7451_v36  ;;  %vm3312_vm15 = vmand %vm3248_vm1, %vm7665_vm5  ;;  %vm7668_vm1 = vcmp.ne.s32.totalorder %v7667_v55, 0  ;;  %vm3253_vm5 = vcmp.eq.f32.partialorder %v6692_v22, %v3103_v31 }
 0xac9   :  { %v4866_v27 = vpack.i.bf16 %v4360_v19, %v4359_v33  ;;  %vm3313_vm10 = vmand %vm3249_vm7, %vm7666_vm11  ;;  %vm7670_vm7 = vcmp.ne.s32.totalorder %v7669_v41, 0  ;;  %vm3188_vm11 = vcmp.gt.f32.partialorder %v6684_v35, %v3103_v31  ;;  %v3113_v33 = vperm.slane %v6933_v44, 7 }
 0xaca   :  { %vm3376_vm2 = vmor %vm3184_vm6, %vm3312_vm15  ;;  %vm3252_vm6 = vcmp.eq.f32.partialorder %v6684_v35, %v3103_v31 }
 0xacb   :  { %4867 = vperm.xlu1 %4769, %v4866_v27   ;;  %vm3377_vm13 = vmor %vm3185_vm3, %vm3313_vm10  ;;  %v4361_v5 = vsel %vm3376_vm2, 1.0, %v7451_v36  ;;  %vm3189_vm10 = vcmp.gt.f32.partialorder %v6692_v22, %v3103_v31  ;;  %v3105_v27 = vperm.slane %v6832_v42, 7  ;;  %v3111_v42 = vperm.slane %v6933_v44, 5 }
 0xacc   :  { %v4362_v48 = vsel %vm3377_vm13, 1.0, %v7451_v36  ;;  %vm3304_vm0 = vmand %vm3240_vm9, %vm7668_vm1  ;;  %vm7671_vm9 = vcmp.ne.s32.totalorder %v5467_v6, 0  ;;  %vm3255_vm1 = vcmp.eq.f32.partialorder %v6692_v22, %v3104_v7 }
 0xacd   :  { %v4871_v23 = vpack.i.bf16 %v4362_v48, %v4361_v5  ;;  %vm3305_vm14 = vmand %vm3241_vm4, %vm7670_vm7  ;;  %vm7672_vm4 = vcmp.ne.s32.totalorder %v5331_v52, 0  ;;  %vm3190_vm7 = vcmp.gt.f32.partialorder %v6684_v35, %v3104_v7 }
 0xace   :  { %vm3368_vm3 = vmor %vm3176_vm12, %vm3304_vm0  ;;  %vm3254_vm12 = vcmp.eq.f32.partialorder %v6684_v35, %v3104_v7 }
 0xacf   :  { %4872 = vperm.xlu2 %4775, %v4871_v23   ;;  %vm3369_vm15 = vmor %vm3177_vm8, %vm3305_vm14  ;;  %v4353_v32 = vsel %vm3368_vm3, 1.0, %v7451_v36  ;;  %vm3191_vm14 = vcmp.gt.f32.partialorder %v6692_v22, %v3104_v7 }
 0xad0   :  { %v4354_v49 = vsel %vm3369_vm15, 1.0, %v7451_v36  ;;  %vm3316_vm2 = vmand %vm3252_vm6, %vm7671_vm9  ;;  %vm7673_vm6 = vcmp.ne.s32.totalorder %v7482_v51, 0  ;;  %vm3251_vm9 = vcmp.eq.f32.partialorder %v6692_v22, %v3102_v17 }
 0xad1   :  { %v4851_v38 = vpack.i.bf16 %v4354_v49, %v4353_v32  ;;  %vm3317_vm13 = vmand %vm3253_vm5, %vm7672_vm4  ;;  %vm7674_vm5 = vcmp.ne.s32.totalorder %v7484_v1, 0  ;;  %vm3186_vm4 = vcmp.gt.f32.partialorder %v6684_v35, %v3102_v17 }
 0xad2   :  { %vm3380_vm8 = vmor %vm3188_vm11, %vm3316_vm2  ;;  %vm3250_vm11 = vcmp.eq.f32.partialorder %v6684_v35, %v3102_v17 }
 0xad3   :  { %4852 = vperm.xlu0 %4763, %v4851_v38   ;;  %vm3381_vm0 = vmor %vm3189_vm10, %vm3317_vm13  ;;  %v4365_v2 = vsel %vm3380_vm8, 1.0, %v7451_v36  ;;  %vm3187_vm13 = vcmp.gt.f32.partialorder %v6692_v22, %v3102_v17 }
 0xad4   :  { %v4366_v6 = vsel %vm3381_vm0, 1.0, %v7451_v36  ;;  %vm3318_vm3 = vmand %vm3254_vm12, %vm7673_vm6  ;;  %vm7675_vm12 = vcmp.ne.s32.totalorder %v5327_v24, 0  ;;  %vm3265_vm6 = vcmp.eq.f32.partialorder %v6692_v22, %v3109_v62 }
 0xad5   :  { %v4881_v52 = vpack.i.bf16 %v4366_v6, %v4365_v2  ;;  %vm3319_vm15 = vmand %vm3255_vm1, %vm7674_vm5  ;;  %vm7676_vm1 = vcmp.ne.s32.totalorder %v5403_v26, 0  ;;  %vm3200_vm5 = vcmp.gt.f32.partialorder %v6684_v35, %v3109_v62 }
 0xad6   :  { %vm3382_vm10 = vmor %vm3190_vm7, %vm3318_vm3  ;;  %vm3264_vm7 = vcmp.eq.f32.partialorder %v6684_v35, %v3109_v62 }
 0xad7   :  { %4882 = vperm.xlu1 %4769, %v4881_v52   ;;  %vm3383_vm2 = vmor %vm3191_vm14, %vm3319_vm15  ;;  %v4367_v61 = vsel %vm3382_vm10, 1.0, %v7451_v36  ;;  %vm3201_vm15 = vcmp.gt.f32.partialorder %v6692_v22, %v3109_v62 }
 0xad8   :  { %v4368_v51 = vsel %vm3383_vm2, 1.0, %v7451_v36  ;;  %vm3314_vm8 = vmand %vm3250_vm11, %vm7675_vm12  ;;  %vm7677_vm11 = vcmp.ne.s32.totalorder %v7651_v53, 0  ;;  %vm3261_vm12 = vcmp.eq.f32.partialorder %v6692_v22, %v3107_v43 }
 0xad9   :  { %v4886_v1 = vpack.i.bf16 %v4368_v51, %v4367_v61  ;;  %vm3315_vm0 = vmand %vm3251_vm9, %vm7676_vm1  ;;  %vm7678_vm9 = vcmp.ne.s32.totalorder %v7653_v12, 0  ;;  %vm3196_vm1 = vcmp.gt.f32.partialorder %v6684_v35, %v3107_v43 }
 0xada   :  { %vm3378_vm14 = vmor %vm3186_vm4, %vm3314_vm8  ;;  %vm3260_vm4 = vcmp.eq.f32.partialorder %v6684_v35, %v3107_v43 }
 0xadb   :  { %4887 = vperm.xlu2 %4775, %v4886_v1   ;;  %vm3379_vm3 = vmor %vm3187_vm13, %vm3315_vm0  ;;  %v4363_v20 = vsel %vm3378_vm14, 1.0, %v7451_v36  ;;  %vm3197_vm0 = vcmp.gt.f32.partialorder %v6692_v22, %v3107_v43 }
 0xadc   :  { %v4364_v24 = vsel %vm3379_vm3, 1.0, %v7451_v36  ;;  %vm3328_vm10 = vmand %vm3264_vm7, %vm7677_vm11  ;;  %vm7679_vm7 = vcmp.ne.s32.totalorder %v7635_v4, 0  ;;  %vm3259_vm11 = vcmp.eq.f32.partialorder %v6692_v22, %v3106_v16 }
 0xadd   :  { %v4876_v26 = vpack.i.bf16 %v4364_v24, %v4363_v20  ;;  %vm3329_vm2 = vmand %vm3265_vm6, %vm7678_vm9  ;;  %vm7680_vm6 = vcmp.ne.s32.totalorder %v7637_v0, 0  ;;  %vm3194_vm9 = vcmp.gt.f32.partialorder %v6684_v35, %v3106_v16 }
 0xade   :  { %vm3392_vm13 = vmor %vm3200_vm5, %vm3328_vm10  ;;  %vm3258_vm5 = vcmp.eq.f32.partialorder %v6684_v35, %v3106_v16 }
 0xadf   :  { %4877 = vperm.xlu0 %4763, %v4876_v26   ;;  %vm3393_vm8 = vmor %vm3201_vm15, %vm3329_vm2  ;;  %v4377_v50 = vsel %vm3392_vm13, 1.0, %v7451_v36  ;;  %vm3195_vm2 = vcmp.gt.f32.partialorder %v6692_v22, %v3106_v16 }
 0xae0   :  { %v4378_v53 = vsel %vm3393_vm8, 1.0, %v7451_v36  ;;  %vm3324_vm14 = vmand %vm3260_vm4, %vm7679_vm7  ;;  %vm7681_vm4 = vcmp.ne.s32.totalorder %v7639_v40, 0  ;;  %vm3271_vm7 = vcmp.eq.f32.partialorder %v6692_v22, %v3112_v29 }
 0xae1   :  { %v4906_v12 = vpack.i.bf16 %v4378_v53, %v4377_v50  ;;  %vm3325_vm3 = vmand %vm3261_vm12, %vm7680_vm6  ;;  %vm7682_vm12 = vcmp.ne.s32.totalorder %v7641_v47, 0  ;;  %vm3206_vm6 = vcmp.gt.f32.partialorder %v6684_v35, %v3112_v29 }
 0xae2   :  { %vm3388_vm15 = vmor %vm3196_vm1, %vm3324_vm14  ;;  %vm3270_vm1 = vcmp.eq.f32.partialorder %v6684_v35, %v3112_v29 }
 0xae3   :  { %4907 = vperm.xlu1 %4769, %v4906_v12   ;;  %vm3389_vm10 = vmor %vm3197_vm0, %vm3325_vm3  ;;  %v4373_v28 = vsel %vm3388_vm15, 1.0, %v7451_v36  ;;  %vm3207_vm3 = vcmp.gt.f32.partialorder %v6692_v22, %v3112_v29 }
 0xae4   :  { %v4374_v4 = vsel %vm3389_vm10, 1.0, %v7451_v36  ;;  %vm3322_vm13 = vmand %vm3258_vm5, %vm7681_vm4  ;;  %vm7683_vm5 = vcmp.ne.s32.totalorder %v7659_v8, 0  ;;  %vm3267_vm4 = vcmp.eq.f32.partialorder %v6692_v22, %v3110_v57 }
 0xae5   :  { %v4896_v0 = vpack.i.bf16 %v4374_v4, %v4373_v28  ;;  %vm3323_vm8 = vmand %vm3259_vm11, %vm7682_vm12  ;;  %vm7684_vm11 = vcmp.ne.s32.totalorder %v7661_v9, 0  ;;  %vm3202_vm12 = vcmp.gt.f32.partialorder %v6684_v35, %v3110_v57  ;;  %v4783_v48 = vpop.permute.xlu2 %4782 }
 0xae6   :  { %vm3386_vm0 = vmor %vm3194_vm9, %vm3322_vm13  ;;  %vm3266_vm9 = vcmp.eq.f32.partialorder %v6684_v35, %v3110_v57  ;;  %v4785_v2 = vunpack.i.h.bf16 %v4783_v48  ;;  %v4784_v6 = vunpack.i.l.bf16 %v4783_v48 }
 0xae7   :  { %4897 = vperm.xlu2 %4775, %v4896_v0   ;;  %vm3387_vm14 = vmor %vm3195_vm2, %vm3323_vm8  ;;  %v4371_v30 = vsel %vm3386_vm0, 1.0, %v7451_v36  ;;  %vm3203_vm8 = vcmp.gt.f32.partialorder %v6692_v22, %v3110_v57 }
 0xae8   :  { %v4372_v40 = vsel %vm3387_vm14, 1.0, %v7451_v36  ;;  %vm3334_vm15 = vmand %vm3270_vm1, %vm7683_vm5  ;;  %vm7685_vm1 = vcmp.ne.s32.totalorder %v7647_v15, 0  ;;  %vm3263_vm5 = vcmp.eq.f32.partialorder %v6692_v22, %v3108_v63  ;;  %v3790_v1 = vperm.slane %v4785_v2, %v5184_v14 }
 0xae9   :  { %v4891_v47 = vpack.i.bf16 %v4372_v40, %v4371_v30  ;;  %vm3335_vm10 = vmand %vm3271_vm7, %vm7684_vm11  ;;  %vm7686_vm7 = vcmp.ne.s32.totalorder %v7649_v45, 0  ;;  %vm3198_vm11 = vcmp.gt.f32.partialorder %v6684_v35, %v3108_v63  ;;  %v3789_v43 = vperm.slane %v4784_v6, %v5181_v13 }
 0xaea   :  { %vm3398_vm2 = vmor %vm3206_vm6, %vm3334_vm15  ;;  %vm3262_vm6 = vcmp.eq.f32.partialorder %v6684_v35, %v3108_v63 }
 0xaeb   :  { %4892 = vperm.xlu0 %4763, %v4891_v47   ;;  %vm3399_vm13 = vmor %vm3207_vm3, %vm3335_vm10  ;;  %v4383_v46 = vsel %vm3398_vm2, 1.0, %v7451_v36  ;;  %vm3199_vm10 = vcmp.gt.f32.partialorder %v6692_v22, %v3108_v63 }
 0xaec   :  { %v4384_v8 = vsel %vm3399_vm13, 1.0, %v7451_v36  ;;  %vm3330_vm0 = vmand %vm3266_vm9, %vm7685_vm1  ;;  %vm7687_vm9 = vcmp.ne.s32.totalorder %v7490_v18, 0  ;;  %vm3273_vm1 = vcmp.eq.f32.partialorder %v6692_v22, %v3113_v33 }
 0xaed   :  { %v4926_v9 = vpack.i.bf16 %v4384_v8, %v4383_v46  ;;  %vm3331_vm14 = vmand %vm3267_vm4, %vm7686_vm7  ;;  %vm7688_vm4 = vcmp.ne.s32.totalorder %v7633_v59, 0  ;;  %vm3208_vm7 = vcmp.gt.f32.partialorder %v6684_v35, %v3113_v33 }
 0xaee   :  { %vm3394_vm3 = vmor %vm3202_vm12, %vm3330_vm0  ;;  %vm3272_vm12 = vcmp.eq.f32.partialorder %v6684_v35, %v3113_v33 }
 0xaef   :  { %4927 = vperm.xlu1 %4769, %v4926_v9   ;;  %vm3395_vm15 = vmor %vm3203_vm8, %vm3331_vm14  ;;  %v4379_v19 = vsel %vm3394_vm3, 1.0, %v7451_v36  ;;  %vm3209_vm14 = vcmp.gt.f32.partialorder %v6692_v22, %v3113_v33 }
 0xaf0   :  { %v4380_v15 = vsel %vm3395_vm15, 1.0, %v7451_v36  ;;  %vm3326_vm2 = vmand %vm3262_vm6, %vm7687_vm9  ;;  %vm7689_vm6 = vcmp.ne.s32.totalorder %v7667_v55, 0  ;;  %vm3257_vm9 = vcmp.eq.f32.partialorder %v6692_v22, %v3105_v27 }
 0xaf1   :  { %v4911_v45 = vpack.i.bf16 %v4380_v15, %v4379_v19  ;;  %vm3327_vm13 = vmand %vm3263_vm5, %vm7688_vm4  ;;  %vm7690_vm5 = vcmp.ne.s32.totalorder %v7669_v41, 0  ;;  %vm3192_vm4 = vcmp.gt.f32.partialorder %v6684_v35, %v3105_v27 }
 0xaf2   :  { %vm3390_vm8 = vmor %vm3198_vm11, %vm3326_vm2  ;;  %vm3256_vm11 = vcmp.eq.f32.partialorder %v6684_v35, %v3105_v27 }
 0xaf3   :  { %4912 = vperm.xlu2 %4775, %v4911_v45   ;;  %vm3391_vm0 = vmor %vm3199_vm10, %vm3327_vm13  ;;  %v4375_v31 = vsel %vm3390_vm8, 1.0, %v7451_v36  ;;  %vm3193_vm13 = vcmp.gt.f32.partialorder %v6692_v22, %v3105_v27 }
 0xaf4   :  { %v4376_v18 = vsel %vm3391_vm0, 1.0, %v7451_v36  ;;  %vm3336_vm3 = vmand %vm3272_vm12, %vm7689_vm6  ;;  %vm7691_vm12 = vcmp.ne.s32.totalorder %v7478_v54, 0 }
 0xaf5   :  { %v4901_v59 = vpack.i.bf16 %v4376_v18, %v4375_v31  ;;  %vm3337_vm15 = vmand %vm3273_vm1, %vm7690_vm5  ;;  %vm7692_vm1 = vcmp.ne.s32.totalorder %v7480_v10, 0  ;;  %vm3204_vm5 = vcmp.gt.f32.partialorder %v6684_v35, %v3111_v42 }
 0xaf6   :  { %vm3400_vm10 = vmor %vm3208_vm7, %vm3336_vm3  ;;  %vm3268_vm7 = vcmp.eq.f32.partialorder %v6684_v35, %v3111_v42  ;;  %v4793_v35 = vpop.permute.xlu2 %4792 }
 0xaf7   :  { %4902 = vperm.xlu0 %4763, %v4901_v59   ;;  %vm3401_vm2 = vmor %vm3209_vm14, %vm3337_vm15  ;;  %v4385_v5 = vsel %vm3400_vm10, 1.0, %v7451_v36  ;;  %vm3269_vm14 = vcmp.eq.f32.partialorder %v6692_v22, %v3111_v42  ;;  %vm3205_vm15 = vcmp.gt.f32.partialorder %v6692_v22, %v3111_v42  ;;  %v4795_v29 = vunpack.i.h.bf16 %v4793_v35 }
 0xaf8   :  { %v4386_v55 = vsel %vm3401_vm2, 1.0, %v7451_v36  ;;  %vm3320_vm8 = vmand %vm3256_vm11, %vm7691_vm12  ;;  %vm7693_vm11 = vcmp.ne.s32.totalorder %v7643_v56, 0  ;;  %v4794_v28 = vunpack.i.l.bf16 %v4793_v35 }
 0xaf9   :  { %v4931_v23 = vpack.i.bf16 %v4386_v55, %v4385_v5  ;;  %vm3321_vm0 = vmand %vm3257_vm9, %vm7692_vm1  ;;  %vm7694_vm9 = vcmp.ne.s32.totalorder %v7645_v34, 0  ;;  %v4788_v38 = vpop.permute.xlu1 %4787  ;;  %vm7697_vm1 = vcmask 1041409   ;;  %v3796_v8 = vperm.slane %v4795_v29, %v5184_v14 }
 0xafa   :  { %vm3384_vm6 = vmor %vm3192_vm4, %vm3320_vm8  ;;  %v4790_v34 = vunpack.i.h.bf16 %v4788_v38  ;;  %v4789_v62 = vunpack.i.l.bf16 %v4788_v38  ;;  %v3795_v9 = vperm.slane %v4794_v28, %v5181_v13 }
 0xafb   :  { %4932 = vperm.xlu1 %4769, %v4931_v23   ;;  %vm3385_vm3 = vmor %vm3193_vm13, %vm3321_vm0  ;;  %v4369_v41 = vsel %vm3384_vm6, 1.0, %v7451_v36  ;;  %vm7695_vm13 = vcmask 130112  }
 0xafc   :  { %v4370_v7 = vsel %vm3385_vm3, 1.0, %v7451_v36  ;;  %vm3332_vm10 = vmand %vm3268_vm7, %vm7693_vm11  ;;  %v3793_v24 = vperm.slane %v4790_v34, %v5184_v14  ;;  %v3792_v26 = vperm.slane %v4789_v62, %v5181_v13  ;;  %vm7699_vm7 = vcmask 1042434  }
 0xafd   :  { %v4916_v54 = vpack.i.bf16 %v4370_v7, %v4369_v41  ;;  %vm3333_vm2 = vmand %vm3269_vm14, %vm7694_vm9  ;;  %vm7702_vm3 = vcmask 1043459   ;;  %vm7705_vm11 = vcmask 1045509  }
 0xafe   :  { %vm3396_vm4 = vmor %vm3204_vm5, %vm3332_vm10  ;;  %v4808_v22 = vpop.permute.xlu2 %4807 }
 0xaff   :  { %4917 = vperm.xlu2 %4775, %v4916_v54   ;;  %vm3397_vm12 = vmor %vm3205_vm15, %vm3333_vm2  ;;  %v4381_v10 = vsel %vm3396_vm4, 1.0, %v7451_v36  ;;  %v4810_v31 = vunpack.i.h.bf16 %v4808_v22  ;;  %v4809_v18 = vunpack.i.l.bf16 %v4808_v22  ;;  %vm7704_vm15 = vcmask 1044484  }
 0xb00   :  { %v4382_v32 = vsel %vm3397_vm12, 1.0, %v7451_v36  ;;  %vm7696_vm8 = vmmov %vm7695_vm13  ;;  %vm7708_vm2 = vcmask 1046534   ;;  %vm7709_vm4 = vcmask 1047559   ;;  %vm7710_vm12 = vcmask 130048  }
 0xb01   :  { %v4921_v49 = vpack.i.bf16 %v4382_v32, %v4381_v10  ;;  %v4778_v17 = vpop.permute.xlu0 %4777  ;;  %v3791_v4 = vsel %vm7696_vm8, %v3790_v1, %v3789_v43  ;;  %vm7698_vm0 = vmmov %vm7696_vm8  ;;  %v3805_v54 = vperm.slane %v4810_v31, %v5184_v14  ;;  %v3804_v10 = vperm.slane %v4809_v18, %v5181_v13 }
 0xb02   :  { %v4780_v44 = vunpack.i.h.bf16 %v4778_v17  ;;  %v4779_v56 = vunpack.i.l.bf16 %v4778_v17  ;;  %v3794_v57 = vsel %vm7698_vm0, %v3793_v24, %v3792_v26  ;;  %vm7700_vm6 = vmmov %vm7698_vm0 }
 0xb03   :  { %4922 = vperm.xlu0 %4763, %v4921_v49   ;;  %vm7701_vm14 = vmmov %vm7698_vm0 }
 0xb04   :  { %v3787_v61 = vperm.slane %v4780_v44, %v5184_v14  ;;  %v3786_v51 = vperm.slane %v4779_v56, %v5181_v13  ;;  %v3797_v5 = vsel %vm7701_vm14, %v3796_v8, %v3795_v9  ;;  %vm7703_vm5 = vmmov %vm7698_vm0 }
 0xb05   :  { %v4798_v52 = vpop.permute.xlu1 %4797  ;;  %vm7706_vm10 = vmmov %vm7698_vm0 }
 0xb06   :  { %v4823_v20 = vpop.permute.xlu2 %4822  ;;  %v3788_v16 = vsel %vm7695_vm13, %v3787_v61, %v3786_v51  ;;  %v4800_v53 = vunpack.i.h.bf16 %v4798_v52  ;;  %v4799_v12 = vunpack.i.l.bf16 %v4798_v52  ;;  %vm7707_vm9 = vmmov %vm7698_vm0 }
 0xb07   :  { %v3882_v0 = vsel %vm7697_vm1, %v3791_v4, %v3788_v16  ;;  %v3806_v38 = vsel %vm7707_vm9, %v3805_v54, %v3804_v10  ;;  %v4825_v51 = vunpack.i.h.bf16 %v4823_v20  ;;  %v4824_v1 = vunpack.i.l.bf16 %v4823_v20  ;;  %vm7711_vm13 = vmmov %vm7698_vm0 }
 0xb08   :  { %v3799_v47 = vperm.slane %v4800_v53, %v5184_v14  ;;  %v3798_v63 = vperm.slane %v4799_v12, %v5181_v13  ;;  %v3883_v33 = vsel %vm7699_vm7, %v3794_v57, %v3882_v0  ;;  %vm7712_vm8 = vmmov %vm7698_vm0 }
 0xb09   :  { %v3884_v48 = vsel %vm7702_vm3, %v3797_v5, %v3883_v33  ;;  %v3814_v29 = vperm.slane %v4825_v51, %v5184_v14  ;;  %v3813_v28 = vperm.slane %v4824_v1, %v5181_v13  ;;  %vm7713_vm1 = vmmov %vm7698_vm0  ;;  %vm7714_vm0 = vcmask 1041409  }
 0xb0a   :  { %v3800_v59 = vsel %vm7700_vm6, %v3799_v47, %v3798_v63  ;;  %vm7715_vm7 = vmmov %vm7713_vm1  ;;  %vm7716_vm6 = vcmask 1042434  }
 0xb0b   :  { %v3885_v7 = vsel %vm7704_vm15, %v3800_v59, %v3884_v48  ;;  %v3815_v8 = vsel %vm7712_vm8, %v3814_v29, %v3813_v28  ;;  %vm7717_vm14 = vmmov %vm7702_vm3 }
 0xb0c   :  { %vm7718_vm3 = vmmov %vm7713_vm1 }
 0xb0d   :  { %v4803_v50 = vpop.permute.xlu0 %4802  ;;  %vm7723_vm9 = vmmov %vm7713_vm1 }
 0xb0e   :  { %v4805_v30 = vunpack.i.h.bf16 %v4803_v50  ;;  %v4804_v40 = vunpack.i.l.bf16 %v4803_v50  ;;  %vm7725_vm8 = vmmov %vm7713_vm1 }
 0xb10   :  { %v3802_v19 = vperm.slane %v4805_v30, %v5184_v14  ;;  %v3801_v15 = vperm.slane %v4804_v40, %v5181_v13 }
 0xb11   :  { %v4813_v46 = vpop.permute.xlu1 %4812  ;;  %v4838_v42 = vpop.permute.xlu2 %4837 }
 0xb12   :  { %v4815_v45 = vunpack.i.h.bf16 %v4813_v46  ;;  %v4814_v27 = vunpack.i.l.bf16 %v4813_v46  ;;  %v3803_v55 = vsel %vm7703_vm5, %v3802_v19, %v3801_v15  ;;  %v4840_v63 = vunpack.i.h.bf16 %v4838_v42  ;;  %vm7719_vm5 = vmmov %vm7704_vm15 }
 0xb13   :  { %v3886_v32 = vsel %vm7705_vm11, %v3803_v55, %v3885_v7  ;;  %v4839_v46 = vunpack.i.l.bf16 %v4838_v42  ;;  %vm7720_vm15 = vmmov %vm7713_vm1 }
 0xb14   :  { %v3808_v23 = vperm.slane %v4815_v45, %v5184_v14  ;;  %v3807_v41 = vperm.slane %v4814_v27, %v5181_v13  ;;  %v3887_v17 = vsel %vm7708_vm2, %v3806_v38, %v3886_v32  ;;  %v3823_v18 = vperm.slane %v4840_v63, %v5184_v14  ;;  %vm7721_vm11 = vmmov %vm7713_vm1 }
 0xb15   :  { %v3822_v59 = vperm.slane %v4839_v46, %v5181_v13 }
 0xb16   :  { %v3809_v35 = vsel %vm7706_vm10, %v3808_v23, %v3807_v41  ;;  %vm7722_vm10 = vcmask 1045509  }
 0xb17   :  { %v3888_v44 = vsel %vm7709_vm4, %v3809_v35, %v3887_v17  ;;  %v3824_v54 = vsel %vm7718_vm3, %v3823_v18, %v3822_v59  ;;  %vm7729_vm3 = vmmov %vm7713_vm1 }
 0xb18   :  { %v3914_v2 = vsel %vm7710_vm12, %v3888_v44, 0.0 }
 0xb19   :  { %v4828_v49 = vpop.permute.xlu1 %4827 }
 0xb1a   :  { %v4830_v43 = vunpack.i.h.bf16 %v4828_v49  ;;  %v4829_v24 = vunpack.i.l.bf16 %v4828_v49 }
 0xb1c   :  { %v3817_v4 = vperm.slane %v4830_v43, %v5184_v14  ;;  %v3816_v0 = vperm.slane %v4829_v24, %v5181_v13 }
 0xb1d   :  { %v7085_v22 = vpop.permute.xlu2 %4857 }
 0xb1e   :  { %v3818_v9 = vsel %vm7713_vm1, %v3817_v4, %v3816_v0 }
 0xb21   :  { %v4818_v56 = vpop.permute.xlu0 %4817 }
 0xb22   :  { %v4820_v62 = vunpack.i.h.bf16 %v4818_v56  ;;  %v4819_v61 = vunpack.i.l.bf16 %v4818_v56  ;;  %v4860_v56 = vunpack.i.h.bf16 %v7085_v22 }
 0xb24   :  { %v3811_v16 = vperm.slane %v4820_v62, %v5184_v14  ;;  %v3810_v50 = vperm.slane %v4819_v61, %v5181_v13 }
 0xb25   :  { %v4843_v6 = vpop.permute.xlu1 %4842 }
 0xb26   :  { %v3812_v30 = vsel %vm7711_vm13, %v3811_v16, %v3810_v50  ;;  %v4845_v33 = vunpack.i.h.bf16 %v4843_v6  ;;  %v4844_v15 = vunpack.i.l.bf16 %v4843_v6  ;;  %v3835_v50 = vperm.slane %v4860_v56, %v5184_v14  ;;  %vm7724_vm13 = vmmov %vm7713_vm1 }
 0xb27   :  { %v3889_v19 = vsel %vm7714_vm0, %v3815_v8, %v3812_v30 }
 0xb28   :  { %v3890_v48 = vsel %vm7716_vm6, %v3818_v9, %v3889_v19  ;;  %v3826_v42 = vperm.slane %v4845_v33, %v5184_v14  ;;  %v3825_v23 = vperm.slane %v4844_v15, %v5181_v13 }
 0xb29   :  { %v7089_v52 = vpop.permute.xlu2 %4872 }
 0xb2a   :  { %v3827_v6 = vsel %vm7720_vm15, %v3826_v42, %v3825_v23  ;;  %v4874_v30 = vunpack.i.l.bf16 %v7089_v52  ;;  %vm7731_vm15 = vcmask 1044484  }
 0xb2c   :  { %v3843_v19 = vperm.slane %v4874_v30, %v5181_v13 }
 0xb2d   :  { %3915 = vadd.xlane.f32.xlu0 %v3914_v2  ;;  %v4833_v34 = vpop.permute.xlu0 %4832  ;;  %v4859_v2 = vunpack.i.l.bf16 %v7085_v22 }
 0xb2e   :  { %v4835_v53 = vunpack.i.h.bf16 %v4833_v34  ;;  %v4834_v12 = vunpack.i.l.bf16 %v4833_v34 }
 0xb2f   :  { %v3834_v29 = vperm.slane %v4859_v2, %v5181_v13 }
 0xb30   :  { %v3820_v40 = vperm.slane %v4835_v53, %v5184_v14  ;;  %v3819_v47 = vperm.slane %v4834_v12, %v5181_v13 }
 0xb31   :  { %v4863_v26 = vpop.permute.xlu1 %4862  ;;  %v3836_v8 = vsel %vm7725_vm8, %v3835_v50, %v3834_v29  ;;  %vm7737_vm8 = vmmov %vm7713_vm1 }
 0xb32   :  { %v3821_v31 = vsel %vm7715_vm7, %v3820_v40, %v3819_v47  ;;  %v4865_v32 = vunpack.i.h.bf16 %v4863_v26  ;;  %v4864_v35 = vunpack.i.l.bf16 %v4863_v26  ;;  %vm7726_vm7 = vmmov %vm7716_vm6 }
 0xb33   :  { %v3891_v55 = vsel %vm7717_vm14, %v3821_v31, %v3890_v48  ;;  %vm7727_vm6 = vmmov %vm7713_vm1 }
 0xb34   :  { %v3892_v44 = vsel %vm7719_vm5, %v3824_v54, %v3891_v55  ;;  %v3838_v24 = vperm.slane %v4865_v32, %v5184_v14  ;;  %v3837_v26 = vperm.slane %v4864_v35, %v5181_v13  ;;  %vm7728_vm14 = vmmov %vm7713_vm1  ;;  %vm7730_vm5 = vcmask 1043459  }
 0xb35   :  { %v7097_v57 = vpop.permute.xlu2 %4887  ;;  %v3893_v43 = vsel %vm7722_vm10, %v3827_v6, %v3892_v44 }
 0xb36   :  { %v3839_v40 = vsel %vm7724_vm13, %v3838_v24, %v3837_v26  ;;  %v4890_v59 = vunpack.i.h.bf16 %v7097_v57  ;;  %vm7736_vm13 = vmmov %vm7713_vm1 }
 0xb37   :  { %v3896_v15 = vsel %vm7714_vm0, %v3839_v40, %v3836_v8 }
 0xb38   :  { %v3853_v32 = vperm.slane %v4890_v59, %v5184_v14 }
 0xb39   :  { %v4848_v20 = vpop.permute.xlu0 %4847 }
 0xb3a   :  { %v4850_v45 = vunpack.i.h.bf16 %v4848_v20  ;;  %v4849_v27 = vunpack.i.l.bf16 %v4848_v20  ;;  %v4875_v20 = vunpack.i.h.bf16 %v7089_v52 }
 0xb3c   :  { %v3829_v41 = vperm.slane %v4850_v45, %v5184_v14  ;;  %v3828_v7 = vperm.slane %v4849_v27, %v5181_v13  ;;  %v3844_v33 = vperm.slane %v4875_v20, %v5184_v14 }
 0xb3d   :  { %v4868_v5 = vpop.permute.xlu1 %4867 }
 0xb3e   :  { %v3830_v34 = vsel %vm7721_vm11, %v3829_v41, %v3828_v7  ;;  %v4870_v51 = vunpack.i.h.bf16 %v4868_v5  ;;  %v4869_v1 = vunpack.i.l.bf16 %v4868_v5  ;;  %v4889_v5 = vunpack.i.l.bf16 %v7097_v57  ;;  %vm7732_vm11 = vmmov %vm7722_vm10 }
 0xb3f   :  { %v3894_v22 = vsel %vm7708_vm2, %v3830_v34, %v3893_v43  ;;  %v3845_v23 = vsel %vm7727_vm6, %v3844_v33, %v3843_v19  ;;  %vm7733_vm10 = vmmov %vm7713_vm1 }
 0xb40   :  { %v3841_v28 = vperm.slane %v4870_v51, %v5184_v14  ;;  %v3840_v4 = vperm.slane %v4869_v1, %v5181_v13  ;;  %vm7738_vm6 = vmmov %vm7713_vm1 }
 0xb41   :  { %v7115_v10 = vpop.permute.xlu2 %4897 }
 0xb42   :  { %v3842_v9 = vsel %vm7713_vm1, %v3841_v28, %v3840_v4  ;;  %v4900_v50 = vunpack.i.h.bf16 %v7115_v10 }
 0xb43   :  { %v3897_v48 = vsel %vm7726_vm7, %v3842_v9, %v3896_v15 }
 0xb44   :  { %v3898_v54 = vsel %vm7730_vm5, %v3845_v23, %v3897_v48  ;;  %v3862_v30 = vperm.slane %v4900_v50, %v5184_v14 }
 0xb45   :  { %v4853_v49 = vpop.permute.xlu0 %4852 }
 0xb46   :  { %v4855_v38 = vunpack.i.h.bf16 %v4853_v49  ;;  %v4854_v17 = vunpack.i.l.bf16 %v4853_v49  ;;  %v3852_v49 = vperm.slane %v4889_v5, %v5181_v13 }
 0xb48   :  { %v3832_v62 = vperm.slane %v4855_v38, %v5184_v14  ;;  %v3831_v61 = vperm.slane %v4854_v17, %v5181_v13  ;;  %v3854_v56 = vsel %vm7733_vm10, %v3853_v32, %v3852_v49  ;;  %vm7743_vm10 = vcmask 1045509  }
 0xb49   :  { %v4883_v53 = vpop.permute.xlu1 %4882 }
 0xb4a   :  { %v3833_v16 = vsel %vm7723_vm9, %v3832_v62, %v3831_v61  ;;  %v4885_v47 = vunpack.i.h.bf16 %v4883_v53  ;;  %v4884_v63 = vunpack.i.l.bf16 %v4883_v53  ;;  %vm7734_vm9 = vmmov %vm7708_vm2  ;;  %v4899_v53 = vunpack.i.l.bf16 %v7115_v10 }
 0xb4b   :  { %v3895_v12 = vsel %vm7709_vm4, %v3833_v16, %v3894_v22  ;;  %vm7735_vm2 = vmmov %vm7713_vm1 }
 0xb4c   :  { %v3917_v0 = vsel %vm7710_vm12, %v3895_v12, 0.0  ;;  %v3850_v31 = vperm.slane %v4885_v47, %v5184_v14  ;;  %v3849_v18 = vperm.slane %v4884_v63, %v5181_v13  ;;  %v3861_v40 = vperm.slane %v4899_v53, %v5181_v13  ;;  %v62_v53 = vld [vmem:[%s7267_s3 + $0x1] sm:$0x1] }
 0xb4d   :  { %3918 = vadd.xlane.f32.xlu2 %v3917_v0  ;;  %v7138_v46 = vpop.permute.xlu2 %4912 }
 0xb4e   :  { %v3851_v7 = vsel %vm7729_vm3, %v3850_v31, %v3849_v18  ;;  %v4915_v10 = vunpack.i.h.bf16 %v7138_v46  ;;  %v4914_v9 = vunpack.i.l.bf16 %v7138_v46  ;;  %v3863_v15 = vsel %vm7713_vm1, %v3862_v30, %v3861_v40  ;;  %vm7740_vm3 = vmmov %vm7713_vm1 }
 0xb50   :  { %v3870_v46 = vperm.slane %v4914_v9, %v5181_v13  ;;  %v3939_v9 = vmul.f32 %v6677_v11, %v6659_v25 }
 0xb51   :  { %v4878_v45 = vpop.permute.xlu0 %4877 }
 0xb52   :  { %v4880_v27 = vunpack.i.h.bf16 %v4878_v45  ;;  %v4879_v52 = vunpack.i.l.bf16 %v4878_v45 }
 0xb54   :  { %v3847_v42 = vperm.slane %v4880_v27, %v5184_v14  ;;  %v3846_v55 = vperm.slane %v4879_v52, %v5181_v13 }
 0xb55   :  { %v4908_v62 = vpop.permute.xlu1 %4907 }
 0xb56   :  { %v3848_v41 = vsel %vm7728_vm14, %v3847_v42, %v3846_v55  ;;  %v4910_v47 = vunpack.i.h.bf16 %v4908_v62  ;;  %v4909_v63 = vunpack.i.l.bf16 %v4908_v62  ;;  %v3871_v42 = vperm.slane %v4915_v10, %v5184_v14  ;;  %vm7739_vm14 = vmmov %vm7730_vm5 }
 0xb57   :  { %v3899_v57 = vsel %vm7731_vm15, %v3848_v41, %v3898_v54  ;;  %vm7741_vm5 = vmmov %vm7713_vm1  ;;  %v3938_v10 = vmul.f32 %v6668_v3, %v6654_v39 }
 0xb58   :  { %v3900_v38 = vsel %vm7732_vm11, %v3851_v7, %v3899_v57  ;;  %v3868_v45 = vperm.slane %v4910_v47, %v5184_v14  ;;  %v3867_v27 = vperm.slane %v4909_v63, %v5181_v13  ;;  %vm7742_vm11 = vmmov %vm7713_vm1 }
 0xb59   :  { %v4918_v35 = vpop.permute.xlu2 %4917  ;;  %v3901_v34 = vsel %vm7734_vm9, %v3854_v56, %v3900_v38  ;;  %vm7744_vm9 = vmmov %vm7713_vm1 }
 0xb5a   :  { %v4920_v17 = vunpack.i.h.bf16 %v4918_v35  ;;  %v4919_v44 = vunpack.i.l.bf16 %v4918_v35  ;;  %v3869_v23 = vsel %vm7738_vm6, %v3868_v45, %v3867_v27 }
 0xb5c   :  { %v3856_v2 = vperm.slane %v4920_v17, %v5184_v14  ;;  %v3855_v6 = vperm.slane %v4919_v44, %v5181_v13  ;;  %v3872_v44 = vsel %vm7740_vm3, %v3871_v42, %v3870_v46 }
 0xb5d   :  { %v4893_v51 = vpop.permute.xlu0 %4892 }
 0xb5e   :  { %v3857_v61 = vsel %vm7735_vm2, %v3856_v2, %v3855_v6  ;;  %v4895_v26 = vunpack.i.h.bf16 %v4893_v51  ;;  %v4894_v16 = vunpack.i.l.bf16 %v4893_v51  ;;  %vm7745_vm2 = vcmask 1046534  }
 0xb5f   :  { %v3902_v1 = vsel %vm7709_vm4, %v3857_v61, %v3901_v34 }
 0xb60   :  { %v3920_v43 = vsel %vm7710_vm12, %v3902_v1, 0.0  ;;  %v3859_v28 = vperm.slane %v4895_v26, %v5184_v14  ;;  %v3858_v4 = vperm.slane %v4894_v16, %v5181_v13  ;;  %v61_v1 = vld [vmem:[%s7267_s3] sm:$0x1] }
 0xb61   :  { %3921 = vadd.xlane.f32.xlu1 %v3920_v43  ;;  %v4928_v24 = vpop.permute.xlu1 %4927 }
 0xb62   :  { %v3860_v8 = vsel %vm7736_vm13, %v3859_v28, %v3858_v4  ;;  %v4930_v31 = vunpack.i.h.bf16 %v4928_v24  ;;  %v4929_v18 = vunpack.i.l.bf16 %v4928_v24  ;;  %v5047_v24 = vld [vmem:[%s7267_s3] ss:$0 sm:$0xff] }
 0xb63   :  { %v3903_v52 = vsel %vm7714_vm0, %v3863_v15, %v3860_v8 }
 0xb64   :  { %v3877_v54 = vperm.slane %v4930_v31, %v5184_v14  ;;  %v3876_v32 = vperm.slane %v4929_v18, %v5181_v13 }
 0xb66   :  { %v3878_v6 = vsel %vm7742_vm11, %v3877_v54, %v3876_v32 }
 0xb69   :  { %v4903_v22 = vpop.permute.xlu0 %4902 }
 0xb6a   :  { %v4905_v12 = vunpack.i.h.bf16 %v4903_v22  ;;  %v4904_v29 = vunpack.i.l.bf16 %v4903_v22 }
 0xb6c   :  { %v3865_v0 = vperm.slane %v4905_v12, %v5184_v14  ;;  %v3864_v20 = vperm.slane %v4904_v29, %v5181_v13  ;;  %v5048_v29 = vld [vmem:[%s7267_s3 + $0x1] ss:$0 sm:$0xff]  ;;  %s5054_s3 = smov 32  }
 0xb6d   :  { %v4933_v19 = vpop.permute.xlu1 %4932 }
 0xb6e   :  { %v3866_v33 = vsel %vm7737_vm8, %v3865_v0, %v3864_v20  ;;  %v4935_v5 = vunpack.i.h.bf16 %v4933_v19  ;;  %v4934_v48 = vunpack.i.l.bf16 %v4933_v19 }
 0xb6f   :  { %v3904_v59 = vsel %vm7726_vm7, %v3866_v33, %v3903_v52  ;;  %vm7746_vm7 = vcmask 261120  }
 0xb70   :  { %v3905_v49 = vsel %vm7739_vm14, %v3869_v23, %v3904_v59  ;;  %v3880_v38 = vperm.slane %v4935_v5, %v5184_v14  ;;  %v3879_v17 = vperm.slane %v4934_v48, %v5181_v13  ;;  %vm7747_vm6 = vmmov %vm7746_vm7 }
 0xb71   :  { %v3906_v2 = vsel %vm7731_vm15, %v3872_v44, %v3905_v49  ;;  %vm7748_vm14 = vmmov %vm7747_vm6 }
 0xb72   :  { %v3881_v62 = vsel %vm7744_vm9, %v3880_v38, %v3879_v17  ;;  %vm7749_vm3 = vmmov %vm7747_vm6 }
 0xb73   :  { %vm7750_vm9 = vmmov %vm7749_vm3 }
 0xb75   :  { %v4923_v55 = vpop.permute.xlu0 %4922 }
 0xb76   :  { %v4925_v41 = vunpack.i.h.bf16 %v4923_v55  ;;  %v4924_v7 = vunpack.i.l.bf16 %v4923_v55 }
 0xb78   :  { %v3874_v57 = vperm.slane %v4925_v41, %v5184_v14  ;;  %v3873_v35 = vperm.slane %v4924_v7, %v5181_v13  ;;  %v5053_v13 = vmov 3  }
 0xb79   :  { %4948 = vset.pattern.permute.xlu0 %v5053_v13  ;;  %4936 = vset.pattern.permute.xlu2 %v5053_v13 }
 0xb7a   :  { %v3875_v56 = vsel %vm7741_vm5, %v3874_v57, %v3873_v35  ;;  %4942 = vset.pattern.permute.xlu1 %v5053_v13 }
 0xb7b   :  { %v3907_v34 = vsel %vm7743_vm10, %v3875_v56, %v3906_v2  ;;  %v3940_v2 = vmul.f32 %v6674_v60, %v6651_v37 }
 0xb7c   :  { %v3908_v61 = vsel %vm7745_vm2, %v3878_v6, %v3907_v34  ;;  %v3941_v6 = vmul.f32 %v6689_v58, %v6662_v21  ;;  %vm7751_vm2 = vmmov %vm7749_vm3 }
 0xb7d   :  { %v3909_v51 = vsel %vm7709_vm4, %v3881_v62, %v3908_v61  ;;  %vm7752_vm4 = vmmov %vm7751_vm2 }
 0xb7e   :  { %v3923_v14 = vsel %vm7710_vm12, %v3909_v51, 0.0  ;;  %vm7753_vm12 = vmmov %vm7751_vm2 }
 0xb7f   :  { %3924 = vadd.xlane.f32.xlu0 %v3923_v14 }
 0xb93   :  { %4007 = vperm.xlu0 %4948, %v61_v1  }
 0xba0   :  { %v3916_v43 = vpop.xlane.xlu0 %3915 }
 0xba1   :  { %vm3926_vm13 = vcmp.lt.f32.partialorder %v3916_v43, %v5047_v24 }
 0xba2   :  { %v4387_v16 = vsel %vm3926_vm13, 1.0, %v7451_v36 }
 0xbc0   :  { %v3919_v26 = vpop.xlane.xlu2 %3918 }
 0xbc1   :  { %vm3927_vm8 = vcmp.lt.f32.partialorder %v3919_v26, %v5047_v24 }
 0xbc2   :  { %v4388_v22 = vsel %vm3927_vm8, 1.0, %v7451_v36 }
 0xbc3   :  { %v4937_v50 = vpack.i.bf16 %v4388_v22, %v4387_v16 }
 0xbc5   :  { %4938 = vperm.xlu2 %4936, %v4937_v50  }
 0xbcd   :  { %4012 = vperm.xlu2 %4936, %v62_v53  }
 0xbd4   :  { %v3922_v12 = vpop.xlane.xlu1 %3921 }
 0xbd5   :  { %vm3928_vm1 = vcmp.lt.f32.partialorder %v3922_v12, %v5048_v29 }
 0xbd6   :  { %v4389_v4 = vsel %vm3928_vm1, 1.0, %v7451_v36 }
 0xbf2   :  { %v3925_v28 = vpop.xlane.xlu0 %3924 }
 0xbf3   :  { %vm3929_vm0 = vcmp.lt.f32.partialorder %v3925_v28, %v5048_v29 }
 0xbf4   :  { %v4390_v0 = vsel %vm3929_vm0, 1.0, %v7451_v36 }
 0xbf5   :  { %v4943_v20 = vpack.i.bf16 %v4390_v0, %v4389_v4 }
 0xbf7   :  { %4944 = vperm.xlu1 %4942, %v4943_v20  }
 0xc05   :  { %v4008_v30 = vpop.permute.xlu0 %4007 }
 0xc06   :  { %v4010_v40 = vperm.slane %v4008_v30, 0 }
 0xc08   :  { %5029 = vrcp.f32 %v4010_v40  ;;  %vm4021_vm5 = vweird.f32 %v4010_v40  ;;  %v4027_v11 = vand.u32 2147483648, %v4010_v40  ;;  %v4025_v55 = vand.u32 2147483647, %v4010_v40 }
 0xc0a   :  { %v4028_v41 = vor.u32 1.1754944e-38, %v4027_v11  ;;  %vm4026_vm10 = vcmp.eq.f32.partialorder %v4025_v55, 8.507059e+37 }
 0xc0e   :  { %v5030_v47 = vpop.eup %5029 }
 0xc0f   :  { %v4017_v8 = vmul.f32 %v5030_v47, %v4010_v40  ;;  %vm4022_vm15 = vweird.f32 %v5030_v47 }
 0xc10   :  { %vm4023_vm11 = vmor %vm4021_vm5, %vm4022_vm15 }
 0xc11   :  { %v4018_v27 = vsub.f32 1.0, %v4017_v8 }
 0xc13   :  { %v4019_v3 = vmul.f32 %v5030_v47, %v4018_v27 }
 0xc15   :  { %v4020_v46 = vadd.f32 %v5030_v47, %v4019_v3 }
 0xc17   :  { %v4024_v54 = vsel %vm4023_vm11, %v5030_v47, %v4020_v46 }
 0xc18   :  { %v4029_v49 = vsel %vm4026_vm10, %v4028_v41, %v4024_v54 }
 0xc1f   :  { %v4939_v63 = vpop.permute.xlu2 %4938 }
 0xc20   :  { %v4941_v33 = vunpack.i.h.bf16 %v4939_v63  ;;  %v4940_v19 = vunpack.i.l.bf16 %v4939_v63 }
 0xc22   :  { %v3963_v15 = vmul.f32 %v4941_v33, %v3939_v9  ;;  %v3962_v45 = vmul.f32 %v4940_v19, %v3938_v10 }
 0xc24   :  { %v3967_v36 = vmax.f32 %v3963_v15, 0.0  ;;  %v3966_v52 = vmax.f32 %v3962_v45, 0.0  ;;  %v4056_v45 = vld [vmem:[%s7274_s13] sm:$0x1]  ;;  %s5055_s13 = smov 64  }
 0xc26   :  { %v3971_v31 = vsel %vm7746_vm7, %v3967_v36, -inf  ;;  %v3989_v18 = vsel %vm7747_vm6, %v3967_v36, 0.0  ;;  %v3970_v59 = vsel %vm7748_vm14, %v3966_v52, -inf  ;;  %v3988_v5 = vsel %vm7749_vm3, %v3966_v52, 0.0  ;;  %vm7754_vm7 = vmmov %vm7751_vm2 }
 0xc27   :  { %v7227_v48 = vmax.f32 %v3970_v59, %v3971_v31  ;;  %v3990_v39 = vadd.f32 %v3989_v18, %v3988_v5  ;;  %v4013_v38 = vpop.permute.xlu2 %4012  ;;  %vm4059_vm6 = vcmask 516096   ;;  %v20_v18 = vstv %s7275_s14  ;;  %vm7755_vm14 = vmmov %vm7751_vm2 }
 0xc28   :  { %v4015_v17 = vperm.slane %v4013_v38, 0  ;;  %21 = vst [vmem:[#allocation2] sm:$0x1] %v20_v18 }
 0xc29   :  { %v3991_v25 = vrot.slane %v3990_v39, 4  ;;  %v3973_v8 = vrot.slane %v7227_v48, 4 }
 0xc2a   :  { %5031 = vrcp.f32 %v4015_v17  ;;  %vm4036_vm13 = vweird.f32 %v4015_v17  ;;  %v4042_v53 = vand.u32 2147483648, %v4015_v17  ;;  %v4040_v28 = vand.u32 2147483647, %v4015_v17 }
 0xc2b   :  { %v3992_v42 = vadd.f32 %v3991_v25, %v3990_v39  ;;  %v3974_v10 = vmax.f32 %v7227_v48, %v3973_v8 }
 0xc2c   :  { %v4043_v0 = vor.u32 1.1754944e-38, %v4042_v53  ;;  %vm4041_vm0 = vcmp.eq.f32.partialorder %v4040_v28, 8.507059e+37 }
 0xc2d   :  { %v3993_v23 = vrot.slane %v3992_v42, 2  ;;  %v3975_v9 = vrot.slane %v3974_v10, 2 }
 0xc2f   :  { %v3994_v7 = vadd.f32 %v3993_v23, %v3992_v42  ;;  %v3976_v33 = vmax.f32 %v3974_v10, %v3975_v9  ;;  %v4066_v23 = vld [vmem:[#allocation2] sm:$0x1] }
 0xc30   :  { %v5032_v44 = vpop.eup %5031 }
 0xc31   :  { %v3995_v32 = vrot.slane %v3994_v7, 1  ;;  %v4032_v61 = vmul.f32 %v5032_v44, %v4015_v17  ;;  %vm4037_vm8 = vweird.f32 %v5032_v44  ;;  %v3977_v19 = vrot.slane %v3976_v33, 1 }
 0xc32   :  { %vm4038_vm1 = vmor %vm4036_vm13, %vm4037_vm8  ;;  %vm4118_vm13 = vcmask 531456  }
 0xc33   :  { %v3996_v57 = vadd.f32 %v3995_v32, %v3994_v7  ;;  %v4033_v43 = vsub.f32 1.0, %v4032_v61  ;;  %v3978_v15 = vmax.f32 %v3976_v33, %v3977_v19 }
 0xc35   :  { %v4030_v35 = vmul.f32 %v4029_v49, %v3996_v57  ;;  %v4034_v50 = vmul.f32 %v5032_v44, %v4033_v43 }
 0xc37   :  { %4048 = vrot.lane.b32.xlu1 %v4030_v35, %s5054_s3  ;;  %v4035_v29 = vadd.f32 %v5032_v44, %v4034_v50 }
 0xc39   :  { %v4039_v30 = vsel %vm4038_vm1, %v5032_v44, %v4035_v29 }
 0xc3a   :  { %v4044_v47 = vsel %vm4041_vm0, %v4043_v0, %v4039_v30 }
 0xc69   :  { %v4945_v56 = vpop.permute.xlu1 %4944 }
 0xc6a   :  { %v4947_v34 = vunpack.i.h.bf16 %v4945_v56  ;;  %v4946_v62 = vunpack.i.l.bf16 %v4945_v56 }
 0xc6c   :  { %v3965_v51 = vmul.f32 %v4947_v34, %v3941_v6  ;;  %v3964_v14 = vmul.f32 %v4946_v62, %v3940_v2 }
 0xc6e   :  { %v3969_v13 = vmax.f32 %v3965_v51, 0.0  ;;  %v3968_v1 = vmax.f32 %v3964_v14, 0.0 }
 0xc70   :  { %v3980_v24 = vsel %vm7750_vm9, %v3969_v13, -inf  ;;  %v3998_v26 = vsel %vm7751_vm2, %v3969_v13, 0.0  ;;  %v3979_v16 = vsel %vm7752_vm4, %v3968_v1, -inf  ;;  %v3997_v22 = vsel %vm7753_vm12, %v3968_v1, 0.0 }
 0xc71   :  { %v3981_v37 = vmax.f32 %v3979_v16, %v3980_v24  ;;  %v3999_v60 = vadd.f32 %v3998_v26, %v3997_v22  ;;  %vm4115_vm12 = vcmask 523264  }
 0xc73   :  { %v4000_v21 = vrot.slane %v3999_v60, 4  ;;  %v3982_v59 = vrot.slane %v3981_v37, 4 }
 0xc75   :  { %v4001_v58 = vadd.f32 %v4000_v21, %v3999_v60  ;;  %v3983_v5 = vmax.f32 %v3981_v37, %v3982_v59 }
 0xc77   :  { %v4002_v12 = vrot.slane %v4001_v58, 2  ;;  %v3984_v48 = vrot.slane %v3983_v5, 2 }
 0xc79   :  { %v4003_v4 = vadd.f32 %v4002_v12, %v4001_v58  ;;  %v3985_v39 = vmax.f32 %v3983_v5, %v3984_v48 }
 0xc7b   :  { %v4004_v20 = vrot.slane %v4003_v4, 1  ;;  %v3986_v3 = vrot.slane %v3985_v39, 1 }
 0xc7d   :  { %v4005_v40 = vadd.f32 %v4004_v20, %v4003_v4  ;;  %v3987_v25 = vmax.f32 %v3985_v39, %v3986_v3 }
 0xc7f   :  { %v4045_v63 = vmul.f32 %v4044_v47, %v4005_v40 }
 0xc81   :  { %4050 = vrot.lane.b32.xlu2 %v4045_v63, %s5054_s3 }
 0xca9   :  { %v4049_v27 = vpop.permute.xlu1 %4048 }
 0xcaa   :  { %v7245_v36 = vsel %vm7754_vm7, %v3978_v15, %v4049_v27 }
 0xcab   :  { %v4057_v52 = vmul.f32 %v4056_v45, %v7245_v36 }
 0xcad   :  { %v4060_v31 = vsel %vm4059_vm6, %v4057_v52, 0.0 }
 0xcae   :  { %4061 = vadd.xlane.f32.xlu1 %v4060_v31 }
 0xcdb   :  { %v4051_v11 = vpop.permute.xlu2 %4050 }
 0xcdc   :  { %v4055_v42 = vsel %vm7755_vm14, %v3987_v25, %v4051_v11 }
 0xcdd   :  { %v4058_v46 = vmul.f32 %v4056_v45, %v4055_v42 }
 0xcdf   :  { %v4063_v55 = vsel %vm4059_vm6, %v4058_v46, 0.0 }
 0xce0   :  { %4064 = vadd.xlane.f32.xlu2 %v4063_v55 }
 0xd21   :  { %v4062_v41 = vpop.xlane.xlu1 %4061 }
 0xd22   :  { %v4067_v7 = vadd.f32 %v4066_v23, %v4062_v41 }
 0xd24   :  { %v4391_v54 = vmul.f32 -1.442695, %v4067_v7 }
 0xd26   :  { %5033 = vpow2.f32 %v4391_v54 }
 0xd2c   :  { %v5034_v32 = vpop.eup %5033 }
 0xd2d   :  { %v4075_v49 = vadd.f32 1.0, %v5034_v32 }
 0xd2f   :  { %5035 = vrcp.f32 %v4075_v49  ;;  %v4088_v17 = vand.u32 2147483648, %v4075_v49  ;;  %v4086_v56 = vand.u32 2147483647, %v4075_v49  ;;  %vm4082_vm5 = vweird.f32 %v4075_v49 }
 0xd31   :  { %v4089_v6 = vor.u32 1.1754944e-38, %v4088_v17  ;;  %vm4087_vm11 = vcmp.eq.f32.partialorder %v4086_v56, 8.507059e+37 }
 0xd35   :  { %v5036_v57 = vpop.eup %5035 }
 0xd36   :  { %v4078_v35 = vmul.f32 %v5036_v57, %v4075_v49  ;;  %vm4083_vm3 = vweird.f32 %v5036_v57 }
 0xd37   :  { %vm4084_vm15 = vmor %vm4082_vm5, %vm4083_vm3 }
 0xd38   :  { %v4079_v38 = vsub.f32 1.0, %v4078_v35 }
 0xd3a   :  { %v4080_v44 = vmul.f32 %v5036_v57, %v4079_v38 }
 0xd3c   :  { %v4081_v2 = vadd.f32 %v5036_v57, %v4080_v44 }
 0xd3e   :  { %v4085_v34 = vsel %vm4084_vm15, %v5036_v57, %v4081_v2 }
 0xd3f   :  { %v4090_v62 = vsel %vm4087_vm11, %v4089_v6, %v4085_v34 }
 0xd40   :  { %4109 = vrot.lane.b32.xlu0 %v4090_v62, %s5055_s13 }
 0xd53   :  { %v4065_v61 = vpop.xlane.xlu2 %4064 }
 0xd54   :  { %v4068_v51 = vadd.f32 %v4066_v23, %v4065_v61 }
 0xd56   :  { %v4392_v14 = vmul.f32 -1.442695, %v4068_v51 }
 0xd58   :  { %5037 = vpow2.f32 %v4392_v14 }
 0xd5e   :  { %v5038_v13 = vpop.eup %5037 }
 0xd5f   :  { %v4076_v1 = vadd.f32 1.0, %v5038_v13 }
 0xd61   :  { %5039 = vrcp.f32 %v4076_v1  ;;  %v4103_v16 = vand.u32 2147483648, %v4076_v1  ;;  %v4101_v37 = vand.u32 2147483647, %v4076_v1  ;;  %vm4097_vm9 = vweird.f32 %v4076_v1 }
 0xd63   :  { %v4104_v50 = vor.u32 1.1754944e-38, %v4103_v16  ;;  %vm4102_vm4 = vcmp.eq.f32.partialorder %v4101_v37, 8.507059e+37 }
 0xd67   :  { %v5040_v43 = vpop.eup %5039 }
 0xd68   :  { %v4093_v24 = vmul.f32 %v5040_v43, %v4076_v1  ;;  %vm4098_vm10 = vweird.f32 %v5040_v43 }
 0xd69   :  { %vm4099_vm2 = vmor %vm4097_vm9, %vm4098_vm10 }
 0xd6a   :  { %v4094_v26 = vsub.f32 1.0, %v4093_v24 }
 0xd6c   :  { %v4095_v22 = vmul.f32 %v5040_v43, %v4094_v26 }
 0xd6e   :  { %v4096_v60 = vadd.f32 %v5040_v43, %v4095_v22 }
 0xd70   :  { %v4100_v21 = vsel %vm4099_vm2, %v5040_v43, %v4096_v60 }
 0xd71   :  { %v4105_v58 = vsel %vm4102_vm4, %v4104_v50, %v4100_v21 }
 0xd72   :  { %4111 = vrot.lane.b32.xlu0 %v4105_v58, %s5055_s13 }
 0xdb2   :  { %v4110_v53 = vpop.permute.xlu0 %4109 }
 0xdb3   :  { %v4116_v12 = vsel %vm4115_vm12, %v7245_v36, %v4110_v53 }
 0xdb4   :  { %v4119_v29 = vsel %vm4118_vm13, %v4116_v12, 0.0 }
 0xdb5   :  { %4121 = vst [vmem:[%s7276_s15] sm:$0x1] %v4119_v29 }
 0xde4   :  { %v4112_v28 = vpop.permute.xlu0 %4111 }
 0xde5   :  { %v4117_v4 = vsel %vm4115_vm12, %v4055_v42, %v4112_v28 }
 0xde6   :  { %v4120_v0 = vsel %vm4118_vm13, %v4117_v4, 0.0 }
 0xde7   :  { %4122 = vst [vmem:[%s7276_s15 + $0x1] sm:$0x1] %v4120_v0 }

</bundles_post_ra>
